<compile_context>
chip_gen: v5e
topology: v5e:2x2
jax: 0.10.0
libtpu: 0.0.40
codegen_flags: <defaults>
</compile_context>

<pallas_src>
import math
import functools

import jax
import jax.numpy as jnp
from jax.experimental import pallas as pl
from jax.experimental.pallas import tpu as pltpu


# ----------------------------- fused Pallas kernel ---------------------------

def _fused_forward_kernel(
    x_ref, pe_ref,
    emb_w_ref, emb_b_ref, ln_g_ref, ln_b_ref,
    wqkv_ref, bqkv_ref, wo_ref, bo_ref, ln1_g_ref, ln1_b_ref,
    w1_ref, b1_ref, w2_ref, b2_ref, ln2_g_ref, ln2_b_ref,
    out_w_ref, out_b_ref, bn_scale_ref, bn_shift_ref,
    o_ref,
    *, B, S, E, H, n_layers, n_out, eps):
  Dh = E // H
  scale = 1.0 / math.sqrt(Dh)

  def mm(a, w_bf16, b_f32):
    # bf16 inputs to the MXU, f32 accumulation; bias add in f32.
    return jnp.dot(a.astype(jnp.bfloat16), w_bf16,
                   preferred_element_type=jnp.float32) + b_f32

  def layer_norm(h, g, b):
    mean = jnp.mean(h, axis=-1, keepdims=True)
    hc = h - mean
    var = jnp.mean(hc * hc, axis=-1, keepdims=True)  # biased var (PyTorch LN)
    return hc * jax.lax.rsqrt(var + eps) * g + b

  # --- embedding Linear + positional encoding + outer LayerNorm -------------
  h = mm(x_ref[...].astype(jnp.float32), emb_w_ref[...], emb_b_ref[...])
  h = h + pe_ref[...]                       # batch-indexed PE (PyTorch semantics)
  h = layer_norm(h, ln_g_ref[...], ln_b_ref[...])

  # --- encoder layers (post-norm, ReLU FFN, dropout = identity in eval) -----
  for l in range(n_layers):
    # fused QKV projection: (B*S, E) @ (E, 3E)
    qkv = mm(h, wqkv_ref[l], bqkv_ref[l])
    q = qkv[:, 0:E] * scale                 # pre-scale q once per layer
    k = qkv[:, E:2 * E]
    v = qkv[:, 2 * E:3 * E]

    # per-(batch, head) attention with static slices — everything stays in VMEM
    batch_outs = []
    for b in range(B):
      r0 = b * S
      head_outs = []
      for hh in range(H):
        c0 = hh * Dh
        qb = q[r0:r0 + S, c0:c0 + Dh]
        kb = k[r0:r0 + S, c0:c0 + Dh]
        vb = v[r0:r0 + S, c0:c0 + Dh]
        s = jnp.dot(qb, kb.T, preferred_element_type=jnp.float32)
        m = jnp.max(s, axis=-1, keepdims=True)
        p = jnp.exp(s - m)
        p = p * pl.reciprocal(jnp.sum(p, axis=-1, keepdims=True), approx=False)
        head_outs.append(jnp.dot(p, vb, preferred_element_type=jnp.float32))
      batch_outs.append(jnp.concatenate(head_outs, axis=-1))   # (S, E)
    a = jnp.concatenate(batch_outs, axis=0)                    # (B*S, E)

    # output projection + residual + LN1
    a = mm(a, wo_ref[l], bo_ref[l])
    h = layer_norm(h + a, ln1_g_ref[l], ln1_b_ref[l])

    # fused FFN: Linear -> ReLU -> Linear -> residual -> LN2
    ff = mm(h, w1_ref[l], b1_ref[l])
    ff = jnp.maximum(ff, 0.0)
    ff = mm(ff, w2_ref[l], b2_ref[l])
    h = layer_norm(h + ff, ln2_g_ref[l], ln2_b_ref[l])

  # --- last token per sequence -> Linear -> BatchNorm1d(eval) -> Sigmoid ----
  last = jnp.concatenate(
      [h[b * S + S - 1:b * S + S, :] for b in range(B)], axis=0)   # (B, E)

  z = jnp.dot(last, out_w_ref[...], preferred_element_type=jnp.float32)
  z = z + out_b_ref[...]
  z = z * bn_scale_ref[...] + bn_shift_ref[...]
  sig = jax.nn.sigmoid(z)                                          # (B, n_out)

  lanes = o_ref.shape[1]
  if n_out == 1:
    # lane-dense store: broadcast the single logit across all 128 lanes
    o_ref[...] = jnp.broadcast_to(sig, (sig.shape[0], lanes))
  else:
    o_ref[...] = jnp.concatenate(
        [sig, jnp.zeros((sig.shape[0], lanes - n_out), jnp.float32)], axis=-1)


# --------------------------- parameter packing -------------------------------

def pack_params(params):
  """Stack per-layer params across layers and cast matmul weights to bf16."""
  def stack(fn):
    return jnp.stack([fn(p) for p in params["layers"]], axis=0)

  return {
      "emb_w": params["emb_w"].astype(jnp.bfloat16),
      "emb_b": params["emb_b"].reshape(1, -1),
      "ln_g": params["ln_g"].reshape(1, -1),
      "ln_b": params["ln_b"].reshape(1, -1),
      # fused QKV weight (L, E, 3E) and bias (L, 1, 3E)
      "wqkv": stack(lambda p: jnp.concatenate(
          [p["wq"], p["wk"], p["wv"]], axis=1)).astype(jnp.bfloat16),
      "bqkv": stack(lambda p: jnp.concatenate(
          [p["bq"], p["bk"], p["bv"]], axis=0).reshape(1, -1)),
      "wo": stack(lambda p: p["wo"]).astype(jnp.bfloat16),
      "bo": stack(lambda p: p["bo"].reshape(1, -1)),
      "ln1_g": stack(lambda p: p["ln1_g"].reshape(1, -1)),
      "ln1_b": stack(lambda p: p["ln1_b"].reshape(1, -1)),
      "w1": stack(lambda p: p["w1"]).astype(jnp.bfloat16),
      "b1": stack(lambda p: p["b1"].reshape(1, -1)),
      "w2": stack(lambda p: p["w2"]).astype(jnp.bfloat16),
      "b2": stack(lambda p: p["b2"].reshape(1, -1)),
      "ln2_g": stack(lambda p: p["ln2_g"].reshape(1, -1)),
      "ln2_b": stack(lambda p: p["ln2_b"].reshape(1, -1)),
      "out_w": params["out_w"],                      # (E, n_out), kept f32 (tiny)
      "out_b": params["out_b"].reshape(1, -1),
      "bn_scale": params["bn_scale"].reshape(1, -1),
      "bn_shift": params["bn_shift"].reshape(1, -1),
  }


# ------------------------------- forward -------------------------------------

def forward(x, params, n_head):
  B, S, F = x.shape
  E = params["emb_w"].shape[1]
  L = len(params["layers"])
  N_OUT = params["out_w"].shape[1]

  pk = pack_params(params)
  x2 = x.reshape(B * S, F)
  # PositionalEncoding: x + pe[:x.size(0)] — batch-indexed, broadcast over seq.
  pe_bs = jnp.broadcast_to(params["pe"][:B], (B, S, E)).reshape(B * S, E)

  out_lanes = max(128, ((N_OUT + 127) // 128) * 128)   # lane-dense output slab

  kernel = functools.partial(
      _fused_forward_kernel,
      B=B, S=S, E=E, H=n_head, n_layers=L, n_out=N_OUT, eps=1e-5)

  operands = (x2, pe_bs,
              pk["emb_w"], pk["emb_b"], pk["ln_g"], pk["ln_b"],
              pk["wqkv"], pk["bqkv"], pk["wo"], pk["bo"],
              pk["ln1_g"], pk["ln1_b"],
              pk["w1"], pk["b1"], pk["w2"], pk["b2"],
              pk["ln2_g"], pk["ln2_b"],
              pk["out_w"], pk["out_b"], pk["bn_scale"], pk["bn_shift"])

  out_padded = pl.pallas_call(
      kernel,
      out_shape=jax.ShapeDtypeStruct((B, out_lanes), jnp.float32),
      in_specs=[pl.BlockSpec(memory_space=pltpu.MemorySpace.VMEM)
                for _ in operands],
      out_specs=pl.BlockSpec(memory_space=pltpu.MemorySpace.VMEM),
      compiler_params=pltpu.CompilerParams(vmem_limit_bytes=64 << 20),
  )(*operands)

  out = out_padded[:, :N_OUT]
  if N_OUT == 1:
    out = out[:, 0]            # matches torch .squeeze(dim=1)
  return out


# ------------------------- pure-JAX f32 reference ----------------------------

def forward_reference(x, params, n_head):
  B, S, F = x.shape
  E = params["emb_w"].shape[1]
  H = n_head
  Dh = E // H
  eps = 1e-5

  def ln(h, g, b):
    m = jnp.mean(h, -1, keepdims=True)
    v = jnp.mean((h - m) ** 2, -1, keepdims=True)
    return (h - m) * jax.lax.rsqrt(v + eps) * g + b

  h = x @ params["emb_w"] + params["emb_b"]
  h = h + params["pe"][:B]                      # (B,1,E) broadcast over seq
  h = ln(h, params["ln_g"], params["ln_b"])
  for p in params["layers"]:
    q = h @ p["wq"] + p["bq"]
    k = h @ p["wk"] + p["bk"]
    v = h @ p["wv"] + p["bv"]

    def split(t):
      return t.reshape(B, S, H, Dh).transpose(0, 2, 1, 3)

    qh, kh, vh = split(q), split(k), split(v)
    s = jnp.einsum("bhqd,bhkd->bhqk", qh, kh) / math.sqrt(Dh)
    attn = jax.nn.softmax(s, axis=-1)
    a = jnp.einsum("bhqk,bhkd->bhqd", attn, vh)
    a = a.transpose(0, 2, 1, 3).reshape(B, S, E)
    a = a @ p["wo"] + p["bo"]
    h = ln(h + a, p["ln1_g"], p["ln1_b"])
    ff = jnp.maximum(h @ p["w1"] + p["b1"], 0.0) @ p["w2"] + p["b2"]
    h = ln(h + ff, p["ln2_g"], p["ln2_b"])
  last = h[:, -1, :]
  z = last @ params["out_w"] + params["out_b"]
  z = z * params["bn_scale"] + params["bn_shift"]
  out = jax.nn.sigmoid(z)
  if params["out_w"].shape[1] == 1:
    out = out[:, 0]
  return out


# ----------------------------- parameter init --------------------------------

def init_linear_params(key, fan_in, fan_out):
  kw, kb = jax.random.split(key)
  bound = 1.0 / math.sqrt(fan_in)
  w = jax.random.uniform(kw, (fan_in, fan_out), jnp.float32, -bound, bound)
  b = jax.random.uniform(kb, (fan_out,), jnp.float32, -bound, bound)
  return w, b


def make_positional_encoding(max_len, E):
  position = jnp.arange(max_len, dtype=jnp.float32)[:, None]
  div_term = jnp.exp(jnp.arange(0, E, 2, dtype=jnp.float32)
                     * (-math.log(10000.0) / E))
  pe = jnp.zeros((max_len, E), jnp.float32)
  pe = pe.at[:, 0::2].set(jnp.sin(position * div_term))
  pe = pe.at[:, 1::2].set(jnp.cos(position * div_term))
  return pe[:, None, :]                                   # (max_len, 1, E)


def init_params(key, n_features, E, n_layers, n_out, d_ff, max_len=64):
  keys = jax.random.split(key, 2 + 6 * n_layers)
  ki = iter(keys)

  params = {}
  params["emb_w"], params["emb_b"] = init_linear_params(next(ki), n_features, E)
  params["pe"] = make_positional_encoding(max_len, E)
  params["ln_g"] = jnp.ones((E,), jnp.float32)
  params["ln_b"] = jnp.zeros((E,), jnp.float32)

  layers = []
  for _ in range(n_layers):
    p = {}
    p["wq"], p["bq"] = init_linear_params(next(ki), E, E)
    p["wk"], p["bk"] = init_linear_params(next(ki), E, E)
    p["wv"], p["bv"] = init_linear_params(next(ki), E, E)
    p["wo"], p["bo"] = init_linear_params(next(ki), E, E)
    p["w1"], p["b1"] = init_linear_params(next(ki), E, d_ff)
    p["w2"], p["b2"] = init_linear_params(next(ki), d_ff, E)
    p["ln1_g"] = jnp.ones((E,), jnp.float32)
    p["ln1_b"] = jnp.zeros((E,), jnp.float32)
    p["ln2_g"] = jnp.ones((E,), jnp.float32)
    p["ln2_b"] = jnp.zeros((E,), jnp.float32)
    layers.append(p)
  params["layers"] = layers

  params["out_w"], params["out_b"] = init_linear_params(
      jax.random.PRNGKey(1234), E, n_out)
  # BatchNorm1d eval mode: running_mean=0, running_var=1, weight=1, bias=0
  eps = 1e-5
  gamma = jnp.ones((n_out,), jnp.float32)
  beta = jnp.zeros((n_out,), jnp.float32)
  running_mean = jnp.zeros((n_out,), jnp.float32)
  running_var = jnp.ones((n_out,), jnp.float32)
  params["bn_scale"] = gamma / jnp.sqrt(running_var + eps)
  params["bn_shift"] = beta - running_mean * params["bn_scale"]
  return params


# ---------------------------------- main --------------------------------------

if __name__ == "__main__":
  # Small shapes consistent with the module: (batch, seq, n_features)
  B, S, F = 2, 8, 16
  E, H, L = 32, 4, 2
  N_OUT = 1
  D_FF = 2048  # nn.TransformerEncoderLayer default dim_feedforward

  key = jax.random.PRNGKey(0)
  k_params, k_x = jax.random.split(key)

  params = init_params(k_params, F, E, L, N_OUT, D_FF)
  x = jax.random.normal(k_x, (B, S, F), dtype=jnp.float32)

  fwd = jax.jit(forward, static_argnums=(2,))
  out = fwd(x, params, H)
  out = jax.block_until_ready(out)

  assert out.shape == (B,), out.shape
  assert jnp.all(jnp.isfinite(out)) and jnp.all(out >= 0.0) and jnp.all(out <= 1.0)

  # Correctness against a pure-JAX f32 reference (bf16 matmul weights in the
  # kernel introduce small, bounded error).
  ref = jax.block_until_ready(forward_reference(x, params, H))
  assert ref.shape == (B,), ref.shape
  assert float(jnp.max(jnp.abs(out - ref))) < 3e-2, (out, ref)

  print("KERNEL_OK")
</pallas_src>

<mosaic_0001>
module attributes {stable_mosaic.version = 11 : i64} {
  func.func @_fused_forward_kernel(%arg0: memref<16x16xf32, #tpu.memory_space<vmem>>, %arg1: memref<16x32xf32, #tpu.memory_space<vmem>>, %arg2: memref<16x32xbf16, #tpu.memory_space<vmem>>, %arg3: memref<1x32xf32, #tpu.memory_space<vmem>>, %arg4: memref<1x32xf32, #tpu.memory_space<vmem>>, %arg5: memref<1x32xf32, #tpu.memory_space<vmem>>, %arg6: memref<2x32x96xbf16, #tpu.memory_space<vmem>>, %arg7: memref<2x1x96xf32, #tpu.memory_space<vmem>>, %arg8: memref<2x32x32xbf16, #tpu.memory_space<vmem>>, %arg9: memref<2x1x32xf32, #tpu.memory_space<vmem>>, %arg10: memref<2x1x32xf32, #tpu.memory_space<vmem>>, %arg11: memref<2x1x32xf32, #tpu.memory_space<vmem>>, %arg12: memref<2x32x2048xbf16, #tpu.memory_space<vmem>>, %arg13: memref<2x1x2048xf32, #tpu.memory_space<vmem>>, %arg14: memref<2x2048x32xbf16, #tpu.memory_space<vmem>>, %arg15: memref<2x1x32xf32, #tpu.memory_space<vmem>>, %arg16: memref<2x1x32xf32, #tpu.memory_space<vmem>>, %arg17: memref<2x1x32xf32, #tpu.memory_space<vmem>>, %arg18: memref<32x1xf32, #tpu.memory_space<vmem>>, %arg19: memref<1x1xf32, #tpu.memory_space<vmem>>, %arg20: memref<1x1xf32, #tpu.memory_space<vmem>>, %arg21: memref<1x1xf32, #tpu.memory_space<vmem>>, %arg22: memref<2x128xf32, #tpu.memory_space<vmem>>) attributes {dimension_semantics = [], scalar_prefetch = 0 : i64, scratch_operands = 0 : i64, tpu.core_type = #tpu.core_type<tc>} {
    %c0 = arith.constant 0 : index
    %c0_0 = arith.constant 0 : index
    %0 = vector.load %arg0[%c0, %c0_0] : memref<16x16xf32, #tpu.memory_space<vmem>>, vector<16x16xf32>
    %c0_1 = arith.constant 0 : index
    %c0_2 = arith.constant 0 : index
    %1 = vector.load %arg2[%c0_1, %c0_2] : memref<16x32xbf16, #tpu.memory_space<vmem>>, vector<16x32xbf16>
    %c0_3 = arith.constant 0 : index
    %c0_4 = arith.constant 0 : index
    %2 = vector.load %arg3[%c0_3, %c0_4] : memref<1x32xf32, #tpu.memory_space<vmem>>, vector<1x32xf32>
    %3 = arith.truncf %0 : vector<16x16xf32> to vector<16x16xbf16>
    %cst = arith.constant dense<0.000000e+00> : vector<16x32xf32>
    %4 = tpu.matmul %3, %1, %cst {dimension_numbers = #tpu.dot_dimension_numbers<[1], [0], [0], [1], [0, 0, 1, 1], [], []>} : vector<16x16xbf16>, vector<16x32xbf16>, vector<16x32xf32> -> vector<16x32xf32>
    %5 = vector.broadcast %2 : vector<1x32xf32> to vector<16x32xf32>
    %6 = arith.addf %4, %5 : vector<16x32xf32>
    %c0_5 = arith.constant 0 : index
    %c0_6 = arith.constant 0 : index
    %7 = vector.load %arg1[%c0_5, %c0_6] : memref<16x32xf32, #tpu.memory_space<vmem>>, vector<16x32xf32>
    %8 = arith.addf %6, %7 : vector<16x32xf32>
    %c0_7 = arith.constant 0 : index
    %c0_8 = arith.constant 0 : index
    %9 = vector.load %arg4[%c0_7, %c0_8] : memref<1x32xf32, #tpu.memory_space<vmem>>, vector<1x32xf32>
    %c0_9 = arith.constant 0 : index
    %c0_10 = arith.constant 0 : index
    %10 = vector.load %arg5[%c0_9, %c0_10] : memref<1x32xf32, #tpu.memory_space<vmem>>, vector<1x32xf32>
    %cst_11 = arith.constant dense<0.000000e+00> : vector<16xf32>
    %11 = vector.multi_reduction <add>, %8, %cst_11 [1] : vector<16x32xf32> to vector<16xf32>
    %12 = vector.shape_cast %11 : vector<16xf32> to vector<16x1xf32>
    %cst_12 = arith.constant 3.200000e+01 : f32
    %13 = vector.broadcast %cst_12 : f32 to vector<16x1xf32>
    %14 = arith.divf %12, %13 : vector<16x1xf32>
    %15 = vector.broadcast %14 : vector<16x1xf32> to vector<16x32xf32>
    %16 = arith.subf %8, %15 : vector<16x32xf32>
    %17 = arith.mulf %16, %16 : vector<16x32xf32>
    %cst_13 = arith.constant dense<0.000000e+00> : vector<16xf32>
    %18 = vector.multi_reduction <add>, %17, %cst_13 [1] : vector<16x32xf32> to vector<16xf32>
    %19 = vector.shape_cast %18 : vector<16xf32> to vector<16x1xf32>
    %cst_14 = arith.constant 3.200000e+01 : f32
    %20 = vector.broadcast %cst_14 : f32 to vector<16x1xf32>
    %21 = arith.divf %19, %20 : vector<16x1xf32>
    %cst_15 = arith.constant 9.99999974E-6 : f32
    %22 = vector.broadcast %cst_15 : f32 to vector<16x1xf32>
    %23 = arith.addf %21, %22 : vector<16x1xf32>
    %24 = math.rsqrt %23 : vector<16x1xf32>
    %25 = vector.broadcast %24 : vector<16x1xf32> to vector<16x32xf32>
    %26 = arith.mulf %16, %25 : vector<16x32xf32>
    %27 = vector.broadcast %9 : vector<1x32xf32> to vector<16x32xf32>
    %28 = arith.mulf %26, %27 : vector<16x32xf32>
    %29 = vector.broadcast %10 : vector<1x32xf32> to vector<16x32xf32>
    %30 = arith.addf %28, %29 : vector<16x32xf32>
    %c0_16 = arith.constant 0 : index
    %c0_17 = arith.constant 0 : index
    %c0_18 = arith.constant 0 : index
    %31 = vector.load %arg6[%c0_16, %c0_17, %c0_18] : memref<2x32x96xbf16, #tpu.memory_space<vmem>>, vector<1x32x96xbf16>
    %32 = vector.shape_cast %31 : vector<1x32x96xbf16> to vector<32x96xbf16>
    %c0_19 = arith.constant 0 : index
    %c0_20 = arith.constant 0 : index
    %c0_21 = arith.constant 0 : index
    %33 = vector.load %arg7[%c0_19, %c0_20, %c0_21] : memref<2x1x96xf32, #tpu.memory_space<vmem>>, vector<1x1x96xf32>
    %34 = vector.shape_cast %33 : vector<1x1x96xf32> to vector<1x96xf32>
    %35 = arith.truncf %30 : vector<16x32xf32> to vector<16x32xbf16>
    %cst_22 = arith.constant dense<0.000000e+00> : vector<16x96xf32>
    %36 = tpu.matmul %35, %32, %cst_22 {dimension_numbers = #tpu.dot_dimension_numbers<[1], [0], [0], [1], [0, 0, 1, 1], [], []>} : vector<16x32xbf16>, vector<32x96xbf16>, vector<16x96xf32> -> vector<16x96xf32>
    %37 = vector.broadcast %34 : vector<1x96xf32> to vector<16x96xf32>
    %38 = arith.addf %36, %37 : vector<16x96xf32>
    %39 = vector.extract_strided_slice %38 {offsets = [0, 0], sizes = [16, 32], strides = [1, 1]} : vector<16x96xf32> to vector<16x32xf32>
    %cst_23 = arith.constant 0.353553385 : f32
    %40 = vector.broadcast %cst_23 : f32 to vector<16x32xf32>
    %41 = arith.mulf %39, %40 : vector<16x32xf32>
    %42 = vector.extract_strided_slice %38 {offsets = [0, 32], sizes = [16, 32], strides = [1, 1]} : vector<16x96xf32> to vector<16x32xf32>
    %43 = vector.extract_strided_slice %38 {offsets = [0, 64], sizes = [16, 32], strides = [1, 1]} : vector<16x96xf32> to vector<16x32xf32>
    %44 = vector.extract_strided_slice %41 {offsets = [0, 0], sizes = [8, 8], strides = [1, 1]} : vector<16x32xf32> to vector<8x8xf32>
    %45 = vector.extract_strided_slice %42 {offsets = [0, 0], sizes = [8, 8], strides = [1, 1]} : vector<16x32xf32> to vector<8x8xf32>
    %46 = vector.extract_strided_slice %43 {offsets = [0, 0], sizes = [8, 8], strides = [1, 1]} : vector<16x32xf32> to vector<8x8xf32>
    %47 = tpu.transpose %45, [1, 0] : vector<8x8xf32> -> vector<8x8xf32>
    %cst_24 = arith.constant dense<0.000000e+00> : vector<8x8xf32>
    %48 = tpu.matmul %44, %47, %cst_24 {dimension_numbers = #tpu.dot_dimension_numbers<[1], [0], [0], [1], [0, 0, 1, 1], [], []>} : vector<8x8xf32>, vector<8x8xf32>, vector<8x8xf32> -> vector<8x8xf32>
    %cst_25 = arith.constant dense<0xFF800000> : vector<8xf32>
    %49 = vector.multi_reduction <maximumf>, %48, %cst_25 [1] : vector<8x8xf32> to vector<8xf32>
    %50 = vector.shape_cast %49 : vector<8xf32> to vector<8x1xf32>
    %51 = vector.broadcast %50 : vector<8x1xf32> to vector<8x8xf32>
    %52 = arith.subf %48, %51 : vector<8x8xf32>
    %53 = math.exp %52 : vector<8x8xf32>
    %cst_26 = arith.constant dense<0.000000e+00> : vector<8xf32>
    %54 = vector.multi_reduction <add>, %53, %cst_26 [1] : vector<8x8xf32> to vector<8xf32>
    %55 = vector.shape_cast %54 : vector<8xf32> to vector<8x1xf32>
    %56 = tpu.reciprocal %55 : vector<8x1xf32> -> vector<8x1xf32>
    %57 = vector.broadcast %56 : vector<8x1xf32> to vector<8x8xf32>
    %58 = arith.mulf %53, %57 : vector<8x8xf32>
    %cst_27 = arith.constant dense<0.000000e+00> : vector<8x8xf32>
    %59 = tpu.matmul %58, %46, %cst_27 {dimension_numbers = #tpu.dot_dimension_numbers<[1], [0], [0], [1], [0, 0, 1, 1], [], []>} : vector<8x8xf32>, vector<8x8xf32>, vector<8x8xf32> -> vector<8x8xf32>
    %60 = vector.extract_strided_slice %41 {offsets = [0, 8], sizes = [8, 8], strides = [1, 1]} : vector<16x32xf32> to vector<8x8xf32>
    %61 = vector.extract_strided_slice %42 {offsets = [0, 8], sizes = [8, 8], strides = [1, 1]} : vector<16x32xf32> to vector<8x8xf32>
    %62 = vector.extract_strided_slice %43 {offsets = [0, 8], sizes = [8, 8], strides = [1, 1]} : vector<16x32xf32> to vector<8x8xf32>
    %63 = tpu.transpose %61, [1, 0] : vector<8x8xf32> -> vector<8x8xf32>
    %cst_28 = arith.constant dense<0.000000e+00> : vector<8x8xf32>
    %64 = tpu.matmul %60, %63, %cst_28 {dimension_numbers = #tpu.dot_dimension_numbers<[1], [0], [0], [1], [0, 0, 1, 1], [], []>} : vector<8x8xf32>, vector<8x8xf32>, vector<8x8xf32> -> vector<8x8xf32>
    %cst_29 = arith.constant dense<0xFF800000> : vector<8xf32>
    %65 = vector.multi_reduction <maximumf>, %64, %cst_29 [1] : vector<8x8xf32> to vector<8xf32>
    %66 = vector.shape_cast %65 : vector<8xf32> to vector<8x1xf32>
    %67 = vector.broadcast %66 : vector<8x1xf32> to vector<8x8xf32>
    %68 = arith.subf %64, %67 : vector<8x8xf32>
    %69 = math.exp %68 : vector<8x8xf32>
    %cst_30 = arith.constant dense<0.000000e+00> : vector<8xf32>
    %70 = vector.multi_reduction <add>, %69, %cst_30 [1] : vector<8x8xf32> to vector<8xf32>
    %71 = vector.shape_cast %70 : vector<8xf32> to vector<8x1xf32>
    %72 = tpu.reciprocal %71 : vector<8x1xf32> -> vector<8x1xf32>
    %73 = vector.broadcast %72 : vector<8x1xf32> to vector<8x8xf32>
    %74 = arith.mulf %69, %73 : vector<8x8xf32>
    %cst_31 = arith.constant dense<0.000000e+00> : vector<8x8xf32>
    %75 = tpu.matmul %74, %62, %cst_31 {dimension_numbers = #tpu.dot_dimension_numbers<[1], [0], [0], [1], [0, 0, 1, 1], [], []>} : vector<8x8xf32>, vector<8x8xf32>, vector<8x8xf32> -> vector<8x8xf32>
    %76 = vector.extract_strided_slice %41 {offsets = [0, 16], sizes = [8, 8], strides = [1, 1]} : vector<16x32xf32> to vector<8x8xf32>
    %77 = vector.extract_strided_slice %42 {offsets = [0, 16], sizes = [8, 8], strides = [1, 1]} : vector<16x32xf32> to vector<8x8xf32>
    %78 = vector.extract_strided_slice %43 {offsets = [0, 16], sizes = [8, 8], strides = [1, 1]} : vector<16x32xf32> to vector<8x8xf32>
    %79 = tpu.transpose %77, [1, 0] : vector<8x8xf32> -> vector<8x8xf32>
    %cst_32 = arith.constant dense<0.000000e+00> : vector<8x8xf32>
    %80 = tpu.matmul %76, %79, %cst_32 {dimension_numbers = #tpu.dot_dimension_numbers<[1], [0], [0], [1], [0, 0, 1, 1], [], []>} : vector<8x8xf32>, vector<8x8xf32>, vector<8x8xf32> -> vector<8x8xf32>
    %cst_33 = arith.constant dense<0xFF800000> : vector<8xf32>
    %81 = vector.multi_reduction <maximumf>, %80, %cst_33 [1] : vector<8x8xf32> to vector<8xf32>
    %82 = vector.shape_cast %81 : vector<8xf32> to vector<8x1xf32>
    %83 = vector.broadcast %82 : vector<8x1xf32> to vector<8x8xf32>
    %84 = arith.subf %80, %83 : vector<8x8xf32>
    %85 = math.exp %84 : vector<8x8xf32>
    %cst_34 = arith.constant dense<0.000000e+00> : vector<8xf32>
    %86 = vector.multi_reduction <add>, %85, %cst_34 [1] : vector<8x8xf32> to vector<8xf32>
    %87 = vector.shape_cast %86 : vector<8xf32> to vector<8x1xf32>
    %88 = tpu.reciprocal %87 : vector<8x1xf32> -> vector<8x1xf32>
    %89 = vector.broadcast %88 : vector<8x1xf32> to vector<8x8xf32>
    %90 = arith.mulf %85, %89 : vector<8x8xf32>
    %cst_35 = arith.constant dense<0.000000e+00> : vector<8x8xf32>
    %91 = tpu.matmul %90, %78, %cst_35 {dimension_numbers = #tpu.dot_dimension_numbers<[1], [0], [0], [1], [0, 0, 1, 1], [], []>} : vector<8x8xf32>, vector<8x8xf32>, vector<8x8xf32> -> vector<8x8xf32>
    %92 = vector.extract_strided_slice %41 {offsets = [0, 24], sizes = [8, 8], strides = [1, 1]} : vector<16x32xf32> to vector<8x8xf32>
    %93 = vector.extract_strided_slice %42 {offsets = [0, 24], sizes = [8, 8], strides = [1, 1]} : vector<16x32xf32> to vector<8x8xf32>
    %94 = vector.extract_strided_slice %43 {offsets = [0, 24], sizes = [8, 8], strides = [1, 1]} : vector<16x32xf32> to vector<8x8xf32>
    %95 = tpu.transpose %93, [1, 0] : vector<8x8xf32> -> vector<8x8xf32>
    %cst_36 = arith.constant dense<0.000000e+00> : vector<8x8xf32>
    %96 = tpu.matmul %92, %95, %cst_36 {dimension_numbers = #tpu.dot_dimension_numbers<[1], [0], [0], [1], [0, 0, 1, 1], [], []>} : vector<8x8xf32>, vector<8x8xf32>, vector<8x8xf32> -> vector<8x8xf32>
    %cst_37 = arith.constant dense<0xFF800000> : vector<8xf32>
    %97 = vector.multi_reduction <maximumf>, %96, %cst_37 [1] : vector<8x8xf32> to vector<8xf32>
    %98 = vector.shape_cast %97 : vector<8xf32> to vector<8x1xf32>
    %99 = vector.broadcast %98 : vector<8x1xf32> to vector<8x8xf32>
    %100 = arith.subf %96, %99 : vector<8x8xf32>
    %101 = math.exp %100 : vector<8x8xf32>
    %cst_38 = arith.constant dense<0.000000e+00> : vector<8xf32>
    %102 = vector.multi_reduction <add>, %101, %cst_38 [1] : vector<8x8xf32> to vector<8xf32>
    %103 = vector.shape_cast %102 : vector<8xf32> to vector<8x1xf32>
    %104 = tpu.reciprocal %103 : vector<8x1xf32> -> vector<8x1xf32>
    %105 = vector.broadcast %104 : vector<8x1xf32> to vector<8x8xf32>
    %106 = arith.mulf %101, %105 : vector<8x8xf32>
    %cst_39 = arith.constant dense<0.000000e+00> : vector<8x8xf32>
    %107 = tpu.matmul %106, %94, %cst_39 {dimension_numbers = #tpu.dot_dimension_numbers<[1], [0], [0], [1], [0, 0, 1, 1], [], []>} : vector<8x8xf32>, vector<8x8xf32>, vector<8x8xf32> -> vector<8x8xf32>
    %108 = tpu.concatenate %59, %75, %91, %107 in 1 : vector<8x8xf32>, vector<8x8xf32>, vector<8x8xf32>, vector<8x8xf32> -> vector<8x32xf32>
    %109 = vector.extract_strided_slice %41 {offsets = [8, 0], sizes = [8, 8], strides = [1, 1]} : vector<16x32xf32> to vector<8x8xf32>
    %110 = vector.extract_strided_slice %42 {offsets = [8, 0], sizes = [8, 8], strides = [1, 1]} : vector<16x32xf32> to vector<8x8xf32>
    %111 = vector.extract_strided_slice %43 {offsets = [8, 0], sizes = [8, 8], strides = [1, 1]} : vector<16x32xf32> to vector<8x8xf32>
    %112 = tpu.transpose %110, [1, 0] : vector<8x8xf32> -> vector<8x8xf32>
    %cst_40 = arith.constant dense<0.000000e+00> : vector<8x8xf32>
    %113 = tpu.matmul %109, %112, %cst_40 {dimension_numbers = #tpu.dot_dimension_numbers<[1], [0], [0], [1], [0, 0, 1, 1], [], []>} : vector<8x8xf32>, vector<8x8xf32>, vector<8x8xf32> -> vector<8x8xf32>
    %cst_41 = arith.constant dense<0xFF800000> : vector<8xf32>
    %114 = vector.multi_reduction <maximumf>, %113, %cst_41 [1] : vector<8x8xf32> to vector<8xf32>
    %115 = vector.shape_cast %114 : vector<8xf32> to vector<8x1xf32>
    %116 = vector.broadcast %115 : vector<8x1xf32> to vector<8x8xf32>
    %117 = arith.subf %113, %116 : vector<8x8xf32>
    %118 = math.exp %117 : vector<8x8xf32>
    %cst_42 = arith.constant dense<0.000000e+00> : vector<8xf32>
    %119 = vector.multi_reduction <add>, %118, %cst_42 [1] : vector<8x8xf32> to vector<8xf32>
    %120 = vector.shape_cast %119 : vector<8xf32> to vector<8x1xf32>
    %121 = tpu.reciprocal %120 : vector<8x1xf32> -> vector<8x1xf32>
    %122 = vector.broadcast %121 : vector<8x1xf32> to vector<8x8xf32>
    %123 = arith.mulf %118, %122 : vector<8x8xf32>
    %cst_43 = arith.constant dense<0.000000e+00> : vector<8x8xf32>
    %124 = tpu.matmul %123, %111, %cst_43 {dimension_numbers = #tpu.dot_dimension_numbers<[1], [0], [0], [1], [0, 0, 1, 1], [], []>} : vector<8x8xf32>, vector<8x8xf32>, vector<8x8xf32> -> vector<8x8xf32>
    %125 = vector.extract_strided_slice %41 {offsets = [8, 8], sizes = [8, 8], strides = [1, 1]} : vector<16x32xf32> to vector<8x8xf32>
    %126 = vector.extract_strided_slice %42 {offsets = [8, 8], sizes = [8, 8], strides = [1, 1]} : vector<16x32xf32> to vector<8x8xf32>
    %127 = vector.extract_strided_slice %43 {offsets = [8, 8], sizes = [8, 8], strides = [1, 1]} : vector<16x32xf32> to vector<8x8xf32>
    %128 = tpu.transpose %126, [1, 0] : vector<8x8xf32> -> vector<8x8xf32>
    %cst_44 = arith.constant dense<0.000000e+00> : vector<8x8xf32>
    %129 = tpu.matmul %125, %128, %cst_44 {dimension_numbers = #tpu.dot_dimension_numbers<[1], [0], [0], [1], [0, 0, 1, 1], [], []>} : vector<8x8xf32>, vector<8x8xf32>, vector<8x8xf32> -> vector<8x8xf32>
    %cst_45 = arith.constant dense<0xFF800000> : vector<8xf32>
    %130 = vector.multi_reduction <maximumf>, %129, %cst_45 [1] : vector<8x8xf32> to vector<8xf32>
    %131 = vector.shape_cast %130 : vector<8xf32> to vector<8x1xf32>
    %132 = vector.broadcast %131 : vector<8x1xf32> to vector<8x8xf32>
    %133 = arith.subf %129, %132 : vector<8x8xf32>
    %134 = math.exp %133 : vector<8x8xf32>
    %cst_46 = arith.constant dense<0.000000e+00> : vector<8xf32>
    %135 = vector.multi_reduction <add>, %134, %cst_46 [1] : vector<8x8xf32> to vector<8xf32>
    %136 = vector.shape_cast %135 : vector<8xf32> to vector<8x1xf32>
    %137 = tpu.reciprocal %136 : vector<8x1xf32> -> vector<8x1xf32>
    %138 = vector.broadcast %137 : vector<8x1xf32> to vector<8x8xf32>
    %139 = arith.mulf %134, %138 : vector<8x8xf32>
    %cst_47 = arith.constant dense<0.000000e+00> : vector<8x8xf32>
    %140 = tpu.matmul %139, %127, %cst_47 {dimension_numbers = #tpu.dot_dimension_numbers<[1], [0], [0], [1], [0, 0, 1, 1], [], []>} : vector<8x8xf32>, vector<8x8xf32>, vector<8x8xf32> -> vector<8x8xf32>
    %141 = vector.extract_strided_slice %41 {offsets = [8, 16], sizes = [8, 8], strides = [1, 1]} : vector<16x32xf32> to vector<8x8xf32>
    %142 = vector.extract_strided_slice %42 {offsets = [8, 16], sizes = [8, 8], strides = [1, 1]} : vector<16x32xf32> to vector<8x8xf32>
    %143 = vector.extract_strided_slice %43 {offsets = [8, 16], sizes = [8, 8], strides = [1, 1]} : vector<16x32xf32> to vector<8x8xf32>
    %144 = tpu.transpose %142, [1, 0] : vector<8x8xf32> -> vector<8x8xf32>
    %cst_48 = arith.constant dense<0.000000e+00> : vector<8x8xf32>
    %145 = tpu.matmul %141, %144, %cst_48 {dimension_numbers = #tpu.dot_dimension_numbers<[1], [0], [0], [1], [0, 0, 1, 1], [], []>} : vector<8x8xf32>, vector<8x8xf32>, vector<8x8xf32> -> vector<8x8xf32>
    %cst_49 = arith.constant dense<0xFF800000> : vector<8xf32>
    %146 = vector.multi_reduction <maximumf>, %145, %cst_49 [1] : vector<8x8xf32> to vector<8xf32>
    %147 = vector.shape_cast %146 : vector<8xf32> to vector<8x1xf32>
    %148 = vector.broadcast %147 : vector<8x1xf32> to vector<8x8xf32>
    %149 = arith.subf %145, %148 : vector<8x8xf32>
    %150 = math.exp %149 : vector<8x8xf32>
    %cst_50 = arith.constant dense<0.000000e+00> : vector<8xf32>
    %151 = vector.multi_reduction <add>, %150, %cst_50 [1] : vector<8x8xf32> to vector<8xf32>
    %152 = vector.shape_cast %151 : vector<8xf32> to vector<8x1xf32>
    %153 = tpu.reciprocal %152 : vector<8x1xf32> -> vector<8x1xf32>
    %154 = vector.broadcast %153 : vector<8x1xf32> to vector<8x8xf32>
    %155 = arith.mulf %150, %154 : vector<8x8xf32>
    %cst_51 = arith.constant dense<0.000000e+00> : vector<8x8xf32>
    %156 = tpu.matmul %155, %143, %cst_51 {dimension_numbers = #tpu.dot_dimension_numbers<[1], [0], [0], [1], [0, 0, 1, 1], [], []>} : vector<8x8xf32>, vector<8x8xf32>, vector<8x8xf32> -> vector<8x8xf32>
    %157 = vector.extract_strided_slice %41 {offsets = [8, 24], sizes = [8, 8], strides = [1, 1]} : vector<16x32xf32> to vector<8x8xf32>
    %158 = vector.extract_strided_slice %42 {offsets = [8, 24], sizes = [8, 8], strides = [1, 1]} : vector<16x32xf32> to vector<8x8xf32>
    %159 = vector.extract_strided_slice %43 {offsets = [8, 24], sizes = [8, 8], strides = [1, 1]} : vector<16x32xf32> to vector<8x8xf32>
    %160 = tpu.transpose %158, [1, 0] : vector<8x8xf32> -> vector<8x8xf32>
    %cst_52 = arith.constant dense<0.000000e+00> : vector<8x8xf32>
    %161 = tpu.matmul %157, %160, %cst_52 {dimension_numbers = #tpu.dot_dimension_numbers<[1], [0], [0], [1], [0, 0, 1, 1], [], []>} : vector<8x8xf32>, vector<8x8xf32>, vector<8x8xf32> -> vector<8x8xf32>
    %cst_53 = arith.constant dense<0xFF800000> : vector<8xf32>
    %162 = vector.multi_reduction <maximumf>, %161, %cst_53 [1] : vector<8x8xf32> to vector<8xf32>
    %163 = vector.shape_cast %162 : vector<8xf32> to vector<8x1xf32>
    %164 = vector.broadcast %163 : vector<8x1xf32> to vector<8x8xf32>
    %165 = arith.subf %161, %164 : vector<8x8xf32>
    %166 = math.exp %165 : vector<8x8xf32>
    %cst_54 = arith.constant dense<0.000000e+00> : vector<8xf32>
    %167 = vector.multi_reduction <add>, %166, %cst_54 [1] : vector<8x8xf32> to vector<8xf32>
    %168 = vector.shape_cast %167 : vector<8xf32> to vector<8x1xf32>
    %169 = tpu.reciprocal %168 : vector<8x1xf32> -> vector<8x1xf32>
    %170 = vector.broadcast %169 : vector<8x1xf32> to vector<8x8xf32>
    %171 = arith.mulf %166, %170 : vector<8x8xf32>
    %cst_55 = arith.constant dense<0.000000e+00> : vector<8x8xf32>
    %172 = tpu.matmul %171, %159, %cst_55 {dimension_numbers = #tpu.dot_dimension_numbers<[1], [0], [0], [1], [0, 0, 1, 1], [], []>} : vector<8x8xf32>, vector<8x8xf32>, vector<8x8xf32> -> vector<8x8xf32>
    %173 = tpu.concatenate %124, %140, %156, %172 in 1 : vector<8x8xf32>, vector<8x8xf32>, vector<8x8xf32>, vector<8x8xf32> -> vector<8x32xf32>
    %174 = tpu.concatenate %108, %173 in 0 : vector<8x32xf32>, vector<8x32xf32> -> vector<16x32xf32>
    %c0_56 = arith.constant 0 : index
    %c0_57 = arith.constant 0 : index
    %c0_58 = arith.constant 0 : index
    %175 = vector.load %arg8[%c0_56, %c0_57, %c0_58] : memref<2x32x32xbf16, #tpu.memory_space<vmem>>, vector<1x32x32xbf16>
    %176 = vector.shape_cast %175 : vector<1x32x32xbf16> to vector<32x32xbf16>
    %c0_59 = arith.constant 0 : index
    %c0_60 = arith.constant 0 : index
    %c0_61 = arith.constant 0 : index
    %177 = vector.load %arg9[%c0_59, %c0_60, %c0_61] : memref<2x1x32xf32, #tpu.memory_space<vmem>>, vector<1x1x32xf32>
    %178 = vector.shape_cast %177 : vector<1x1x32xf32> to vector<1x32xf32>
    %179 = arith.truncf %174 : vector<16x32xf32> to vector<16x32xbf16>
    %cst_62 = arith.constant dense<0.000000e+00> : vector<16x32xf32>
    %180 = tpu.matmul %179, %176, %cst_62 {dimension_numbers = #tpu.dot_dimension_numbers<[1], [0], [0], [1], [0, 0, 1, 1], [], []>} : vector<16x32xbf16>, vector<32x32xbf16>, vector<16x32xf32> -> vector<16x32xf32>
    %181 = vector.broadcast %178 : vector<1x32xf32> to vector<16x32xf32>
    %182 = arith.addf %180, %181 : vector<16x32xf32>
    %183 = arith.addf %30, %182 : vector<16x32xf32>
    %c0_63 = arith.constant 0 : index
    %c0_64 = arith.constant 0 : index
    %c0_65 = arith.constant 0 : index
    %184 = vector.load %arg10[%c0_63, %c0_64, %c0_65] : memref<2x1x32xf32, #tpu.memory_space<vmem>>, vector<1x1x32xf32>
    %185 = vector.shape_cast %184 : vector<1x1x32xf32> to vector<1x32xf32>
    %c0_66 = arith.constant 0 : index
    %c0_67 = arith.constant 0 : index
    %c0_68 = arith.constant 0 : index
    %186 = vector.load %arg11[%c0_66, %c0_67, %c0_68] : memref<2x1x32xf32, #tpu.memory_space<vmem>>, vector<1x1x32xf32>
    %187 = vector.shape_cast %186 : vector<1x1x32xf32> to vector<1x32xf32>
    %cst_69 = arith.constant dense<0.000000e+00> : vector<16xf32>
    %188 = vector.multi_reduction <add>, %183, %cst_69 [1] : vector<16x32xf32> to vector<16xf32>
    %189 = vector.shape_cast %188 : vector<16xf32> to vector<16x1xf32>
    %cst_70 = arith.constant 3.200000e+01 : f32
    %190 = vector.broadcast %cst_70 : f32 to vector<16x1xf32>
    %191 = arith.divf %189, %190 : vector<16x1xf32>
    %192 = vector.broadcast %191 : vector<16x1xf32> to vector<16x32xf32>
    %193 = arith.subf %183, %192 : vector<16x32xf32>
    %194 = arith.mulf %193, %193 : vector<16x32xf32>
    %cst_71 = arith.constant dense<0.000000e+00> : vector<16xf32>
    %195 = vector.multi_reduction <add>, %194, %cst_71 [1] : vector<16x32xf32> to vector<16xf32>
    %196 = vector.shape_cast %195 : vector<16xf32> to vector<16x1xf32>
    %cst_72 = arith.constant 3.200000e+01 : f32
    %197 = vector.broadcast %cst_72 : f32 to vector<16x1xf32>
    %198 = arith.divf %196, %197 : vector<16x1xf32>
    %cst_73 = arith.constant 9.99999974E-6 : f32
    %199 = vector.broadcast %cst_73 : f32 to vector<16x1xf32>
    %200 = arith.addf %198, %199 : vector<16x1xf32>
    %201 = math.rsqrt %200 : vector<16x1xf32>
    %202 = vector.broadcast %201 : vector<16x1xf32> to vector<16x32xf32>
    %203 = arith.mulf %193, %202 : vector<16x32xf32>
    %204 = vector.broadcast %185 : vector<1x32xf32> to vector<16x32xf32>
    %205 = arith.mulf %203, %204 : vector<16x32xf32>
    %206 = vector.broadcast %187 : vector<1x32xf32> to vector<16x32xf32>
    %207 = arith.addf %205, %206 : vector<16x32xf32>
    %c0_74 = arith.constant 0 : index
    %c0_75 = arith.constant 0 : index
    %c0_76 = arith.constant 0 : index
    %208 = vector.load %arg12[%c0_74, %c0_75, %c0_76] : memref<2x32x2048xbf16, #tpu.memory_space<vmem>>, vector<1x32x2048xbf16>
    %209 = vector.shape_cast %208 : vector<1x32x2048xbf16> to vector<32x2048xbf16>
    %c0_77 = arith.constant 0 : index
    %c0_78 = arith.constant 0 : index
    %c0_79 = arith.constant 0 : index
    %210 = vector.load %arg13[%c0_77, %c0_78, %c0_79] : memref<2x1x2048xf32, #tpu.memory_space<vmem>>, vector<1x1x2048xf32>
    %211 = vector.shape_cast %210 : vector<1x1x2048xf32> to vector<1x2048xf32>
    %212 = arith.truncf %207 : vector<16x32xf32> to vector<16x32xbf16>
    %cst_80 = arith.constant dense<0.000000e+00> : vector<16x2048xf32>
    %213 = tpu.matmul %212, %209, %cst_80 {dimension_numbers = #tpu.dot_dimension_numbers<[1], [0], [0], [1], [0, 0, 1, 1], [], []>} : vector<16x32xbf16>, vector<32x2048xbf16>, vector<16x2048xf32> -> vector<16x2048xf32>
    %214 = vector.broadcast %211 : vector<1x2048xf32> to vector<16x2048xf32>
    %215 = arith.addf %213, %214 : vector<16x2048xf32>
    %cst_81 = arith.constant 0.000000e+00 : f32
    %216 = vector.broadcast %cst_81 : f32 to vector<16x2048xf32>
    %217 = arith.maximumf %215, %216 : vector<16x2048xf32>
    %c0_82 = arith.constant 0 : index
    %c0_83 = arith.constant 0 : index
    %c0_84 = arith.constant 0 : index
    %218 = vector.load %arg14[%c0_82, %c0_83, %c0_84] : memref<2x2048x32xbf16, #tpu.memory_space<vmem>>, vector<1x2048x32xbf16>
    %219 = vector.shape_cast %218 : vector<1x2048x32xbf16> to vector<2048x32xbf16>
    %c0_85 = arith.constant 0 : index
    %c0_86 = arith.constant 0 : index
    %c0_87 = arith.constant 0 : index
    %220 = vector.load %arg15[%c0_85, %c0_86, %c0_87] : memref<2x1x32xf32, #tpu.memory_space<vmem>>, vector<1x1x32xf32>
    %221 = vector.shape_cast %220 : vector<1x1x32xf32> to vector<1x32xf32>
    %222 = arith.truncf %217 : vector<16x2048xf32> to vector<16x2048xbf16>
    %cst_88 = arith.constant dense<0.000000e+00> : vector<16x32xf32>
    %223 = tpu.matmul %222, %219, %cst_88 {dimension_numbers = #tpu.dot_dimension_numbers<[1], [0], [0], [1], [0, 0, 1, 1], [], []>} : vector<16x2048xbf16>, vector<2048x32xbf16>, vector<16x32xf32> -> vector<16x32xf32>
    %224 = vector.broadcast %221 : vector<1x32xf32> to vector<16x32xf32>
    %225 = arith.addf %223, %224 : vector<16x32xf32>
    %226 = arith.addf %207, %225 : vector<16x32xf32>
    %c0_89 = arith.constant 0 : index
    %c0_90 = arith.constant 0 : index
    %c0_91 = arith.constant 0 : index
    %227 = vector.load %arg16[%c0_89, %c0_90, %c0_91] : memref<2x1x32xf32, #tpu.memory_space<vmem>>, vector<1x1x32xf32>
    %228 = vector.shape_cast %227 : vector<1x1x32xf32> to vector<1x32xf32>
    %c0_92 = arith.constant 0 : index
    %c0_93 = arith.constant 0 : index
    %c0_94 = arith.constant 0 : index
    %229 = vector.load %arg17[%c0_92, %c0_93, %c0_94] : memref<2x1x32xf32, #tpu.memory_space<vmem>>, vector<1x1x32xf32>
    %230 = vector.shape_cast %229 : vector<1x1x32xf32> to vector<1x32xf32>
    %cst_95 = arith.constant dense<0.000000e+00> : vector<16xf32>
    %231 = vector.multi_reduction <add>, %226, %cst_95 [1] : vector<16x32xf32> to vector<16xf32>
    %232 = vector.shape_cast %231 : vector<16xf32> to vector<16x1xf32>
    %cst_96 = arith.constant 3.200000e+01 : f32
    %233 = vector.broadcast %cst_96 : f32 to vector<16x1xf32>
    %234 = arith.divf %232, %233 : vector<16x1xf32>
    %235 = vector.broadcast %234 : vector<16x1xf32> to vector<16x32xf32>
    %236 = arith.subf %226, %235 : vector<16x32xf32>
    %237 = arith.mulf %236, %236 : vector<16x32xf32>
    %cst_97 = arith.constant dense<0.000000e+00> : vector<16xf32>
    %238 = vector.multi_reduction <add>, %237, %cst_97 [1] : vector<16x32xf32> to vector<16xf32>
    %239 = vector.shape_cast %238 : vector<16xf32> to vector<16x1xf32>
    %cst_98 = arith.constant 3.200000e+01 : f32
    %240 = vector.broadcast %cst_98 : f32 to vector<16x1xf32>
    %241 = arith.divf %239, %240 : vector<16x1xf32>
    %cst_99 = arith.constant 9.99999974E-6 : f32
    %242 = vector.broadcast %cst_99 : f32 to vector<16x1xf32>
    %243 = arith.addf %241, %242 : vector<16x1xf32>
    %244 = math.rsqrt %243 : vector<16x1xf32>
    %245 = vector.broadcast %244 : vector<16x1xf32> to vector<16x32xf32>
    %246 = arith.mulf %236, %245 : vector<16x32xf32>
    %247 = vector.broadcast %228 : vector<1x32xf32> to vector<16x32xf32>
    %248 = arith.mulf %246, %247 : vector<16x32xf32>
    %249 = vector.broadcast %230 : vector<1x32xf32> to vector<16x32xf32>
    %250 = arith.addf %248, %249 : vector<16x32xf32>
    %c1 = arith.constant 1 : index
    %c0_100 = arith.constant 0 : index
    %c0_101 = arith.constant 0 : index
    %251 = vector.load %arg6[%c1, %c0_100, %c0_101] : memref<2x32x96xbf16, #tpu.memory_space<vmem>>, vector<1x32x96xbf16>
    %252 = vector.shape_cast %251 : vector<1x32x96xbf16> to vector<32x96xbf16>
    %c1_102 = arith.constant 1 : index
    %c0_103 = arith.constant 0 : index
    %c0_104 = arith.constant 0 : index
    %253 = vector.load %arg7[%c1_102, %c0_103, %c0_104] : memref<2x1x96xf32, #tpu.memory_space<vmem>>, vector<1x1x96xf32>
    %254 = vector.shape_cast %253 : vector<1x1x96xf32> to vector<1x96xf32>
    %255 = arith.truncf %250 : vector<16x32xf32> to vector<16x32xbf16>
    %cst_105 = arith.constant dense<0.000000e+00> : vector<16x96xf32>
    %256 = tpu.matmul %255, %252, %cst_105 {dimension_numbers = #tpu.dot_dimension_numbers<[1], [0], [0], [1], [0, 0, 1, 1], [], []>} : vector<16x32xbf16>, vector<32x96xbf16>, vector<16x96xf32> -> vector<16x96xf32>
    %257 = vector.broadcast %254 : vector<1x96xf32> to vector<16x96xf32>
    %258 = arith.addf %256, %257 : vector<16x96xf32>
    %259 = vector.extract_strided_slice %258 {offsets = [0, 0], sizes = [16, 32], strides = [1, 1]} : vector<16x96xf32> to vector<16x32xf32>
    %cst_106 = arith.constant 0.353553385 : f32
    %260 = vector.broadcast %cst_106 : f32 to vector<16x32xf32>
    %261 = arith.mulf %259, %260 : vector<16x32xf32>
    %262 = vector.extract_strided_slice %258 {offsets = [0, 32], sizes = [16, 32], strides = [1, 1]} : vector<16x96xf32> to vector<16x32xf32>
    %263 = vector.extract_strided_slice %258 {offsets = [0, 64], sizes = [16, 32], strides = [1, 1]} : vector<16x96xf32> to vector<16x32xf32>
    %264 = vector.extract_strided_slice %261 {offsets = [0, 0], sizes = [8, 8], strides = [1, 1]} : vector<16x32xf32> to vector<8x8xf32>
    %265 = vector.extract_strided_slice %262 {offsets = [0, 0], sizes = [8, 8], strides = [1, 1]} : vector<16x32xf32> to vector<8x8xf32>
    %266 = vector.extract_strided_slice %263 {offsets = [0, 0], sizes = [8, 8], strides = [1, 1]} : vector<16x32xf32> to vector<8x8xf32>
    %267 = tpu.transpose %265, [1, 0] : vector<8x8xf32> -> vector<8x8xf32>
    %cst_107 = arith.constant dense<0.000000e+00> : vector<8x8xf32>
    %268 = tpu.matmul %264, %267, %cst_107 {dimension_numbers = #tpu.dot_dimension_numbers<[1], [0], [0], [1], [0, 0, 1, 1], [], []>} : vector<8x8xf32>, vector<8x8xf32>, vector<8x8xf32> -> vector<8x8xf32>
    %cst_108 = arith.constant dense<0xFF800000> : vector<8xf32>
    %269 = vector.multi_reduction <maximumf>, %268, %cst_108 [1] : vector<8x8xf32> to vector<8xf32>
    %270 = vector.shape_cast %269 : vector<8xf32> to vector<8x1xf32>
    %271 = vector.broadcast %270 : vector<8x1xf32> to vector<8x8xf32>
    %272 = arith.subf %268, %271 : vector<8x8xf32>
    %273 = math.exp %272 : vector<8x8xf32>
    %cst_109 = arith.constant dense<0.000000e+00> : vector<8xf32>
    %274 = vector.multi_reduction <add>, %273, %cst_109 [1] : vector<8x8xf32> to vector<8xf32>
    %275 = vector.shape_cast %274 : vector<8xf32> to vector<8x1xf32>
    %276 = tpu.reciprocal %275 : vector<8x1xf32> -> vector<8x1xf32>
    %277 = vector.broadcast %276 : vector<8x1xf32> to vector<8x8xf32>
    %278 = arith.mulf %273, %277 : vector<8x8xf32>
    %cst_110 = arith.constant dense<0.000000e+00> : vector<8x8xf32>
    %279 = tpu.matmul %278, %266, %cst_110 {dimension_numbers = #tpu.dot_dimension_numbers<[1], [0], [0], [1], [0, 0, 1, 1], [], []>} : vector<8x8xf32>, vector<8x8xf32>, vector<8x8xf32> -> vector<8x8xf32>
    %280 = vector.extract_strided_slice %261 {offsets = [0, 8], sizes = [8, 8], strides = [1, 1]} : vector<16x32xf32> to vector<8x8xf32>
    %281 = vector.extract_strided_slice %262 {offsets = [0, 8], sizes = [8, 8], strides = [1, 1]} : vector<16x32xf32> to vector<8x8xf32>
    %282 = vector.extract_strided_slice %263 {offsets = [0, 8], sizes = [8, 8], strides = [1, 1]} : vector<16x32xf32> to vector<8x8xf32>
    %283 = tpu.transpose %281, [1, 0] : vector<8x8xf32> -> vector<8x8xf32>
    %cst_111 = arith.constant dense<0.000000e+00> : vector<8x8xf32>
    %284 = tpu.matmul %280, %283, %cst_111 {dimension_numbers = #tpu.dot_dimension_numbers<[1], [0], [0], [1], [0, 0, 1, 1], [], []>} : vector<8x8xf32>, vector<8x8xf32>, vector<8x8xf32> -> vector<8x8xf32>
    %cst_112 = arith.constant dense<0xFF800000> : vector<8xf32>
    %285 = vector.multi_reduction <maximumf>, %284, %cst_112 [1] : vector<8x8xf32> to vector<8xf32>
    %286 = vector.shape_cast %285 : vector<8xf32> to vector<8x1xf32>
    %287 = vector.broadcast %286 : vector<8x1xf32> to vector<8x8xf32>
    %288 = arith.subf %284, %287 : vector<8x8xf32>
    %289 = math.exp %288 : vector<8x8xf32>
    %cst_113 = arith.constant dense<0.000000e+00> : vector<8xf32>
    %290 = vector.multi_reduction <add>, %289, %cst_113 [1] : vector<8x8xf32> to vector<8xf32>
    %291 = vector.shape_cast %290 : vector<8xf32> to vector<8x1xf32>
    %292 = tpu.reciprocal %291 : vector<8x1xf32> -> vector<8x1xf32>
    %293 = vector.broadcast %292 : vector<8x1xf32> to vector<8x8xf32>
    %294 = arith.mulf %289, %293 : vector<8x8xf32>
    %cst_114 = arith.constant dense<0.000000e+00> : vector<8x8xf32>
    %295 = tpu.matmul %294, %282, %cst_114 {dimension_numbers = #tpu.dot_dimension_numbers<[1], [0], [0], [1], [0, 0, 1, 1], [], []>} : vector<8x8xf32>, vector<8x8xf32>, vector<8x8xf32> -> vector<8x8xf32>
    %296 = vector.extract_strided_slice %261 {offsets = [0, 16], sizes = [8, 8], strides = [1, 1]} : vector<16x32xf32> to vector<8x8xf32>
    %297 = vector.extract_strided_slice %262 {offsets = [0, 16], sizes = [8, 8], strides = [1, 1]} : vector<16x32xf32> to vector<8x8xf32>
    %298 = vector.extract_strided_slice %263 {offsets = [0, 16], sizes = [8, 8], strides = [1, 1]} : vector<16x32xf32> to vector<8x8xf32>
    %299 = tpu.transpose %297, [1, 0] : vector<8x8xf32> -> vector<8x8xf32>
    %cst_115 = arith.constant dense<0.000000e+00> : vector<8x8xf32>
    %300 = tpu.matmul %296, %299, %cst_115 {dimension_numbers = #tpu.dot_dimension_numbers<[1], [0], [0], [1], [0, 0, 1, 1], [], []>} : vector<8x8xf32>, vector<8x8xf32>, vector<8x8xf32> -> vector<8x8xf32>
    %cst_116 = arith.constant dense<0xFF800000> : vector<8xf32>
    %301 = vector.multi_reduction <maximumf>, %300, %cst_116 [1] : vector<8x8xf32> to vector<8xf32>
    %302 = vector.shape_cast %301 : vector<8xf32> to vector<8x1xf32>
    %303 = vector.broadcast %302 : vector<8x1xf32> to vector<8x8xf32>
    %304 = arith.subf %300, %303 : vector<8x8xf32>
    %305 = math.exp %304 : vector<8x8xf32>
    %cst_117 = arith.constant dense<0.000000e+00> : vector<8xf32>
    %306 = vector.multi_reduction <add>, %305, %cst_117 [1] : vector<8x8xf32> to vector<8xf32>
    %307 = vector.shape_cast %306 : vector<8xf32> to vector<8x1xf32>
    %308 = tpu.reciprocal %307 : vector<8x1xf32> -> vector<8x1xf32>
    %309 = vector.broadcast %308 : vector<8x1xf32> to vector<8x8xf32>
    %310 = arith.mulf %305, %309 : vector<8x8xf32>
    %cst_118 = arith.constant dense<0.000000e+00> : vector<8x8xf32>
    %311 = tpu.matmul %310, %298, %cst_118 {dimension_numbers = #tpu.dot_dimension_numbers<[1], [0], [0], [1], [0, 0, 1, 1], [], []>} : vector<8x8xf32>, vector<8x8xf32>, vector<8x8xf32> -> vector<8x8xf32>
    %312 = vector.extract_strided_slice %261 {offsets = [0, 24], sizes = [8, 8], strides = [1, 1]} : vector<16x32xf32> to vector<8x8xf32>
    %313 = vector.extract_strided_slice %262 {offsets = [0, 24], sizes = [8, 8], strides = [1, 1]} : vector<16x32xf32> to vector<8x8xf32>
    %314 = vector.extract_strided_slice %263 {offsets = [0, 24], sizes = [8, 8], strides = [1, 1]} : vector<16x32xf32> to vector<8x8xf32>
    %315 = tpu.transpose %313, [1, 0] : vector<8x8xf32> -> vector<8x8xf32>
    %cst_119 = arith.constant dense<0.000000e+00> : vector<8x8xf32>
    %316 = tpu.matmul %312, %315, %cst_119 {dimension_numbers = #tpu.dot_dimension_numbers<[1], [0], [0], [1], [0, 0, 1, 1], [], []>} : vector<8x8xf32>, vector<8x8xf32>, vector<8x8xf32> -> vector<8x8xf32>
    %cst_120 = arith.constant dense<0xFF800000> : vector<8xf32>
    %317 = vector.multi_reduction <maximumf>, %316, %cst_120 [1] : vector<8x8xf32> to vector<8xf32>
    %318 = vector.shape_cast %317 : vector<8xf32> to vector<8x1xf32>
    %319 = vector.broadcast %318 : vector<8x1xf32> to vector<8x8xf32>
    %320 = arith.subf %316, %319 : vector<8x8xf32>
    %321 = math.exp %320 : vector<8x8xf32>
    %cst_121 = arith.constant dense<0.000000e+00> : vector<8xf32>
    %322 = vector.multi_reduction <add>, %321, %cst_121 [1] : vector<8x8xf32> to vector<8xf32>
    %323 = vector.shape_cast %322 : vector<8xf32> to vector<8x1xf32>
    %324 = tpu.reciprocal %323 : vector<8x1xf32> -> vector<8x1xf32>
    %325 = vector.broadcast %324 : vector<8x1xf32> to vector<8x8xf32>
    %326 = arith.mulf %321, %325 : vector<8x8xf32>
    %cst_122 = arith.constant dense<0.000000e+00> : vector<8x8xf32>
    %327 = tpu.matmul %326, %314, %cst_122 {dimension_numbers = #tpu.dot_dimension_numbers<[1], [0], [0], [1], [0, 0, 1, 1], [], []>} : vector<8x8xf32>, vector<8x8xf32>, vector<8x8xf32> -> vector<8x8xf32>
    %328 = tpu.concatenate %279, %295, %311, %327 in 1 : vector<8x8xf32>, vector<8x8xf32>, vector<8x8xf32>, vector<8x8xf32> -> vector<8x32xf32>
    %329 = vector.extract_strided_slice %261 {offsets = [8, 0], sizes = [8, 8], strides = [1, 1]} : vector<16x32xf32> to vector<8x8xf32>
    %330 = vector.extract_strided_slice %262 {offsets = [8, 0], sizes = [8, 8], strides = [1, 1]} : vector<16x32xf32> to vector<8x8xf32>
    %331 = vector.extract_strided_slice %263 {offsets = [8, 0], sizes = [8, 8], strides = [1, 1]} : vector<16x32xf32> to vector<8x8xf32>
    %332 = tpu.transpose %330, [1, 0] : vector<8x8xf32> -> vector<8x8xf32>
    %cst_123 = arith.constant dense<0.000000e+00> : vector<8x8xf32>
    %333 = tpu.matmul %329, %332, %cst_123 {dimension_numbers = #tpu.dot_dimension_numbers<[1], [0], [0], [1], [0, 0, 1, 1], [], []>} : vector<8x8xf32>, vector<8x8xf32>, vector<8x8xf32> -> vector<8x8xf32>
    %cst_124 = arith.constant dense<0xFF800000> : vector<8xf32>
    %334 = vector.multi_reduction <maximumf>, %333, %cst_124 [1] : vector<8x8xf32> to vector<8xf32>
    %335 = vector.shape_cast %334 : vector<8xf32> to vector<8x1xf32>
    %336 = vector.broadcast %335 : vector<8x1xf32> to vector<8x8xf32>
    %337 = arith.subf %333, %336 : vector<8x8xf32>
    %338 = math.exp %337 : vector<8x8xf32>
    %cst_125 = arith.constant dense<0.000000e+00> : vector<8xf32>
    %339 = vector.multi_reduction <add>, %338, %cst_125 [1] : vector<8x8xf32> to vector<8xf32>
    %340 = vector.shape_cast %339 : vector<8xf32> to vector<8x1xf32>
    %341 = tpu.reciprocal %340 : vector<8x1xf32> -> vector<8x1xf32>
    %342 = vector.broadcast %341 : vector<8x1xf32> to vector<8x8xf32>
    %343 = arith.mulf %338, %342 : vector<8x8xf32>
    %cst_126 = arith.constant dense<0.000000e+00> : vector<8x8xf32>
    %344 = tpu.matmul %343, %331, %cst_126 {dimension_numbers = #tpu.dot_dimension_numbers<[1], [0], [0], [1], [0, 0, 1, 1], [], []>} : vector<8x8xf32>, vector<8x8xf32>, vector<8x8xf32> -> vector<8x8xf32>
    %345 = vector.extract_strided_slice %261 {offsets = [8, 8], sizes = [8, 8], strides = [1, 1]} : vector<16x32xf32> to vector<8x8xf32>
    %346 = vector.extract_strided_slice %262 {offsets = [8, 8], sizes = [8, 8], strides = [1, 1]} : vector<16x32xf32> to vector<8x8xf32>
    %347 = vector.extract_strided_slice %263 {offsets = [8, 8], sizes = [8, 8], strides = [1, 1]} : vector<16x32xf32> to vector<8x8xf32>
    %348 = tpu.transpose %346, [1, 0] : vector<8x8xf32> -> vector<8x8xf32>
    %cst_127 = arith.constant dense<0.000000e+00> : vector<8x8xf32>
    %349 = tpu.matmul %345, %348, %cst_127 {dimension_numbers = #tpu.dot_dimension_numbers<[1], [0], [0], [1], [0, 0, 1, 1], [], []>} : vector<8x8xf32>, vector<8x8xf32>, vector<8x8xf32> -> vector<8x8xf32>
    %cst_128 = arith.constant dense<0xFF800000> : vector<8xf32>
    %350 = vector.multi_reduction <maximumf>, %349, %cst_128 [1] : vector<8x8xf32> to vector<8xf32>
    %351 = vector.shape_cast %350 : vector<8xf32> to vector<8x1xf32>
    %352 = vector.broadcast %351 : vector<8x1xf32> to vector<8x8xf32>
    %353 = arith.subf %349, %352 : vector<8x8xf32>
    %354 = math.exp %353 : vector<8x8xf32>
    %cst_129 = arith.constant dense<0.000000e+00> : vector<8xf32>
    %355 = vector.multi_reduction <add>, %354, %cst_129 [1] : vector<8x8xf32> to vector<8xf32>
    %356 = vector.shape_cast %355 : vector<8xf32> to vector<8x1xf32>
    %357 = tpu.reciprocal %356 : vector<8x1xf32> -> vector<8x1xf32>
    %358 = vector.broadcast %357 : vector<8x1xf32> to vector<8x8xf32>
    %359 = arith.mulf %354, %358 : vector<8x8xf32>
    %cst_130 = arith.constant dense<0.000000e+00> : vector<8x8xf32>
    %360 = tpu.matmul %359, %347, %cst_130 {dimension_numbers = #tpu.dot_dimension_numbers<[1], [0], [0], [1], [0, 0, 1, 1], [], []>} : vector<8x8xf32>, vector<8x8xf32>, vector<8x8xf32> -> vector<8x8xf32>
    %361 = vector.extract_strided_slice %261 {offsets = [8, 16], sizes = [8, 8], strides = [1, 1]} : vector<16x32xf32> to vector<8x8xf32>
    %362 = vector.extract_strided_slice %262 {offsets = [8, 16], sizes = [8, 8], strides = [1, 1]} : vector<16x32xf32> to vector<8x8xf32>
    %363 = vector.extract_strided_slice %263 {offsets = [8, 16], sizes = [8, 8], strides = [1, 1]} : vector<16x32xf32> to vector<8x8xf32>
    %364 = tpu.transpose %362, [1, 0] : vector<8x8xf32> -> vector<8x8xf32>
    %cst_131 = arith.constant dense<0.000000e+00> : vector<8x8xf32>
    %365 = tpu.matmul %361, %364, %cst_131 {dimension_numbers = #tpu.dot_dimension_numbers<[1], [0], [0], [1], [0, 0, 1, 1], [], []>} : vector<8x8xf32>, vector<8x8xf32>, vector<8x8xf32> -> vector<8x8xf32>
    %cst_132 = arith.constant dense<0xFF800000> : vector<8xf32>
    %366 = vector.multi_reduction <maximumf>, %365, %cst_132 [1] : vector<8x8xf32> to vector<8xf32>
    %367 = vector.shape_cast %366 : vector<8xf32> to vector<8x1xf32>
    %368 = vector.broadcast %367 : vector<8x1xf32> to vector<8x8xf32>
    %369 = arith.subf %365, %368 : vector<8x8xf32>
    %370 = math.exp %369 : vector<8x8xf32>
    %cst_133 = arith.constant dense<0.000000e+00> : vector<8xf32>
    %371 = vector.multi_reduction <add>, %370, %cst_133 [1] : vector<8x8xf32> to vector<8xf32>
    %372 = vector.shape_cast %371 : vector<8xf32> to vector<8x1xf32>
    %373 = tpu.reciprocal %372 : vector<8x1xf32> -> vector<8x1xf32>
    %374 = vector.broadcast %373 : vector<8x1xf32> to vector<8x8xf32>
    %375 = arith.mulf %370, %374 : vector<8x8xf32>
    %cst_134 = arith.constant dense<0.000000e+00> : vector<8x8xf32>
    %376 = tpu.matmul %375, %363, %cst_134 {dimension_numbers = #tpu.dot_dimension_numbers<[1], [0], [0], [1], [0, 0, 1, 1], [], []>} : vector<8x8xf32>, vector<8x8xf32>, vector<8x8xf32> -> vector<8x8xf32>
    %377 = vector.extract_strided_slice %261 {offsets = [8, 24], sizes = [8, 8], strides = [1, 1]} : vector<16x32xf32> to vector<8x8xf32>
    %378 = vector.extract_strided_slice %262 {offsets = [8, 24], sizes = [8, 8], strides = [1, 1]} : vector<16x32xf32> to vector<8x8xf32>
    %379 = vector.extract_strided_slice %263 {offsets = [8, 24], sizes = [8, 8], strides = [1, 1]} : vector<16x32xf32> to vector<8x8xf32>
    %380 = tpu.transpose %378, [1, 0] : vector<8x8xf32> -> vector<8x8xf32>
    %cst_135 = arith.constant dense<0.000000e+00> : vector<8x8xf32>
    %381 = tpu.matmul %377, %380, %cst_135 {dimension_numbers = #tpu.dot_dimension_numbers<[1], [0], [0], [1], [0, 0, 1, 1], [], []>} : vector<8x8xf32>, vector<8x8xf32>, vector<8x8xf32> -> vector<8x8xf32>
    %cst_136 = arith.constant dense<0xFF800000> : vector<8xf32>
    %382 = vector.multi_reduction <maximumf>, %381, %cst_136 [1] : vector<8x8xf32> to vector<8xf32>
    %383 = vector.shape_cast %382 : vector<8xf32> to vector<8x1xf32>
    %384 = vector.broadcast %383 : vector<8x1xf32> to vector<8x8xf32>
    %385 = arith.subf %381, %384 : vector<8x8xf32>
    %386 = math.exp %385 : vector<8x8xf32>
    %cst_137 = arith.constant dense<0.000000e+00> : vector<8xf32>
    %387 = vector.multi_reduction <add>, %386, %cst_137 [1] : vector<8x8xf32> to vector<8xf32>
    %388 = vector.shape_cast %387 : vector<8xf32> to vector<8x1xf32>
    %389 = tpu.reciprocal %388 : vector<8x1xf32> -> vector<8x1xf32>
    %390 = vector.broadcast %389 : vector<8x1xf32> to vector<8x8xf32>
    %391 = arith.mulf %386, %390 : vector<8x8xf32>
    %cst_138 = arith.constant dense<0.000000e+00> : vector<8x8xf32>
    %392 = tpu.matmul %391, %379, %cst_138 {dimension_numbers = #tpu.dot_dimension_numbers<[1], [0], [0], [1], [0, 0, 1, 1], [], []>} : vector<8x8xf32>, vector<8x8xf32>, vector<8x8xf32> -> vector<8x8xf32>
    %393 = tpu.concatenate %344, %360, %376, %392 in 1 : vector<8x8xf32>, vector<8x8xf32>, vector<8x8xf32>, vector<8x8xf32> -> vector<8x32xf32>
    %394 = tpu.concatenate %328, %393 in 0 : vector<8x32xf32>, vector<8x32xf32> -> vector<16x32xf32>
    %c1_139 = arith.constant 1 : index
    %c0_140 = arith.constant 0 : index
    %c0_141 = arith.constant 0 : index
    %395 = vector.load %arg8[%c1_139, %c0_140, %c0_141] : memref<2x32x32xbf16, #tpu.memory_space<vmem>>, vector<1x32x32xbf16>
    %396 = vector.shape_cast %395 : vector<1x32x32xbf16> to vector<32x32xbf16>
    %c1_142 = arith.constant 1 : index
    %c0_143 = arith.constant 0 : index
    %c0_144 = arith.constant 0 : index
    %397 = vector.load %arg9[%c1_142, %c0_143, %c0_144] : memref<2x1x32xf32, #tpu.memory_space<vmem>>, vector<1x1x32xf32>
    %398 = vector.shape_cast %397 : vector<1x1x32xf32> to vector<1x32xf32>
    %399 = arith.truncf %394 : vector<16x32xf32> to vector<16x32xbf16>
    %cst_145 = arith.constant dense<0.000000e+00> : vector<16x32xf32>
    %400 = tpu.matmul %399, %396, %cst_145 {dimension_numbers = #tpu.dot_dimension_numbers<[1], [0], [0], [1], [0, 0, 1, 1], [], []>} : vector<16x32xbf16>, vector<32x32xbf16>, vector<16x32xf32> -> vector<16x32xf32>
    %401 = vector.broadcast %398 : vector<1x32xf32> to vector<16x32xf32>
    %402 = arith.addf %400, %401 : vector<16x32xf32>
    %403 = arith.addf %250, %402 : vector<16x32xf32>
    %c1_146 = arith.constant 1 : index
    %c0_147 = arith.constant 0 : index
    %c0_148 = arith.constant 0 : index
    %404 = vector.load %arg10[%c1_146, %c0_147, %c0_148] : memref<2x1x32xf32, #tpu.memory_space<vmem>>, vector<1x1x32xf32>
    %405 = vector.shape_cast %404 : vector<1x1x32xf32> to vector<1x32xf32>
    %c1_149 = arith.constant 1 : index
    %c0_150 = arith.constant 0 : index
    %c0_151 = arith.constant 0 : index
    %406 = vector.load %arg11[%c1_149, %c0_150, %c0_151] : memref<2x1x32xf32, #tpu.memory_space<vmem>>, vector<1x1x32xf32>
    %407 = vector.shape_cast %406 : vector<1x1x32xf32> to vector<1x32xf32>
    %cst_152 = arith.constant dense<0.000000e+00> : vector<16xf32>
    %408 = vector.multi_reduction <add>, %403, %cst_152 [1] : vector<16x32xf32> to vector<16xf32>
    %409 = vector.shape_cast %408 : vector<16xf32> to vector<16x1xf32>
    %cst_153 = arith.constant 3.200000e+01 : f32
    %410 = vector.broadcast %cst_153 : f32 to vector<16x1xf32>
    %411 = arith.divf %409, %410 : vector<16x1xf32>
    %412 = vector.broadcast %411 : vector<16x1xf32> to vector<16x32xf32>
    %413 = arith.subf %403, %412 : vector<16x32xf32>
    %414 = arith.mulf %413, %413 : vector<16x32xf32>
    %cst_154 = arith.constant dense<0.000000e+00> : vector<16xf32>
    %415 = vector.multi_reduction <add>, %414, %cst_154 [1] : vector<16x32xf32> to vector<16xf32>
    %416 = vector.shape_cast %415 : vector<16xf32> to vector<16x1xf32>
    %cst_155 = arith.constant 3.200000e+01 : f32
    %417 = vector.broadcast %cst_155 : f32 to vector<16x1xf32>
    %418 = arith.divf %416, %417 : vector<16x1xf32>
    %cst_156 = arith.constant 9.99999974E-6 : f32
    %419 = vector.broadcast %cst_156 : f32 to vector<16x1xf32>
    %420 = arith.addf %418, %419 : vector<16x1xf32>
    %421 = math.rsqrt %420 : vector<16x1xf32>
    %422 = vector.broadcast %421 : vector<16x1xf32> to vector<16x32xf32>
    %423 = arith.mulf %413, %422 : vector<16x32xf32>
    %424 = vector.broadcast %405 : vector<1x32xf32> to vector<16x32xf32>
    %425 = arith.mulf %423, %424 : vector<16x32xf32>
    %426 = vector.broadcast %407 : vector<1x32xf32> to vector<16x32xf32>
    %427 = arith.addf %425, %426 : vector<16x32xf32>
    %c1_157 = arith.constant 1 : index
    %c0_158 = arith.constant 0 : index
    %c0_159 = arith.constant 0 : index
    %428 = vector.load %arg12[%c1_157, %c0_158, %c0_159] : memref<2x32x2048xbf16, #tpu.memory_space<vmem>>, vector<1x32x2048xbf16>
    %429 = vector.shape_cast %428 : vector<1x32x2048xbf16> to vector<32x2048xbf16>
    %c1_160 = arith.constant 1 : index
    %c0_161 = arith.constant 0 : index
    %c0_162 = arith.constant 0 : index
    %430 = vector.load %arg13[%c1_160, %c0_161, %c0_162] : memref<2x1x2048xf32, #tpu.memory_space<vmem>>, vector<1x1x2048xf32>
    %431 = vector.shape_cast %430 : vector<1x1x2048xf32> to vector<1x2048xf32>
    %432 = arith.truncf %427 : vector<16x32xf32> to vector<16x32xbf16>
    %cst_163 = arith.constant dense<0.000000e+00> : vector<16x2048xf32>
    %433 = tpu.matmul %432, %429, %cst_163 {dimension_numbers = #tpu.dot_dimension_numbers<[1], [0], [0], [1], [0, 0, 1, 1], [], []>} : vector<16x32xbf16>, vector<32x2048xbf16>, vector<16x2048xf32> -> vector<16x2048xf32>
    %434 = vector.broadcast %431 : vector<1x2048xf32> to vector<16x2048xf32>
    %435 = arith.addf %433, %434 : vector<16x2048xf32>
    %cst_164 = arith.constant 0.000000e+00 : f32
    %436 = vector.broadcast %cst_164 : f32 to vector<16x2048xf32>
    %437 = arith.maximumf %435, %436 : vector<16x2048xf32>
    %c1_165 = arith.constant 1 : index
    %c0_166 = arith.constant 0 : index
    %c0_167 = arith.constant 0 : index
    %438 = vector.load %arg14[%c1_165, %c0_166, %c0_167] : memref<2x2048x32xbf16, #tpu.memory_space<vmem>>, vector<1x2048x32xbf16>
    %439 = vector.shape_cast %438 : vector<1x2048x32xbf16> to vector<2048x32xbf16>
    %c1_168 = arith.constant 1 : index
    %c0_169 = arith.constant 0 : index
    %c0_170 = arith.constant 0 : index
    %440 = vector.load %arg15[%c1_168, %c0_169, %c0_170] : memref<2x1x32xf32, #tpu.memory_space<vmem>>, vector<1x1x32xf32>
    %441 = vector.shape_cast %440 : vector<1x1x32xf32> to vector<1x32xf32>
    %442 = arith.truncf %437 : vector<16x2048xf32> to vector<16x2048xbf16>
    %cst_171 = arith.constant dense<0.000000e+00> : vector<16x32xf32>
    %443 = tpu.matmul %442, %439, %cst_171 {dimension_numbers = #tpu.dot_dimension_numbers<[1], [0], [0], [1], [0, 0, 1, 1], [], []>} : vector<16x2048xbf16>, vector<2048x32xbf16>, vector<16x32xf32> -> vector<16x32xf32>
    %444 = vector.broadcast %441 : vector<1x32xf32> to vector<16x32xf32>
    %445 = arith.addf %443, %444 : vector<16x32xf32>
    %446 = arith.addf %427, %445 : vector<16x32xf32>
    %c1_172 = arith.constant 1 : index
    %c0_173 = arith.constant 0 : index
    %c0_174 = arith.constant 0 : index
    %447 = vector.load %arg16[%c1_172, %c0_173, %c0_174] : memref<2x1x32xf32, #tpu.memory_space<vmem>>, vector<1x1x32xf32>
    %448 = vector.shape_cast %447 : vector<1x1x32xf32> to vector<1x32xf32>
    %c1_175 = arith.constant 1 : index
    %c0_176 = arith.constant 0 : index
    %c0_177 = arith.constant 0 : index
    %449 = vector.load %arg17[%c1_175, %c0_176, %c0_177] : memref<2x1x32xf32, #tpu.memory_space<vmem>>, vector<1x1x32xf32>
    %450 = vector.shape_cast %449 : vector<1x1x32xf32> to vector<1x32xf32>
    %cst_178 = arith.constant dense<0.000000e+00> : vector<16xf32>
    %451 = vector.multi_reduction <add>, %446, %cst_178 [1] : vector<16x32xf32> to vector<16xf32>
    %452 = vector.shape_cast %451 : vector<16xf32> to vector<16x1xf32>
    %cst_179 = arith.constant 3.200000e+01 : f32
    %453 = vector.broadcast %cst_179 : f32 to vector<16x1xf32>
    %454 = arith.divf %452, %453 : vector<16x1xf32>
    %455 = vector.broadcast %454 : vector<16x1xf32> to vector<16x32xf32>
    %456 = arith.subf %446, %455 : vector<16x32xf32>
    %457 = arith.mulf %456, %456 : vector<16x32xf32>
    %cst_180 = arith.constant dense<0.000000e+00> : vector<16xf32>
    %458 = vector.multi_reduction <add>, %457, %cst_180 [1] : vector<16x32xf32> to vector<16xf32>
    %459 = vector.shape_cast %458 : vector<16xf32> to vector<16x1xf32>
    %cst_181 = arith.constant 3.200000e+01 : f32
    %460 = vector.broadcast %cst_181 : f32 to vector<16x1xf32>
    %461 = arith.divf %459, %460 : vector<16x1xf32>
    %cst_182 = arith.constant 9.99999974E-6 : f32
    %462 = vector.broadcast %cst_182 : f32 to vector<16x1xf32>
    %463 = arith.addf %461, %462 : vector<16x1xf32>
    %464 = math.rsqrt %463 : vector<16x1xf32>
    %465 = vector.broadcast %464 : vector<16x1xf32> to vector<16x32xf32>
    %466 = arith.mulf %456, %465 : vector<16x32xf32>
    %467 = vector.broadcast %448 : vector<1x32xf32> to vector<16x32xf32>
    %468 = arith.mulf %466, %467 : vector<16x32xf32>
    %469 = vector.broadcast %450 : vector<1x32xf32> to vector<16x32xf32>
    %470 = arith.addf %468, %469 : vector<16x32xf32>
    %471 = vector.extract_strided_slice %470 {offsets = [7, 0], sizes = [1, 32], strides = [1, 1]} : vector<16x32xf32> to vector<1x32xf32>
    %472 = vector.extract_strided_slice %470 {offsets = [15, 0], sizes = [1, 32], strides = [1, 1]} : vector<16x32xf32> to vector<1x32xf32>
    %473 = tpu.concatenate %471, %472 in 0 : vector<1x32xf32>, vector<1x32xf32> -> vector<2x32xf32>
    %c0_183 = arith.constant 0 : index
    %c0_184 = arith.constant 0 : index
    %474 = vector.load %arg18[%c0_183, %c0_184] : memref<32x1xf32, #tpu.memory_space<vmem>>, vector<32x1xf32>
    %cst_185 = arith.constant dense<0.000000e+00> : vector<2x1xf32>
    %475 = tpu.matmul %473, %474, %cst_185 {dimension_numbers = #tpu.dot_dimension_numbers<[1], [0], [0], [1], [0, 0, 1, 1], [], []>} : vector<2x32xf32>, vector<32x1xf32>, vector<2x1xf32> -> vector<2x1xf32>
    %c0_186 = arith.constant 0 : index
    %c0_187 = arith.constant 0 : index
    %476 = vector.load %arg19[%c0_186, %c0_187] : memref<1x1xf32, #tpu.memory_space<vmem>>, vector<1x1xf32>
    %477 = vector.broadcast %476 : vector<1x1xf32> to vector<2x1xf32>
    %478 = arith.addf %475, %477 : vector<2x1xf32>
    %c0_188 = arith.constant 0 : index
    %c0_189 = arith.constant 0 : index
    %479 = vector.load %arg20[%c0_188, %c0_189] : memref<1x1xf32, #tpu.memory_space<vmem>>, vector<1x1xf32>
    %480 = vector.broadcast %479 : vector<1x1xf32> to vector<2x1xf32>
    %481 = arith.mulf %478, %480 : vector<2x1xf32>
    %c0_190 = arith.constant 0 : index
    %c0_191 = arith.constant 0 : index
    %482 = vector.load %arg21[%c0_190, %c0_191] : memref<1x1xf32, #tpu.memory_space<vmem>>, vector<1x1xf32>
    %483 = vector.broadcast %482 : vector<1x1xf32> to vector<2x1xf32>
    %484 = arith.addf %481, %483 : vector<2x1xf32>
    %485 = arith.negf %484 : vector<2x1xf32>
    %486 = math.exp %485 : vector<2x1xf32>
    %cst_192 = arith.constant 1.000000e+00 : f32
    %487 = vector.broadcast %cst_192 : f32 to vector<2x1xf32>
    %488 = arith.addf %487, %486 : vector<2x1xf32>
    %489 = arith.divf %487, %488 : vector<2x1xf32>
    %490 = vector.shape_cast %489 : vector<2x1xf32> to vector<2x1xf32>
    %491 = vector.broadcast %490 : vector<2x1xf32> to vector<2x128xf32>
    %c0_193 = arith.constant 0 : index
    %c0_194 = arith.constant 0 : index
    %492 = vector.load %arg22[%c0_193, %c0_194] : memref<2x128xf32, #tpu.memory_space<vmem>>, vector<2x128xf32>
    tpu.vector_store %arg22[%c0_193, %c0_194], %491 {strides = array<i32>} : memref<2x128xf32, #tpu.memory_space<vmem>>, vector<2x128xf32>,
    return
  }
}

</mosaic_0001>

<bundles_post_ra>
// kernel: forward.1
= control target key start
LH: loop header
LB: loop body
LE: loop exit
PB: predicated region body
PF: predicated region fallthrough
CT: control target
= control target key end

     0   :  { %vm93_vm0 = vcmask 130048   ;;  %vm117_vm1 = vcmask 261120   ;;  %v7674_v15 = vmov 32.0   ;;  %s9595_s27 = smov 64   ;;  %s7680_s28 = smov 72   ;;  %vm222_vm9 = vcmask 64512   ;;  %s9559_s2 = inlined_call_operand.vmem [shape: bf16[16,32], index: 2, kind: input, shape index: {}]   ;;  %s9560_s0 = inlined_call_operand.vmem [shape: f32[16,16], index: 0, kind: input, shape index: {}]   ;;  %s9561_s3 = inlined_call_operand.vmem [shape: f32[1,32], index: 3, kind: input, shape index: {}]   ;;  %s9562_s1 = inlined_call_operand.vmem [shape: f32[16,32], index: 1, kind: input, shape index: {}]   ;;  %s9563_s4 = inlined_call_operand.vmem [shape: f32[1,32], index: 4, kind: input, shape index: {}]   ;;  %s9564_s5 = inlined_call_operand.vmem [shape: f32[1,32], index: 5, kind: input, shape index: {}]   ;;  %s9565_s7 = inlined_call_operand.vmem [shape: f32[2,1,96], index: 7, kind: input, shape index: {}]   ;;  %s9566_s6 = inlined_call_operand.vmem [shape: bf16[2,32,96], index: 6, kind: input, shape index: {}]   ;;  %s9567_s9 = inlined_call_operand.vmem [shape: f32[2,1,32], index: 9, kind: input, shape index: {}]   ;;  %s9568_s8 = inlined_call_operand.vmem [shape: bf16[2,32,32], index: 8, kind: input, shape index: {}]   ;;  %s9569_s10 = inlined_call_operand.vmem [shape: f32[2,1,32], index: 10, kind: input, shape index: {}]   ;;  %s9570_s11 = inlined_call_operand.vmem [shape: f32[2,1,32], index: 11, kind: input, shape index: {}]   ;;  %s9571_s12 = inlined_call_operand.vmem [shape: bf16[2,32,2048], index: 12, kind: input, shape index: {}]   ;;  %s9572_s14 = inlined_call_operand.vmem [shape: bf16[2,2048,32], index: 14, kind: input, shape index: {}]   ;;  %s9573_s15 = inlined_call_operand.vmem [shape: f32[2,1,32], index: 15, kind: input, shape index: {}]   ;;  %s9574_s13 = inlined_call_operand.vmem [shape: f32[2,1,2048], index: 13, kind: input, shape index: {}]   ;;  %s9575_s16 = inlined_call_operand.vmem [shape: f32[2,1,32], index: 16, kind: input, shape index: {}]   ;;  %s9576_s17 = inlined_call_operand.vmem [shape: f32[2,1,32], index: 17, kind: input, shape index: {}]   ;;  %s9577_s18 = inlined_call_operand.vmem [shape: f32[32,1], index: 18, kind: input, shape index: {}]   ;;  %s9578_s19 = inlined_call_operand.<no memory space> [shape: f32[1,1], index: 19, kind: input, shape index: {}]   ;;  %s9579_s20 = inlined_call_operand.<no memory space> [shape: f32[1,1], index: 20, kind: input, shape index: {}]   ;;  %s9580_s21 = inlined_call_operand.<no memory space> [shape: f32[1,1], index: 21, kind: input, shape index: {}]   ;;  %s9581_s22 = inlined_call_operand.vmem [shape: f32[2,128], index: 22, kind: output, shape index: {}]  }
   0x1   :  { %9605 = sst [smem:[#allocation5_spill]] %s9559_s2  ;;  %7584 = vrcp.f32 %v7674_v15  ;;  %v7189_v32 = vld [vmem:[%s9566_s6 + $0x8] sm:$0xff]  ;;  %v7188_v34 = vld [vmem:[%s9566_s6] sm:$0xff]  ;;  %s9588_s30 = smov 56  }
   0x2   :  { %9606 = sst [smem:[#allocation6_spill]] %s9560_s0  ;;  %209 = vmatpush.bf16.msra.mxu1 %v7189_v32  ;;  %s9590_s23 = smov 48  }
   0x3   :  { %9607 = sst [smem:[#allocation7_spill]] %s9561_s3  ;;  %s7677_s3 = smov 88  }
   0x4   :  { %9608 = sst [smem:[#allocation8_spill]] %s9562_s1  ;;  %s9599_s1 = smov 80  }
   0x5   :  { %9609 = sst [smem:[#allocation9_spill]] %s9563_s4  ;;  %s9603_s4 = smov 112  }
   0x6   :  { %9610 = sst [smem:[#allocation10_spill]] %s9564_s5  ;;  %210 = vmatpush.bf16.msra.mxu1 %v7188_v34  ;;  %s9594_s0 = smov 16  }
   0x7   :  { %9611 = sst [smem:[#allocation11_spill]] %s9565_s7  ;;  %v7585_v16 = vpop.eup %7584 }
   0x8   :  { %9612 = sst [smem:[#allocation12_spill]] %s9576_s17  ;;  %v125_v17 = vmul.f32 32.0, %v7585_v16  ;;  %vm129_vm2 = vweird.f32 %v7585_v16 }
   0x9   :  { %s9613_s29 = sld [smem:[#allocation5_spill]] }
   0xa   :  { %s9614_s17 = sld [smem:[#allocation6_spill]]  ;;  %v126_v18 = vsub.f32 1.0, %v125_v17 }
   0xb   :  { %s9615_s24 = sld [smem:[#allocation7_spill]] }
   0xc   :  { %s9616_s26 = sld [smem:[#allocation8_spill]]  ;;  %v127_v19 = vmul.f32 %v7585_v16, %v126_v18 }
   0xd   :  { %s9617_s2 = sld [smem:[#allocation9_spill]] }
   0xe   :  { %v128_v20 = vadd.f32 %v7585_v16, %v127_v19  ;;  %s9618_s5 = sld [smem:[#allocation10_spill]] }
   0xf   :  { %v7187_v0 = vld [vmem:[%s9613_s29] sm:$0xff]  ;;  %s9619_s25 = sld [smem:[#allocation11_spill]]  ;;  %s9597_s29 = smov 104  }
  0x10   :  { %v78_v1 = vld [vmem:[%s9614_s17] sm:$0xff]  ;;  %v79_v2 = vld [vmem:[%s9614_s17 + $0x8] sm:$0xff]  ;;  %104 = vmatpush.bf16.msra.mxu0 %v7187_v0  ;;  %v7826_v21 = vsel %vm129_vm2, %v7585_v16, %v128_v20  ;;  %s9601_s17 = smov 120  }
  0x11   :  { %v83_v3 = vpack.c.bf16 %v79_v2, %v78_v1  ;;  %v7564_v4 = vld [vmem:[%s9615_s24] ss:$0 sm:$0xff]  ;;  %s9592_s24 = smov 24  }
  0x12   :  { %v111_v6 = vld [vmem:[%s9616_s26] sm:$0xff]  ;;  %v112_v11 = vld [vmem:[%s9616_s26 + $0x8] sm:$0xff]  ;;  %s7675_s26 = smov 96  }
  0x13   :  { %5483 = vmatmul.msk.bf16.vlgmr.msra.gmra.mxu0 %vm93_vm0, %v83_v3  ;;  %v7565_v53 = vld [vmem:[%s9617_s2] ss:$0 sm:$0xff]  ;;  %s9586_s2 = smov 40  }
  0x14   :  { %v7566_v58 = vld [vmem:[%s9618_s5] ss:$0 sm:$0xff]  ;;  %s9593_s5 = smov 8  }
  0x15   :  { %v7567_v63 = vld [vmem:[%s9619_s25] ss:$0 sm:$0xff] }
  0x90   :  { %v106_v5 = vpop.f32.mrf.mxu0 }
  0x91   :  { %v107_v7 = vadd.f32 %v7564_v4, %v106_v5 }
  0x93   :  { %v113_v8 = vadd.f32 %v111_v6, %v107_v7 }
  0x95   :  { %v118_v9 = vsel %vm117_vm1, %v113_v8, 0.0 }
  0x96   :  { %119 = vadd.xlane.f32.xlu0 %v118_v9 }
  0x98   :  { %v108_v10 = vpop.f32.mrf.mxu0 }
  0x99   :  { %v109_v12 = vadd.f32 %v7564_v4, %v108_v10 }
  0x9b   :  { %v114_v13 = vadd.f32 %v112_v11, %v109_v12 }
  0x9d   :  { %v121_v14 = vsel %vm117_vm1, %v114_v13, 0.0 }
  0x9e   :  { %122 = vadd.xlane.f32.xlu0 %v121_v14 }
 0x109   :  { %v120_v22 = vpop.xlane.xlu0 %119 }
 0x10a   :  { %v131_v23 = vmul.f32 %v7826_v21, %v120_v22 }
 0x10c   :  { %v133_v24 = vsub.f32 %v113_v8, %v131_v23 }
 0x10e   :  { %v135_v25 = vmul.f32 %v133_v24, %v133_v24 }
 0x110   :  { %v137_v26 = vsel %vm117_vm1, %v135_v25, 0.0 }
 0x111   :  { %138 = vadd.xlane.f32.xlu1 %v137_v26  ;;  %v123_v27 = vpop.xlane.xlu0 %122 }
 0x112   :  { %v132_v28 = vmul.f32 %v7826_v21, %v123_v27 }
 0x114   :  { %v134_v29 = vsub.f32 %v114_v13, %v132_v28 }
 0x116   :  { %v136_v30 = vmul.f32 %v134_v29, %v134_v29 }
 0x118   :  { %v140_v31 = vsel %vm117_vm1, %v136_v30, 0.0 }
 0x119   :  { %141 = vadd.xlane.f32.xlu1 %v140_v31 }
 0x184   :  { %v139_v33 = vpop.xlane.xlu1 %138 }
 0x185   :  { %v143_v35 = vmul.f32 %v139_v33, %v7826_v21 }
 0x187   :  { %v145_v36 = vadd.f32 1e-05, %v143_v35 }
 0x189   :  { %7586 = vrsqrt.f32 %v145_v36  ;;  %vm153_vm4 = vweird.f32 %v145_v36 }
 0x18c   :  { %v142_v37 = vpop.xlane.xlu1 %141 }
 0x18d   :  { %v144_v38 = vmul.f32 %v142_v37, %v7826_v21 }
 0x18f   :  { %v7587_v39 = vpop.eup %7586  ;;  %v146_v40 = vadd.f32 1e-05, %v144_v38 }
 0x190   :  { %v148_v41 = vmul.f32 %v7587_v39, %v145_v36  ;;  %vm154_vm3 = vweird.f32 %v7587_v39 }
 0x191   :  { %7588 = vrsqrt.f32 %v146_v40  ;;  %vm155_vm5 = vmor %vm153_vm4, %vm154_vm3  ;;  %vm163_vm7 = vweird.f32 %v146_v40 }
 0x192   :  { %v149_v42 = vmul.f32 %v7587_v39, %v148_v41 }
 0x194   :  { %v150_v43 = vmul.f32 0.5, %v149_v42 }
 0x196   :  { %v151_v44 = vsub.f32 1.5, %v150_v43 }
 0x197   :  { %v7589_v45 = vpop.eup %7588 }
 0x198   :  { %v152_v46 = vmul.f32 %v7587_v39, %v151_v44  ;;  %v158_v47 = vmul.f32 %v7589_v45, %v146_v40  ;;  %vm164_vm6 = vweird.f32 %v7589_v45 }
 0x199   :  { %vm165_vm8 = vmor %vm163_vm7, %vm164_vm6 }
 0x19a   :  { %v159_v48 = vmul.f32 %v7589_v45, %v158_v47  ;;  %v156_v49 = vsel %vm155_vm5, %v7587_v39, %v152_v46 }
 0x19b   :  { %v167_v52 = vmul.f32 %v156_v49, %v133_v24 }
 0x19c   :  { %v160_v50 = vmul.f32 0.5, %v159_v48 }
 0x19d   :  { %v172_v57 = vmul.f32 %v7565_v53, %v167_v52 }
 0x19e   :  { %v161_v51 = vsub.f32 1.5, %v160_v50 }
 0x19f   :  { %v7846_v60 = vadd.f32 %v7566_v58, %v172_v57 }
 0x1a0   :  { %v162_v54 = vmul.f32 %v7589_v45, %v161_v51 }
 0x1a2   :  { %v166_v55 = vsel %vm165_vm8, %v7589_v45, %v162_v54 }
 0x1a3   :  { %v168_v56 = vmul.f32 %v166_v55, %v134_v29 }
 0x1a5   :  { %v173_v59 = vmul.f32 %v7565_v53, %v168_v56 }
 0x1a7   :  { %v7848_v61 = vadd.f32 %v7566_v58, %v173_v59 }
 0x1a9   :  { %v184_v62 = vpack.c.bf16 %v7848_v61, %v7846_v60 }
 0x1ab   :  { %5492 = vmatmul.msk.bf16.vlgmr.msra.gmra.mxu1 %vm117_vm1, %v184_v62 }
 0x228   :  { %v212_v0 = vpop.f32.mrf.mxu1 }
 0x229   :  { %v7856_v1 = vadd.f32 %v7567_v63, %v212_v0 }
 0x22b   :  { %220 = vrot.lane.b32.xlu2 %v7856_v1, %s7675_s26  ;;  %v217_v2 = vmul.f32 0.35355338, %v7856_v1 }
 0x22d   :  { %298 = vrot.lane.b32.xlu0 %v217_v2, %s9601_s17 }
 0x230   :  { %v214_v3 = vpop.f32.mrf.mxu1 }
 0x231   :  { %v7871_v4 = vadd.f32 %v7567_v63, %v214_v3 }
 0x233   :  { %300 = vrot.lane.b32.xlu2 %v7856_v1, %s7677_s3  ;;  %v218_v5 = vmul.f32 0.35355338, %v7871_v4 }
 0x235   :  { %272 = vrot.lane.b32.xlu0 %v7856_v1, %s9595_s27 }
 0x23d   :  { %378 = vrot.lane.b32.xlu0 %v7856_v1, %s9599_s1 }
 0x245   :  { %456 = vrot.lane.b32.xlu0 %v7856_v1, %s7680_s28 }
 0x24d   :  { %454 = vrot.lane.b32.xlu0 %v217_v2, %s9597_s29 }
 0x255   :  { %628 = vrot.lane.b32.xlu0 %v7871_v4, %s7677_s3 }
 0x25d   :  { %706 = vrot.lane.b32.xlu0 %v7871_v4, %s9599_s1  ;;  %s9623_s1 = smov 80  }
 0x265   :  { %782 = vrot.lane.b32.xlu0 %v218_v5, %s9597_s29  ;;  %s9625_s29 = smov 64  }
 0x285   :  { %v221_v6 = vpop.permute.xlu2 %220 }
 0x286   :  { %5493 = vmatpush.xpose.msk.msra.mxu2 %vm222_vm9, %v221_v6 }
 0x289   :  { %5494 = vmatmul.msk.f32.vlgmr.msra.gmra.mxu2 %vm222_vm9, %v217_v2 }
 0x28d   :  { %v301_v7 = vpop.permute.xlu2 %300 }
 0x28e   :  { %5496 = vmatpush.xpose.msk.msra.mxu3 %vm222_vm9, %v301_v7 }
 0x29f   :  { %v299_v8 = vpop.permute.xlu0 %298 }
 0x2a0   :  { %5497 = vmatmul.msk.f32.vlgmr.msra.gmra.mxu3 %vm222_vm9, %v299_v8 }
 0x2a7   :  { %v273_v9 = vpop.permute.xlu0 %272 }
 0x2a8   :  { %293 = vmatpush.msrb.mxu2 %v273_v9 }
 0x2af   :  { %v379_v10 = vpop.permute.xlu0 %378 }
 0x2b0   :  { %5499 = vmatpush.xpose.msk.msrb.mxu3 %vm222_vm9, %v379_v10 }
 0x2b7   :  { %v457_v17 = vpop.permute.xlu0 %456 }
 0x2bf   :  { %v7894_v22 = vpop.permute.xlu0 %454 }
 0x2c7   :  { %v629_v23 = vpop.permute.xlu0 %628 }
 0x2cf   :  { %v707_v30 = vpop.permute.xlu0 %706 }
 0x2d7   :  { %v783_v6 = vpop.permute.xlu0 %782 }
 0x30c   :  { %v245_v11 = vpop.f32.mrf.mxu2 }
 0x30d   :  { %v248_v12 = vsel %vm222_vm9, %v245_v11, -inf }
 0x30e   :  { %249 = vmax.xlane.f32.xlu1 %v248_v12 }
 0x323   :  { %v323_v13 = vpop.f32.mrf.mxu3 }
 0x324   :  { %v326_v14 = vsel %vm222_vm9, %v323_v13, -inf }
 0x325   :  { %327 = vmax.xlane.f32.xlu2 %v326_v14 }
 0x327   :  { %350 = vrot.lane.b32.xlu1 %v7856_v1, %s9588_s30 }
 0x32f   :  { %549 = vrot.lane.b32.xlu1 %v7871_v4, %s7675_s26 }
 0x337   :  { %626 = vrot.lane.b32.xlu1 %v218_v5, %s9601_s17  ;;  %s9622_s17 = smov 120  }
 0x33d   :  { %376 = vrot.lane.b32.xlu2 %v217_v2, %s9603_s4 }
 0x345   :  { %704 = vrot.lane.b32.xlu2 %v218_v5, %s9603_s4  ;;  %s9629_s4 = smov 16  }
 0x381   :  { %v250_v15 = vpop.xlane.xlu1 %249 }
 0x382   :  { %v251_v16 = vsub.f32 %v245_v11, %v250_v15 }
 0x384   :  { %v252_v18 = vmul.f32 1.442695, %v251_v16 }
 0x386   :  { %7590 = vpow2.f32 %v252_v18 }
 0x38c   :  { %v7591_v19 = vpop.eup %7590 }
 0x38d   :  { %v254_v20 = vsel %vm222_vm9, %v7591_v19, 0.0 }
 0x38e   :  { %255 = vadd.xlane.f32.xlu1 %v254_v20 }
 0x398   :  { %v328_v24 = vpop.xlane.xlu2 %327 }
 0x399   :  { %v329_v25 = vsub.f32 %v323_v13, %v328_v24  ;;  %v351_v26 = vpop.permute.xlu1 %350 }
 0x39a   :  { %371 = vmatpush.msra.mxu2 %v351_v26 }
 0x39b   :  { %v330_v27 = vmul.f32 1.442695, %v329_v25 }
 0x39d   :  { %7592 = vpow2.f32 %v330_v27 }
 0x3a0   :  { %v377_v28 = vpop.permute.xlu2 %376 }
 0x3a1   :  { %5500 = vmatmul.msk.f32.vlgmr.msrb.gmra.mxu3 %vm222_vm9, %v377_v28  ;;  %v550_v29 = vpop.permute.xlu1 %549 }
 0x3a2   :  { %5505 = vmatpush.xpose.msk.msra.mxu3 %vm222_vm9, %v550_v29 }
 0x3a3   :  { %v7593_v31 = vpop.eup %7592 }
 0x3a4   :  { %v332_v32 = vsel %vm222_vm9, %v7593_v31, 0.0 }
 0x3a5   :  { %333 = vadd.xlane.f32.xlu1 %v332_v32 }
 0x3a6   :  { %5511 = vmatpush.xpose.msk.msrb.mxu3 %vm222_vm9, %v707_v30 }
 0x3a8   :  { %v705_v33 = vpop.permute.xlu2 %704 }
 0x3a9   :  { %5506 = vmatmul.msk.f32.vlgmr.msra.gmra.mxu3 %vm222_vm9, %v218_v5  ;;  %v627_v34 = vpop.permute.xlu1 %626 }
 0x3b1   :  { %5512 = vmatmul.msk.f32.vlgmr.msrb.gmra.mxu3 %vm222_vm9, %v705_v33 }
 0x3be   :  { %784 = vrot.lane.b32.xlu1 %v7871_v4, %s7680_s28 }
 0x401   :  { %v256_v35 = vpop.xlane.xlu1 %255 }
 0x402   :  { %7594 = vrcp.f32 %v256_v35  ;;  %v268_v39 = vand.u32 2147483648, %v256_v35  ;;  %v266_v41 = vand.u32 2147483647, %v256_v35  ;;  %vm262_vm11 = vweird.f32 %v256_v35 }
 0x404   :  { %v269_v43 = vor.u32 1.1754944e-38, %v268_v39  ;;  %vm267_vm13 = vcmp.eq.f32.partialorder %v266_v41, 8.507059e+37 }
 0x408   :  { %v7595_v36 = vpop.eup %7594 }
 0x409   :  { %v258_v37 = vmul.f32 %v7595_v36, %v256_v35  ;;  %vm263_vm10 = vweird.f32 %v7595_v36 }
 0x40a   :  { %vm264_vm12 = vmor %vm262_vm11, %vm263_vm10 }
 0x40b   :  { %v259_v38 = vsub.f32 1.0, %v258_v37 }
 0x40d   :  { %v260_v40 = vmul.f32 %v7595_v36, %v259_v38 }
 0x40f   :  { %v261_v42 = vadd.f32 %v7595_v36, %v260_v40 }
 0x411   :  { %v265_v44 = vsel %vm264_vm12, %v7595_v36, %v261_v42 }
 0x412   :  { %v270_v45 = vsel %vm267_vm13, %v269_v43, %v265_v44 }
 0x413   :  { %v271_v46 = vmul.f32 %v7591_v19, %v270_v45 }
 0x415   :  { %5495 = vmatmul.msk.f32.vlgmr.msrb.gmra.mxu2 %vm222_vm9, %v271_v46 }
 0x416   :  { %5502 = vmatpush.xpose.msk.msrb.mxu2 %vm222_vm9, %v457_v17 }
 0x418   :  { %v334_v47 = vpop.xlane.xlu1 %333 }
 0x419   :  { %7596 = vrcp.f32 %v334_v47  ;;  %v346_v51 = vand.u32 2147483648, %v334_v47  ;;  %v344_v53 = vand.u32 2147483647, %v334_v47  ;;  %vm340_vm15 = vweird.f32 %v334_v47 }
 0x41b   :  { %v347_v57 = vor.u32 1.1754944e-38, %v346_v51  ;;  %vm345_vm3 = vcmp.eq.f32.partialorder %v344_v53, 8.507059e+37 }
 0x41f   :  { %v7597_v48 = vpop.eup %7596 }
 0x420   :  { %v336_v49 = vmul.f32 %v7597_v48, %v334_v47  ;;  %vm341_vm14 = vweird.f32 %v7597_v48 }
 0x421   :  { %vm342_vm2 = vmor %vm340_vm15, %vm341_vm14 }
 0x422   :  { %v337_v50 = vsub.f32 1.0, %v336_v49 }
 0x424   :  { %v338_v52 = vmul.f32 %v7597_v48, %v337_v50  ;;  %v401_v54 = vpop.f32.mrf.mxu3 }
 0x425   :  { %v404_v55 = vsel %vm222_vm9, %v401_v54, -inf }
 0x426   :  { %v339_v56 = vadd.f32 %v7597_v48, %v338_v52  ;;  %405 = vmax.xlane.f32.xlu1 %v404_v55 }
 0x428   :  { %v343_v58 = vsel %vm342_vm2, %v7597_v48, %v339_v56 }
 0x429   :  { %v348_v59 = vsel %vm345_vm3, %v347_v57, %v343_v58 }
 0x42a   :  { %v349_v62 = vmul.f32 %v7593_v31, %v348_v59 }
 0x42c   :  { %5498 = vmatmul.msk.f32.vlgmr.msra.gmra.mxu2 %vm222_vm9, %v349_v62  ;;  %v573_v63 = vpop.f32.mrf.mxu3 }
 0x42d   :  { %5508 = vmatpush.xpose.msk.msra.mxu2 %vm222_vm9, %v629_v23  ;;  %v576_v0 = vsel %vm222_vm9, %v573_v63, -inf }
 0x42e   :  { %577 = vmax.xlane.f32.xlu0 %v576_v0 }
 0x430   :  { %v785_v2 = vpop.permute.xlu1 %784 }
 0x434   :  { %5503 = vmatmul.msk.f32.vlgmr.msrb.gmra.mxu2 %vm222_vm9, %v7894_v22  ;;  %v729_v3 = vpop.f32.mrf.mxu3 }
 0x435   :  { %5514 = vmatpush.xpose.msk.msrb.mxu2 %vm222_vm9, %v785_v2  ;;  %v732_v5 = vsel %vm222_vm9, %v729_v3, -inf }
 0x436   :  { %733 = vmax.xlane.f32.xlu1 %v732_v5 }
 0x43c   :  { %5509 = vmatmul.msk.f32.vlgmr.msra.gmra.mxu2 %vm222_vm9, %v627_v34 }
 0x444   :  { %5515 = vmatmul.msk.f32.vlgmr.msrb.gmra.mxu2 %vm222_vm9, %v783_v6 }
 0x498   :  { %v7920_v15 = vpop.f32.mrf.mxu2 }
 0x499   :  { %v406_v7 = vpop.xlane.xlu1 %405 }
 0x49a   :  { %v407_v8 = vsub.f32 %v401_v54, %v406_v7 }
 0x49c   :  { %v408_v9 = vmul.f32 1.442695, %v407_v8 }
 0x49e   :  { %7598 = vpow2.f32 %v408_v9 }
 0x4a1   :  { %v578_v10 = vpop.xlane.xlu0 %577 }
 0x4a2   :  { %v579_v11 = vsub.f32 %v573_v63, %v578_v10 }
 0x4a4   :  { %v7916_v12 = vpop.eup %7598  ;;  %v580_v13 = vmul.f32 1.442695, %v579_v11 }
 0x4a5   :  { %v410_v14 = vsel %vm222_vm9, %v7916_v12, 0.0 }
 0x4a6   :  { %7600 = vpow2.f32 %v580_v13  ;;  %411 = vadd.xlane.f32.xlu2 %v410_v14 }
 0x4a9   :  { %v734_v16 = vpop.xlane.xlu1 %733 }
 0x4aa   :  { %v735_v17 = vsub.f32 %v729_v3, %v734_v16 }
 0x4ac   :  { %v7922_v18 = vpop.eup %7600  ;;  %v736_v19 = vmul.f32 1.442695, %v735_v17 }
 0x4ad   :  { %v582_v20 = vsel %vm222_vm9, %v7922_v18, 0.0 }
 0x4ae   :  { %7602 = vpow2.f32 %v736_v19  ;;  %583 = vadd.xlane.f32.xlu0 %v582_v20 }
 0x4af   :  { %v7926_v22 = vpop.f32.mrf.mxu2 }
 0x4b4   :  { %v7928_v23 = vpop.eup %7602 }
 0x4b5   :  { %v738_v24 = vsel %vm222_vm9, %v7928_v23, 0.0 }
 0x4b6   :  { %739 = vadd.xlane.f32.xlu1 %v738_v24 }
 0x4b7   :  { %v479_v25 = vpop.f32.mrf.mxu2 }
 0x4b8   :  { %v482_v26 = vsel %vm222_vm9, %v479_v25, -inf }
 0x4b9   :  { %483 = vmax.xlane.f32.xlu2 %v482_v26 }
 0x4bf   :  { %v651_v27 = vpop.f32.mrf.mxu2 }
 0x4c0   :  { %v654_v28 = vsel %vm222_vm9, %v651_v27, -inf }
 0x4c1   :  { %655 = vmax.xlane.f32.xlu2 %v654_v28 }
 0x4c7   :  { %v807_v29 = vpop.f32.mrf.mxu2 }
 0x4c8   :  { %v810_v30 = vsel %vm222_vm9, %v807_v29, -inf }
 0x4c9   :  { %811 = vmax.xlane.f32.xlu0 %v810_v30 }
 0x4cf   :  { %506 = vrot.lane.b32.xlu1 %v7856_v1, %s9586_s2 }
 0x4d9   :  { %428 = vrot.lane.b32.xlu2 %v7856_v1, %s9590_s23 }
 0x4dd   :  { %600 = vrot.lane.b32.xlu0 %v7871_v4, %s9595_s27  ;;  %s9621_s27 = smov 112  }
 0x519   :  { %v412_v31 = vpop.xlane.xlu2 %411 }
 0x51a   :  { %7604 = vrcp.f32 %v412_v31  ;;  %v424_v41 = vand.u32 2147483648, %v412_v31  ;;  %vm418_vm5 = vweird.f32 %v412_v31  ;;  %v422_v1 = vand.u32 2147483647, %v412_v31 }
 0x51c   :  { %v425_v47 = vor.u32 1.1754944e-38, %v424_v41  ;;  %vm423_vm7 = vcmp.eq.f32.partialorder %v422_v1, 8.507059e+37 }
 0x520   :  { %v7605_v32 = vpop.eup %7604 }
 0x521   :  { %v414_v33 = vmul.f32 %v7605_v32, %v412_v31  ;;  %v584_v36 = vpop.xlane.xlu0 %583  ;;  %vm419_vm4 = vweird.f32 %v7605_v32 }
 0x522   :  { %7606 = vrcp.f32 %v584_v36  ;;  %vm420_vm6 = vmor %vm418_vm5, %vm419_vm4  ;;  %v596_v3 = vand.u32 2147483648, %v584_v36  ;;  %vm590_vm10 = vweird.f32 %v584_v36  ;;  %v594_v6 = vand.u32 2147483647, %v584_v36 }
 0x523   :  { %v415_v34 = vsub.f32 1.0, %v414_v33 }
 0x524   :  { %v597_v9 = vor.u32 1.1754944e-38, %v596_v3  ;;  %vm595_vm12 = vcmp.eq.f32.partialorder %v594_v6, 8.507059e+37 }
 0x525   :  { %v416_v38 = vmul.f32 %v7605_v32, %v415_v34 }
 0x527   :  { %v417_v40 = vadd.f32 %v7605_v32, %v416_v38 }
 0x528   :  { %v7607_v44 = vpop.eup %7606 }
 0x529   :  { %v421_v45 = vsel %vm420_vm6, %v7605_v32, %v417_v40  ;;  %v586_v50 = vmul.f32 %v7607_v44, %v584_v36  ;;  %v740_v51 = vpop.xlane.xlu1 %739  ;;  %vm591_vm8 = vweird.f32 %v7607_v44 }
 0x52a   :  { %v426_v52 = vsel %vm423_vm7, %v425_v47, %v421_v45  ;;  %vm592_vm11 = vmor %vm590_vm10, %vm591_vm8  ;;  %v752_v24 = vand.u32 2147483648, %v740_v51  ;;  %vm746_vm14 = vweird.f32 %v740_v51 }
 0x52b   :  { %v427_v55 = vmul.f32 %v7916_v12, %v426_v52  ;;  %v587_v56 = vsub.f32 1.0, %v586_v50 }
 0x52c   :  { %v484_v35 = vpop.xlane.xlu2 %483 }
 0x52d   :  { %v485_v37 = vsub.f32 %v479_v25, %v484_v35  ;;  %v588_v63 = vmul.f32 %v7607_v44, %v587_v56  ;;  %v750_v25 = vand.u32 2147483647, %v740_v51 }
 0x52f   :  { %v486_v39 = vmul.f32 1.442695, %v485_v37  ;;  %v589_v2 = vadd.f32 %v7607_v44, %v588_v63  ;;  %vm751_vm2 = vcmp.eq.f32.partialorder %v750_v25, 8.507059e+37 }
 0x531   :  { %7608 = vpow2.f32 %v486_v39  ;;  %v593_v8 = vsel %vm592_vm11, %v7607_v44, %v589_v2 }
 0x532   :  { %v598_v10 = vsel %vm595_vm12, %v597_v9, %v593_v8 }
 0x533   :  { %v599_v12 = vmul.f32 %v7922_v18, %v598_v10 }
 0x534   :  { %v656_v42 = vpop.xlane.xlu2 %655 }
 0x535   :  { %v657_v43 = vsub.f32 %v651_v27, %v656_v42 }
 0x537   :  { %v7941_v46 = vpop.eup %7608  ;;  %v658_v48 = vmul.f32 1.442695, %v657_v43 }
 0x538   :  { %v488_v49 = vsel %vm222_vm9, %v7941_v46, 0.0 }
 0x539   :  { %7610 = vpow2.f32 %v658_v48  ;;  %489 = vadd.xlane.f32.xlu1 %v488_v49 }
 0x53c   :  { %v812_v53 = vpop.xlane.xlu0 %811  ;;  %v429_v54 = vpop.permute.xlu2 %428 }
 0x53d   :  { %v813_v57 = vsub.f32 %v807_v29, %v812_v53  ;;  %449 = vmatpush.msrb.mxu0 %v429_v54 }
 0x53e   :  { %5501 = vmatmul.msk.f32.vlgmr.msrb.gmra.mxu0 %vm222_vm9, %v427_v55 }
 0x53f   :  { %v7947_v58 = vpop.eup %7610  ;;  %v814_v59 = vmul.f32 1.442695, %v813_v57 }
 0x540   :  { %v660_v62 = vsel %vm222_vm9, %v7947_v58, 0.0 }
 0x541   :  { %7612 = vpow2.f32 %v814_v59  ;;  %661 = vadd.xlane.f32.xlu2 %v660_v62  ;;  %v507_v0 = vpop.permute.xlu1 %506 }
 0x542   :  { %527 = vmatpush.msrb.mxu1 %v507_v0  ;;  %7614 = vrcp.f32 %v740_v51 }
 0x547   :  { %v7951_v5 = vpop.eup %7612 }
 0x548   :  { %v816_v7 = vsel %vm222_vm9, %v7951_v5, 0.0  ;;  %v7615_v13 = vpop.eup %7614 }
 0x549   :  { %817 = vadd.xlane.f32.xlu0 %v816_v7  ;;  %v742_v14 = vmul.f32 %v7615_v13, %v740_v51  ;;  %vm747_vm13 = vweird.f32 %v7615_v13 }
 0x54a   :  { %vm748_vm15 = vmor %vm746_vm14, %vm747_vm13 }
 0x54b   :  { %v743_v16 = vsub.f32 1.0, %v742_v14  ;;  %v7190_v14 = vld [vmem:[%s9568_s8] sm:$0xff] }
 0x54d   :  { %v744_v19 = vmul.f32 %v7615_v13, %v743_v16 }
 0x54f   :  { %v601_v11 = vpop.permute.xlu0 %600  ;;  %v745_v18 = vadd.f32 %v7615_v13, %v744_v19 }
 0x550   :  { %621 = vmatpush.msra.mxu0 %v601_v11 }
 0x551   :  { %5507 = vmatmul.msk.f32.vlgmr.msra.gmra.mxu0 %vm222_vm9, %v599_v12  ;;  %v749_v28 = vsel %vm748_vm15, %v7615_v13, %v745_v18 }
 0x552   :  { %834 = vrot.lane.b32.xlu1 %v7871_v4, %s9586_s2 }
 0x559   :  { %756 = vrot.lane.b32.xlu2 %v7871_v4, %s9590_s23 }
 0x55d   :  { %678 = vrot.lane.b32.xlu0 %v7871_v4, %s9588_s30  ;;  %v753_v4 = vor.u32 1.1754944e-38, %v752_v24  ;;  %s9620_s30 = sld [smem:[#allocation12_spill]] }
 0x55f   :  { %v754_v32 = vsel %vm751_vm2, %v753_v4, %v749_v28  ;;  %vm546_vm2 = vcmask 195584  }
 0x560   :  { %v755_v40 = vmul.f32 %v7928_v23, %v754_v32 }
 0x5ac   :  { %v490_v17 = vpop.xlane.xlu1 %489 }
 0x5ad   :  { %7616 = vrcp.f32 %v490_v17  ;;  %v502_v31 = vand.u32 2147483648, %v490_v17  ;;  %v500_v33 = vand.u32 2147483647, %v490_v17  ;;  %vm496_vm4 = vweird.f32 %v490_v17 }
 0x5af   :  { %v503_v36 = vor.u32 1.1754944e-38, %v502_v31  ;;  %vm501_vm6 = vcmp.eq.f32.partialorder %v500_v33, 8.507059e+37 }
 0x5b3   :  { %v7617_v20 = vpop.eup %7616 }
 0x5b4   :  { %v492_v26 = vmul.f32 %v7617_v20, %v490_v17  ;;  %v662_v27 = vpop.xlane.xlu2 %661  ;;  %vm497_vm3 = vweird.f32 %v7617_v20 }
 0x5b5   :  { %7618 = vrcp.f32 %v662_v27  ;;  %vm498_vm5 = vmor %vm496_vm4, %vm497_vm3  ;;  %v674_v49 = vand.u32 2147483648, %v662_v27  ;;  %vm668_vm8 = vweird.f32 %v662_v27  ;;  %v672_v23 = vand.u32 2147483647, %v662_v27 }
 0x5b6   :  { %v493_v29 = vsub.f32 1.0, %v492_v26 }
 0x5b7   :  { %v675_v53 = vor.u32 1.1754944e-38, %v674_v49  ;;  %vm673_vm11 = vcmp.eq.f32.partialorder %v672_v23, 8.507059e+37  ;;  %v5592_v49 = vld [vmem:[%s9571_s12 + $0x80] sm:$0xf]  ;;  %v7208_v23 = vld [vmem:[%s9571_s12 + $0x84] sm:$0xf] }
 0x5b8   :  { %v494_v30 = vmul.f32 %v7617_v20, %v493_v29 }
 0x5ba   :  { %v495_v34 = vadd.f32 %v7617_v20, %v494_v30 }
 0x5bb   :  { %v7619_v35 = vpop.eup %7618  ;;  %v451_v6 = vpop.f32.mrf.mxu0 }
 0x5bc   :  { %v664_v37 = vmul.f32 %v7619_v35, %v662_v27  ;;  %v818_v38 = vpop.xlane.xlu0 %817  ;;  %v757_v39 = vpop.permute.xlu2 %756  ;;  %v499_v41 = vsel %vm498_vm5, %v7617_v20, %v495_v34  ;;  %vm669_vm7 = vweird.f32 %v7619_v35 }
 0x5bd   :  { %7620 = vrcp.f32 %v818_v38  ;;  %777 = vmatpush.msrb.mxu0 %v757_v39  ;;  %v504_v42 = vsel %vm501_vm6, %v503_v36, %v499_v41  ;;  %vm670_vm10 = vmor %vm668_vm8, %vm669_vm7  ;;  %vm824_vm13 = vweird.f32 %v818_v38  ;;  %v828_v56 = vand.u32 2147483647, %v818_v38 }
 0x5be   :  { %v665_v1 = vsub.f32 1.0, %v664_v37  ;;  %5513 = vmatmul.msk.f32.vlgmr.msrb.gmra.mxu0 %vm222_vm9, %v755_v40  ;;  %v505_v43 = vmul.f32 %v7941_v46, %v504_v42  ;;  %v830_v46 = vand.u32 2147483648, %v818_v38 }
 0x5bf   :  { %vm829_vm15 = vcmp.eq.f32.partialorder %v828_v56, 8.507059e+37 }
 0x5c0   :  { %v666_v44 = vmul.f32 %v7619_v35, %v665_v1  ;;  %5504 = vmatmul.msk.f32.vlgmr.msrb.gmra.mxu1 %vm222_vm9, %v505_v43  ;;  %v831_v0 = vor.u32 1.1754944e-38, %v830_v46 }
 0x5c2   :  { %v667_v48 = vadd.f32 %v7619_v35, %v666_v44 }
 0x5c3   :  { %v7621_v45 = vpop.eup %7620 }
 0x5c4   :  { %v820_v47 = vmul.f32 %v7621_v45, %v818_v38  ;;  %v671_v51 = vsel %vm670_vm10, %v7619_v35, %v667_v48  ;;  %vm825_vm12 = vweird.f32 %v7621_v45  ;;  %v835_v63 = vpop.permute.xlu1 %834 }
 0x5c5   :  { %v676_v54 = vsel %vm673_vm11, %v675_v53, %v671_v51  ;;  %vm826_vm14 = vmor %vm824_vm13, %vm825_vm12  ;;  %v5600_v53 = vld [vmem:[%s9571_s12 + $0x88] sm:$0xf] }
 0x5c6   :  { %v821_v50 = vsub.f32 1.0, %v820_v47  ;;  %v677_v59 = vmul.f32 %v7947_v58, %v676_v54  ;;  %v7217_v54 = vld [vmem:[%s9571_s12 + $0xc4] sm:$0xf0] }
 0x5c7   :  { %v5601_v56 = vor.u32 %v7217_v54, %v5600_v53  ;;  %v7569_v53 = vld [vmem:[%s9569_s10] ss:$0 sm:$0xff] }
 0x5c8   :  { %v822_v52 = vmul.f32 %v7621_v45, %v821_v50  ;;  %v7216_v50 = vld [vmem:[%s9571_s12 + $0xbc] sm:$0xf0] }
 0x5c9   :  { %v5593_v51 = vor.u32 %v7216_v50, %v5592_v49 }
 0x5ca   :  { %v823_v55 = vadd.f32 %v7621_v45, %v822_v52  ;;  %v5594_v52 = vld [vmem:[%s9571_s12 + $0xc0] sm:$0xf0] }
 0x5cb   :  { %v5597_v46 = vor.u32 %v7208_v23, %v5594_v52  ;;  %1209 = vmatpush.bf16.msra.mxu0 %v5593_v51 }
 0x5cc   :  { %v827_v62 = vsel %vm826_vm14, %v7621_v45, %v823_v55 }
 0x5cd   :  { %v832_v2 = vsel %vm829_vm15, %v831_v0, %v827_v62  ;;  %1223 = vmatpush.bf16.msra.mxu2 %v5597_v46  ;;  %v5528_v0 = vld [vmem:[%s9571_s12] sm:$0xf] }
 0x5ce   :  { %v833_v3 = vmul.f32 %v7951_v5, %v832_v2  ;;  %v623_v7 = vpop.f32.mrf.mxu0  ;;  %v7191_v5 = vld [vmem:[%s9568_s8 + $0x8] sm:$0xff]  ;;  %v7200_v2 = vld [vmem:[%s9571_s12 + $0x3c] sm:$0xf0] }
 0x5cf   :  { %v679_v57 = vpop.permute.xlu0 %678  ;;  %905 = vmatpush.bf16.msra.mxu3 %v7191_v5 }
 0x5d0   :  { %699 = vmatpush.msra.mxu1 %v679_v57  ;;  %v7209_v57 = vld [vmem:[%s9571_s12 + $0x8c] sm:$0xf] }
 0x5d1   :  { %5510 = vmatmul.msk.f32.vlgmr.msra.gmra.mxu1 %vm222_vm9, %v677_v59  ;;  %v5602_v59 = vld [vmem:[%s9571_s12 + $0xc8] sm:$0xf0] }
 0x5d2   :  { %855 = vmatpush.msrb.mxu1 %v835_v63  ;;  %v5605_v63 = vor.u32 %v7209_v57, %v5602_v59 }
 0x5d3   :  { %906 = vmatpush.bf16.msra.mxu3 %v7190_v14 }
 0x5d4   :  { %1237 = vmatpush.bf16.msra.mxu1 %v5601_v56  ;;  %v7570_v56 = vld [vmem:[%s9570_s11] ss:$0 sm:$0xff] }
 0x5d7   :  { %1251 = vmatpush.bf16.msrb.mxu3 %v5605_v63  ;;  %v5624_v63 = vld [vmem:[%s9571_s12 + $0xa0] sm:$0xf] }
 0x5d9   :  { %5516 = vmatmul.msk.f32.vlgmr.msrb.gmra.mxu1 %vm222_vm9, %v833_v3  ;;  %v7192_v3 = vld [vmem:[%s9571_s12 + $0x4] sm:$0xf] }
 0x63b   :  { %v779_v8 = vpop.f32.mrf.mxu0 }
 0x63c   :  { %v7537_v9 = vpack.i.bf16 %v779_v8, %v451_v6  ;;  %v5530_v8 = vld [vmem:[%s9571_s12 + $0x40] sm:$0xf0] }
 0x63d   :  { %v529_v58 = vpop.f32.mrf.mxu1 }
 0x63e   :  { %7538 = vrot.lane.b32.xlu2 %v7537_v9, %s9594_s0  ;;  %v5536_v9 = vld [vmem:[%s9571_s12 + $0x8] sm:$0xf]  ;;  %s9630_s0 = smov 8  }
 0x64e   :  { %v701_v10 = vpop.f32.mrf.mxu1 }
 0x64f   :  { %v7532_v11 = vpack.i.bf16 %v701_v10, %v7926_v22  ;;  %v7201_v10 = vld [vmem:[%s9571_s12 + $0x44] sm:$0xf0] }
 0x651   :  { %7533 = vrot.lane.b32.xlu0 %v7532_v11, %s9593_s5  ;;  %v7193_v11 = vld [vmem:[%s9571_s12 + $0xc] sm:$0xf] }
 0x656   :  { %v857_v12 = vpop.f32.mrf.mxu1 }
 0x657   :  { %v7542_v13 = vpack.i.bf16 %v857_v12, %v529_v58  ;;  %v5533_v58 = vor.u32 %v7192_v3, %v5530_v8  ;;  %v5538_v12 = vld [vmem:[%s9571_s12 + $0x48] sm:$0xf0] }
 0x658   :  { %v5541_v5 = vor.u32 %v7193_v11, %v5538_v12  ;;  %v7213_v8 = vld [vmem:[%s9571_s12 + $0xac] sm:$0xf]  ;;  %v5560_v12 = vld [vmem:[%s9571_s12 + $0x20] sm:$0xf] }
 0x659   :  { %7543 = vrot.lane.b32.xlu1 %v7542_v13, %s9592_s24  ;;  %v5537_v13 = vor.u32 %v7201_v10, %v5536_v9  ;;  %1224 = vmatpush.bf16.msra.mxu2 %v5533_v58  ;;  %v5634_v9 = vld [vmem:[%s9571_s12 + $0xe8] sm:$0xf0] }
 0x65a   :  { %1252 = vmatpush.bf16.msrb.mxu3 %v5541_v5 }
 0x65b   :  { %1238 = vmatpush.bf16.msra.mxu1 %v5537_v13  ;;  %v7204_v13 = vld [vmem:[%s9571_s12 + $0x5c] sm:$0xf0] }
 0x698   :  { %v7539_v19 = vpop.permute.xlu2 %7538 }
 0x699   :  { %v7541_v24 = vunpack.i.h.bf16 %v7539_v19  ;;  %v7540_v25 = vunpack.i.l.bf16 %v7539_v19 }
 0x6c3   :  { %v7534_v16 = vpop.permute.xlu0 %7533 }
 0x6c4   :  { %v7536_v22 = vunpack.i.h.bf16 %v7534_v16  ;;  %v7535_v17 = vunpack.i.l.bf16 %v7534_v16  ;;  %v5608_v16 = vld [vmem:[%s9571_s12 + $0x90] sm:$0xf] }
 0x6c6   :  { %v872_v18 = vsel %vm222_vm9, %v623_v7, %v7536_v22  ;;  %v544_v20 = vsel %vm222_vm9, %v7920_v15, %v7535_v17  ;;  %v7568_v15 = vld [vmem:[%s9567_s9] ss:$0 sm:$0xff]  ;;  %v5529_v7 = vor.u32 %v7200_v2, %v5528_v0  ;;  %v7218_v22 = vld [vmem:[%s9571_s12 + $0xcc] sm:$0xf0]  ;;  %v7210_v17 = vld [vmem:[%s9571_s12 + $0x94] sm:$0xf] }
 0x6c7   :  { %v545_v29 = vsel %vm93_vm0, %v544_v20, %v7540_v25  ;;  %v873_v4 = vsel %vm93_vm0, %v872_v18, %v7541_v24  ;;  %v5609_v18 = vor.u32 %v7218_v22, %v5608_v16  ;;  %v5610_v20 = vld [vmem:[%s9571_s12 + $0xd0] sm:$0xf0]  ;;  %v5616_v24 = vld [vmem:[%s9571_s12 + $0x98] sm:$0xf]  ;;  %v7212_v0 = vld [vmem:[%s9571_s12 + $0xa4] sm:$0xf] }
 0x6c8   :  { %1210 = vmatpush.bf16.msra.mxu0 %v5529_v7  ;;  %v7219_v25 = vld [vmem:[%s9571_s12 + $0xd4] sm:$0xf0]  ;;  %v5626_v2 = vld [vmem:[%s9571_s12 + $0xe0] sm:$0xf0]  ;;  %v7221_v7 = vld [vmem:[%s9571_s12 + $0xe4] sm:$0xf0] }
 0x6c9   :  { %v5629_v11 = vor.u32 %v7212_v0, %v5626_v2  ;;  %v7196_v16 = vld [vmem:[%s9571_s12 + $0x24] sm:$0xf] }
 0x6ca   :  { %v5562_v22 = vld [vmem:[%s9571_s12 + $0x60] sm:$0xf0] }
 0x6cb   :  { %v7544_v26 = vpop.permute.xlu1 %7543  ;;  %v7236_v0 = vld [vmem:[%s9572_s14 + $0x60] sm:$0xff] }
 0x6cc   :  { %v7546_v27 = vunpack.i.h.bf16 %v7544_v26  ;;  %v7545_v28 = vunpack.i.l.bf16 %v7544_v26  ;;  %v5613_v26 = vor.u32 %v7210_v17, %v5610_v20  ;;  %1265 = vmatpush.bf16.msrb.mxu0 %v5609_v18  ;;  %v5568_v17 = vld [vmem:[%s9571_s12 + $0x28] sm:$0xf]  ;;  %v7197_v18 = vld [vmem:[%s9571_s12 + $0x2c] sm:$0xf]  ;;  %v7252_v2 = vld [vmem:[%s9572_s14 + $0xe0] sm:$0xff] }
 0x6cd   :  { %v5570_v20 = vld [vmem:[%s9571_s12 + $0x68] sm:$0xf0] }
 0x6ce   :  { %v874_v30 = vsel %vm546_vm2, %v873_v4, %v7546_v27  ;;  %v547_v31 = vsel %vm546_vm2, %v545_v29, %v7545_v28  ;;  %v5617_v27 = vor.u32 %v7219_v25, %v5616_v24  ;;  %v7211_v28 = vld [vmem:[%s9571_s12 + $0x9c] sm:$0xf]  ;;  %v5544_v4 = vld [vmem:[%s9571_s12 + $0x10] sm:$0xf]  ;;  %1279 = vmatpush.bf16.msrb.mxu2 %v5613_v26  ;;  %v5561_v24 = vor.u32 %v7204_v13, %v5560_v12  ;;  %v7225_v13 = vld [vmem:[%s9572_s14 + $0x8] sm:$0xff] }
 0x6cf   :  { %v880_v32 = vpack.c.bf16 %v874_v30, %v547_v31  ;;  %v5618_v29 = vld [vmem:[%s9571_s12 + $0xd8] sm:$0xf0]  ;;  %v5565_v25 = vor.u32 %v7196_v16, %v5562_v22  ;;  %v7234_v12 = vld [vmem:[%s9572_s14 + $0x50] sm:$0xff]  ;;  %v7249_v16 = vld [vmem:[%s9572_s14 + $0xc8] sm:$0xff] }
 0x6d0   :  { %1293 = vmatpush.bf16.msrb.mxu1 %v5617_v27  ;;  %v5573_v27 = vor.u32 %v7197_v18, %v5570_v20  ;;  %v7224_v22 = vld [vmem:[%s9572_s14] sm:$0xff]  ;;  %v7279_v18 = vld [vmem:[%s9572_s14 + $0x1b8] sm:$0xff] }
 0x6d1   :  { %5525 = vmatmul.msk.bf16.vlgmr.msra.gmra.mxu3 %vm117_vm1, %v880_v32  ;;  %v5621_v32 = vor.u32 %v7211_v28, %v5618_v29  ;;  %v5640_v28 = vld [vmem:[%s9571_s12 + $0xb0] sm:$0xf]  ;;  %v7232_v20 = vld [vmem:[%s9572_s14 + $0x40] sm:$0xff] }
 0x6d2   :  { %v7222_v29 = vld [vmem:[%s9571_s12 + $0xec] sm:$0xf0] }
 0x6d3   :  { %1307 = vmatpush.bf16.msra.mxu3 %v5621_v32  ;;  %v7223_v32 = vld [vmem:[%s9571_s12 + $0xf4] sm:$0xf0] }
 0x754   :  { %v908_v33 = vpop.f32.mrf.mxu3 }
 0x755   :  { %v909_v34 = vadd.f32 %v7568_v15, %v908_v33  ;;  %v7194_v33 = vld [vmem:[%s9571_s12 + $0x14] sm:$0xf] }
 0x757   :  { %v913_v35 = vadd.f32 %v909_v34, %v7846_v60 }
 0x759   :  { %v917_v36 = vsel %vm117_vm1, %v913_v35, 0.0 }
 0x75a   :  { %918 = vadd.xlane.f32.xlu0 %v917_v36  ;;  %v5546_v36 = vld [vmem:[%s9571_s12 + $0x50] sm:$0xf0] }
 0x75c   :  { %v910_v37 = vpop.f32.mrf.mxu3 }
 0x75d   :  { %v911_v38 = vadd.f32 %v7568_v15, %v910_v37  ;;  %v7202_v15 = vld [vmem:[%s9571_s12 + $0x4c] sm:$0xf0]  ;;  %v5552_v37 = vld [vmem:[%s9571_s12 + $0x18] sm:$0xf] }
 0x75f   :  { %v914_v39 = vadd.f32 %v911_v38, %v7848_v61  ;;  %v7203_v38 = vld [vmem:[%s9571_s12 + $0x54] sm:$0xf0] }
 0x761   :  { %v920_v40 = vsel %vm117_vm1, %v914_v39, 0.0 }
 0x762   :  { %921 = vadd.xlane.f32.xlu2 %v920_v40  ;;  %v5553_v40 = vor.u32 %v7203_v38, %v5552_v37  ;;  %v7206_v37 = vld [vmem:[%s9571_s12 + $0x6c] sm:$0xf0] }
 0x764   :  { %1294 = vmatpush.bf16.msrb.mxu1 %v5553_v40  ;;  %v7198_v40 = vld [vmem:[%s9571_s12 + $0x34] sm:$0xf] }
 0x7cd   :  { %v919_v41 = vpop.xlane.xlu0 %918 }
 0x7ce   :  { %v923_v1 = vmul.f32 %v919_v41, %v7826_v21  ;;  %v7195_v41 = vld [vmem:[%s9571_s12 + $0x1c] sm:$0xf] }
 0x7d0   :  { %v7997_v42 = vsub.f32 %v913_v35, %v923_v1  ;;  %v5545_v35 = vor.u32 %v7202_v15, %v5544_v4  ;;  %v5554_v1 = vld [vmem:[%s9571_s12 + $0x58] sm:$0xf0]  ;;  %v7214_v4 = vld [vmem:[%s9571_s12 + $0xb4] sm:$0xf] }
 0x7d1   :  { %v7215_v15 = vld [vmem:[%s9571_s12 + $0xbc] sm:$0xf] }
 0x7d2   :  { %v927_v43 = vmul.f32 %v7997_v42, %v7997_v42  ;;  %1266 = vmatpush.bf16.msrb.mxu0 %v5545_v35 }
 0x7d4   :  { %v929_v60 = vsel %vm117_vm1, %v927_v43, 0.0 }
 0x7d5   :  { %v922_v44 = vpop.xlane.xlu2 %921  ;;  %930 = vadd.xlane.f32.xlu1 %v929_v60  ;;  %v5557_v60 = vor.u32 %v7195_v41, %v5554_v1  ;;  %v5578_v41 = vld [vmem:[%s9571_s12 + $0x70] sm:$0xf0]  ;;  %v5584_v1 = vld [vmem:[%s9571_s12 + $0x38] sm:$0xf] }
 0x7d6   :  { %v924_v45 = vmul.f32 %v922_v44, %v7826_v21 }
 0x7d7   :  { %1308 = vmatpush.bf16.msra.mxu3 %v5557_v60  ;;  %v7199_v60 = vld [vmem:[%s9571_s12 + $0x3c] sm:$0xf] }
 0x7d8   :  { %v8003_v47 = vsub.f32 %v914_v39, %v924_v45  ;;  %v5549_v39 = vor.u32 %v7194_v33, %v5546_v36  ;;  %v5650_v33 = vld [vmem:[%s9571_s12 + $0xf8] sm:$0xf0]  ;;  %v5576_v36 = vld [vmem:[%s9571_s12 + $0x30] sm:$0xf] }
 0x7da   :  { %v928_v61 = vmul.f32 %v8003_v47, %v8003_v47  ;;  %1280 = vmatpush.bf16.msrb.mxu2 %v5549_v39  ;;  %v5653_v39 = vor.u32 %v7215_v15, %v5650_v33  ;;  %v7276_v15 = vld [vmem:[%s9572_s14 + $0x1a0] sm:$0xff]  ;;  %v7269_v33 = vld [vmem:[%s9572_s14 + $0x168] sm:$0xff] }
 0x7dc   :  { %v932_v48 = vsel %vm117_vm1, %v928_v61, 0.0 }
 0x7dd   :  { %933 = vadd.xlane.f32.xlu2 %v932_v48 }
 0x848   :  { %v931_v55 = vpop.xlane.xlu1 %930 }
 0x849   :  { %v935_v62 = vmul.f32 %v931_v55, %v7826_v21 }
 0x84b   :  { %v8042_v6 = vadd.f32 1e-05, %v935_v62 }
 0x84d   :  { %7622 = vrsqrt.f32 %v8042_v6  ;;  %vm945_vm4 = vweird.f32 %v8042_v6 }
 0x850   :  { %v934_v14 = vpop.xlane.xlu2 %933 }
 0x851   :  { %v936_v19 = vmul.f32 %v934_v14, %v7826_v21  ;;  %v5637_v14 = vor.u32 %v7213_v8, %v5634_v9  ;;  %v7235_v8 = vld [vmem:[%s9572_s14 + $0x58] sm:$0xff] }
 0x852   :  { %v7251_v9 = vld [vmem:[%s9572_s14 + $0xd8] sm:$0xff] }
 0x853   :  { %v7623_v30 = vpop.eup %7622  ;;  %v938_v31 = vadd.f32 1e-05, %v936_v19  ;;  %v7205_v19 = vld [vmem:[%s9571_s12 + $0x64] sm:$0xf0] }
 0x854   :  { %v940_v34 = vmul.f32 %v7623_v30, %v8042_v6  ;;  %vm946_vm3 = vweird.f32 %v7623_v30  ;;  %v5569_v26 = vor.u32 %v7205_v19, %v5568_v17  ;;  %v7240_v17 = vld [vmem:[%s9572_s14 + $0x80] sm:$0xff]  ;;  %v7263_v19 = vld [vmem:[%s9572_s14 + $0x138] sm:$0xff] }
 0x855   :  { %7624 = vrsqrt.f32 %v938_v31  ;;  %vm947_vm5 = vmor %vm945_vm4, %vm946_vm3  ;;  %vm955_vm7 = vweird.f32 %v938_v31 }
 0x856   :  { %v941_v43 = vmul.f32 %v7623_v30, %v940_v34  ;;  %v5641_v34 = vor.u32 %v7222_v29, %v5640_v28  ;;  %v7278_v28 = vld [vmem:[%s9572_s14 + $0x1b0] sm:$0xff] }
 0x857   :  { %v7270_v29 = vld [vmem:[%s9572_s14 + $0x170] sm:$0xff] }
 0x858   :  { %v942_v44 = vmul.f32 0.5, %v941_v43  ;;  %v7207_v43 = vld [vmem:[%s9571_s12 + $0x74] sm:$0xf0] }
 0x85a   :  { %v943_v45 = vsub.f32 1.5, %v942_v44  ;;  %v5586_v44 = vld [vmem:[%s9571_s12 + $0x78] sm:$0xf0] }
 0x85b   :  { %v7625_v61 = vpop.eup %7624 }
 0x85c   :  { %v944_v48 = vmul.f32 %v7623_v30, %v943_v45  ;;  %v950_v49 = vmul.f32 %v7625_v61, %v938_v31  ;;  %vm956_vm6 = vweird.f32 %v7625_v61  ;;  %v5648_v31 = vld [vmem:[%s9571_s12 + $0xb8] sm:$0xf]  ;;  %v5577_v45 = vor.u32 %v7206_v37, %v5576_v36  ;;  %v7268_v37 = vld [vmem:[%s9572_s14 + $0x160] sm:$0xff] }
 0x85d   :  { %vm957_vm8 = vmor %vm955_vm7, %vm956_vm6  ;;  %v5649_v38 = vor.u32 %v7223_v32, %v5648_v31  ;;  %v7277_v31 = vld [vmem:[%s9572_s14 + $0x1a8] sm:$0xff]  ;;  %v7260_v32 = vld [vmem:[%s9572_s14 + $0x120] sm:$0xff] }
 0x85e   :  { %v951_v50 = vmul.f32 %v7625_v61, %v950_v49  ;;  %v948_v23 = vsel %vm947_vm5, %v7623_v30, %v944_v48  ;;  %v5642_v30 = vld [vmem:[%s9571_s12 + $0xf0] sm:$0xf0]  ;;  %v5585_v48 = vor.u32 %v7207_v43, %v5584_v1  ;;  %v5589_v49 = vor.u32 %v7199_v60, %v5586_v44  ;;  %v7275_v36 = vld [vmem:[%s9572_s14 + $0x198] sm:$0xff]  ;;  %v7257_v43 = vld [vmem:[%s9572_s14 + $0x108] sm:$0xff] }
 0x85f   :  { %v959_v54 = vmul.f32 %v948_v23, %v7997_v42  ;;  %v7220_v42 = vld [vmem:[%s9571_s12 + $0xdc] sm:$0xf0]  ;;  %v5645_v35 = vor.u32 %v7214_v4, %v5642_v30  ;;  %v7247_v23 = vld [vmem:[%s9572_s14 + $0xb8] sm:$0xff]  ;;  %v7286_v4 = vld [vmem:[%s9572_s14 + $0x1f0] sm:$0xff] }
 0x860   :  { %v952_v51 = vmul.f32 0.5, %v951_v50  ;;  %v5625_v10 = vor.u32 %v7220_v42, %v5624_v63  ;;  %v7231_v50 = vld [vmem:[%s9572_s14 + $0x38] sm:$0xff]  ;;  %v7228_v63 = vld [vmem:[%s9572_s14 + $0x20] sm:$0xff]  ;;  %v7261_v30 = vld [vmem:[%s9572_s14 + $0x128] sm:$0xff] }
 0x861   :  { %v964_v57 = vmul.f32 %v7569_v53, %v959_v54  ;;  %v7246_v54 = vld [vmem:[%s9572_s14 + $0xb0] sm:$0xff]  ;;  %v7244_v42 = vld [vmem:[%s9572_s14 + $0xa0] sm:$0xff]  ;;  %v7283_v1 = vld [vmem:[%s9572_s14 + $0x1d8] sm:$0xff] }
 0x862   :  { %v953_v52 = vsub.f32 1.5, %v952_v51  ;;  %v7239_v51 = vld [vmem:[%s9572_s14 + $0x78] sm:$0xff]  ;;  %v7273_v60 = vld [vmem:[%s9572_s14 + $0x188] sm:$0xff]  ;;  %v7266_v44 = vld [vmem:[%s9572_s14 + $0x150] sm:$0xff] }
 0x863   :  { %v8134_v3 = vadd.f32 %v7570_v56, %v964_v57  ;;  %v7245_v57 = vld [vmem:[%s9572_s14 + $0xa8] sm:$0xff] }
 0x864   :  { %v954_v55 = vmul.f32 %v7625_v61, %v953_v52  ;;  %v7255_v52 = vld [vmem:[%s9572_s14 + $0xf8] sm:$0xff] }
 0x866   :  { %v958_v46 = vsel %vm957_vm8, %v7625_v61, %v954_v55  ;;  %v5581_v61 = vor.u32 %v7198_v40, %v5578_v41  ;;  %v7238_v55 = vld [vmem:[%s9572_s14 + $0x70] sm:$0xff]  ;;  %v7267_v41 = vld [vmem:[%s9572_s14 + $0x158] sm:$0xff] }
 0x867   :  { %v960_v59 = vmul.f32 %v958_v46, %v8003_v47  ;;  %v5632_v47 = vld [vmem:[%s9571_s12 + $0xa8] sm:$0xf]  ;;  %v7254_v46 = vld [vmem:[%s9572_s14 + $0xf0] sm:$0xff] }
 0x868   :  { %v5633_v5 = vor.u32 %v7221_v7, %v5632_v47  ;;  %v7227_v47 = vld [vmem:[%s9572_s14 + $0x18] sm:$0xff]  ;;  %v7274_v40 = vld [vmem:[%s9572_s14 + $0x190] sm:$0xff] }
 0x869   :  { %v965_v62 = vmul.f32 %v7569_v53, %v960_v59  ;;  %v7230_v53 = vld [vmem:[%s9572_s14 + $0x30] sm:$0xff]  ;;  %v7237_v59 = vld [vmem:[%s9572_s14 + $0x68] sm:$0xff]  ;;  %v7243_v7 = vld [vmem:[%s9572_s14 + $0x98] sm:$0xff] }
 0x86b   :  { %v8136_v6 = vadd.f32 %v7570_v56, %v965_v62  ;;  %v7229_v56 = vld [vmem:[%s9572_s14 + $0x28] sm:$0xff] }
 0x86c   :  { %v7253_v62 = vld [vmem:[%s9572_s14 + $0xe8] sm:$0xff] }
 0x86d   :  { %v8149_v58 = vpack.c.bf16 %v8136_v6, %v8134_v3 }
 0x86f   :  { %5654 = vmatmul.msk.bf16.vlgmr.msra.gmra.mxu0 %vm117_vm1, %v8149_v58  ;;  %5655 = vmatmul.msk.bf16.vlgmr.msra.gmra.mxu2 %vm117_vm1, %v8149_v58 }
 0x870   :  { %5656 = vmatmul.msk.bf16.vlgmr.msra.gmra.mxu1 %vm117_vm1, %v8149_v58  ;;  %5657 = vmatmul.msk.bf16.vlgmr.msrb.gmra.mxu3 %vm117_vm1, %v8149_v58 }
 0x871   :  { %1321 = vmatpush.bf16.msra.mxu0 %v5625_v10  ;;  %1335 = vmatpush.bf16.msra.mxu2 %v5629_v11  ;;  %v7226_v10 = vld [vmem:[%s9572_s14 + $0x10] sm:$0xff] }
 0x872   :  { %1349 = vmatpush.bf16.msra.mxu1 %v5633_v5  ;;  %1363 = vmatpush.bf16.msrb.mxu3 %v5637_v14  ;;  %v7242_v11 = vld [vmem:[%s9572_s14 + $0x90] sm:$0xff]  ;;  %v7241_v5 = vld [vmem:[%s9572_s14 + $0x88] sm:$0xff] }
 0x873   :  { %v7233_v14 = vld [vmem:[%s9572_s14 + $0x48] sm:$0xff] }
 0x875   :  { %1322 = vmatpush.bf16.msra.mxu0 %v5561_v24  ;;  %1336 = vmatpush.bf16.msra.mxu2 %v5565_v25  ;;  %v7248_v24 = vld [vmem:[%s9572_s14 + $0xc0] sm:$0xff]  ;;  %v7271_v25 = vld [vmem:[%s9572_s14 + $0x178] sm:$0xff] }
 0x876   :  { %1350 = vmatpush.bf16.msra.mxu1 %v5569_v26  ;;  %1364 = vmatpush.bf16.msrb.mxu3 %v5573_v27  ;;  %v7287_v26 = vld [vmem:[%s9572_s14 + $0x1f8] sm:$0xff]  ;;  %v7262_v27 = vld [vmem:[%s9572_s14 + $0x130] sm:$0xff] }
 0x87f   :  { %5658 = vmatmul.msk.bf16.vlgmr.msrb.gmra.mxu0 %vm117_vm1, %v8149_v58  ;;  %5659 = vmatmul.msk.bf16.vlgmr.msrb.gmra.mxu2 %vm117_vm1, %v8149_v58 }
 0x880   :  { %5660 = vmatmul.msk.bf16.vlgmr.msrb.gmra.mxu1 %vm117_vm1, %v8149_v58  ;;  %5661 = vmatmul.msk.bf16.vlgmr.msra.gmra.mxu3 %vm117_vm1, %v8149_v58 }
 0x881   :  { %1377 = vmatpush.bf16.msrb.mxu0 %v5641_v34  ;;  %1391 = vmatpush.bf16.msrb.mxu2 %v5645_v35  ;;  %v7285_v34 = vld [vmem:[%s9572_s14 + $0x1e8] sm:$0xff]  ;;  %v7259_v35 = vld [vmem:[%s9572_s14 + $0x118] sm:$0xff] }
 0x882   :  { %1405 = vmatpush.bf16.msrb.mxu1 %v5649_v38  ;;  %1419 = vmatpush.bf16.msra.mxu3 %v5653_v39  ;;  %v7284_v38 = vld [vmem:[%s9572_s14 + $0x1e0] sm:$0xff]  ;;  %v7258_v39 = vld [vmem:[%s9572_s14 + $0x110] sm:$0xff] }
 0x885   :  { %1378 = vmatpush.bf16.msrb.mxu0 %v5577_v45  ;;  %1392 = vmatpush.bf16.msrb.mxu2 %v5581_v61  ;;  %v7282_v45 = vld [vmem:[%s9572_s14 + $0x1d0] sm:$0xff]  ;;  %v7256_v61 = vld [vmem:[%s9572_s14 + $0x100] sm:$0xff] }
 0x886   :  { %1406 = vmatpush.bf16.msrb.mxu1 %v5585_v48  ;;  %1420 = vmatpush.bf16.msra.mxu3 %v5589_v49  ;;  %v7272_v48 = vld [vmem:[%s9572_s14 + $0x180] sm:$0xff]  ;;  %v7265_v49 = vld [vmem:[%s9572_s14 + $0x148] sm:$0xff] }
 0x88f   :  { %5662 = vmatmul.msk.bf16.vlgmr.msra.gmra.mxu0 %vm117_vm1, %v8149_v58  ;;  %5663 = vmatmul.msk.bf16.vlgmr.msra.gmra.mxu2 %vm117_vm1, %v8149_v58 }
 0x890   :  { %5664 = vmatmul.msk.bf16.vlgmr.msra.gmra.mxu1 %vm117_vm1, %v8149_v58  ;;  %5665 = vmatmul.msk.bf16.vlgmr.msrb.gmra.mxu3 %vm117_vm1, %v8149_v58 }
 0x891   :  { %2503 = vmatpush.bf16.msra.mxu0 %v7231_v50  ;;  %2531 = vmatpush.bf16.msra.mxu1 %v7247_v23  ;;  %v7281_v50 = vld [vmem:[%s9572_s14 + $0x1c8] sm:$0xff]  ;;  %v7264_v23 = vld [vmem:[%s9572_s14 + $0x140] sm:$0xff] }
 0x892   :  { %2517 = vmatpush.bf16.msra.mxu2 %v7239_v51  ;;  %2545 = vmatpush.bf16.msrb.mxu3 %v7255_v52  ;;  %v7280_v51 = vld [vmem:[%s9572_s14 + $0x1c0] sm:$0xff] }
 0x893   :  { %v8450_v52 = vld [vmem:[%s9574_s13] sm:$0xff] }
 0x895   :  { %2504 = vmatpush.bf16.msra.mxu0 %v7230_v53  ;;  %2532 = vmatpush.bf16.msra.mxu1 %v7246_v54 }
 0x896   :  { %2518 = vmatpush.bf16.msra.mxu2 %v7238_v55  ;;  %2546 = vmatpush.bf16.msrb.mxu3 %v7254_v46  ;;  %v1008_v55 = vperm.slane %v8450_v52, 0  ;;  %v1010_v46 = vperm.slane %v8450_v52, 2 }
 0x899   :  { %2505 = vmatpush.bf16.msra.mxu0 %v7229_v56  ;;  %2533 = vmatpush.bf16.msra.mxu1 %v7245_v57 }
 0x89a   :  { %2519 = vmatpush.bf16.msra.mxu2 %v7237_v59  ;;  %2547 = vmatpush.bf16.msrb.mxu3 %v7253_v62 }
 0x89d   :  { %2506 = vmatpush.bf16.msra.mxu0 %v7228_v63  ;;  %2534 = vmatpush.bf16.msra.mxu1 %v7244_v42  ;;  %v1009_v42 = vperm.slane %v8450_v52, 1 }
 0x89e   :  { %2520 = vmatpush.bf16.msra.mxu2 %v7236_v0  ;;  %2548 = vmatpush.bf16.msrb.mxu3 %v7252_v2 }
 0x89f   :  { %5666 = vmatmul.msk.bf16.vlgmr.msrb.gmra.mxu0 %vm117_vm1, %v8149_v58  ;;  %5667 = vmatmul.msk.bf16.vlgmr.msrb.gmra.mxu2 %vm117_vm1, %v8149_v58 }
 0x8a0   :  { %5668 = vmatmul.msk.bf16.vlgmr.msrb.gmra.mxu1 %vm117_vm1, %v8149_v58  ;;  %5669 = vmatmul.msk.bf16.vlgmr.msra.gmra.mxu3 %vm117_vm1, %v8149_v58  ;;  %v7250_v58 = vld [vmem:[%s9572_s14 + $0xd0] sm:$0xff] }
 0x8a1   :  { %2507 = vmatpush.bf16.msra.mxu0 %v7227_v47  ;;  %2535 = vmatpush.bf16.msra.mxu1 %v7243_v7  ;;  %v1011_v47 = vperm.slane %v8450_v52, 3 }
 0x8a2   :  { %2521 = vmatpush.bf16.msra.mxu2 %v7235_v8  ;;  %2549 = vmatpush.bf16.msrb.mxu3 %v7251_v9 }
 0x8a5   :  { %2508 = vmatpush.bf16.msra.mxu0 %v7226_v10  ;;  %2536 = vmatpush.bf16.msra.mxu1 %v7242_v11 }
 0x8a6   :  { %2522 = vmatpush.bf16.msra.mxu2 %v7234_v12  ;;  %2550 = vmatpush.bf16.msrb.mxu3 %v7250_v58  ;;  %v7295_v12 = vld [vmem:[%s9572_s14 + $0x238] sm:$0xff] }
 0x8a9   :  { %2509 = vmatpush.bf16.msra.mxu0 %v7225_v13  ;;  %2537 = vmatpush.bf16.msra.mxu1 %v7241_v5  ;;  %v7311_v5 = vld [vmem:[%s9572_s14 + $0x2b8] sm:$0xff] }
 0x8aa   :  { %2523 = vmatpush.bf16.msra.mxu2 %v7233_v14  ;;  %2551 = vmatpush.bf16.msrb.mxu3 %v7249_v16 }
 0x8ad   :  { %2510 = vmatpush.bf16.msra.mxu0 %v7224_v22  ;;  %2538 = vmatpush.bf16.msra.mxu1 %v7240_v17 }
 0x8ae   :  { %2524 = vmatpush.bf16.msra.mxu2 %v7232_v20  ;;  %2552 = vmatpush.bf16.msrb.mxu3 %v7248_v24  ;;  %v7294_v24 = vld [vmem:[%s9572_s14 + $0x230] sm:$0xff] }
 0x8b1   :  { %2559 = vmatpush.bf16.msrb.mxu0 %v7263_v19  ;;  %2587 = vmatpush.bf16.msrb.mxu1 %v7279_v18 }
 0x8b2   :  { %2573 = vmatpush.bf16.msrb.mxu2 %v7271_v25  ;;  %2601 = vmatpush.bf16.msra.mxu3 %v7287_v26 }
 0x8b5   :  { %2560 = vmatpush.bf16.msrb.mxu0 %v7262_v27  ;;  %2588 = vmatpush.bf16.msrb.mxu1 %v7278_v28  ;;  %v7310_v28 = vld [vmem:[%s9572_s14 + $0x2b0] sm:$0xff] }
 0x8b6   :  { %2574 = vmatpush.bf16.msrb.mxu2 %v7270_v29  ;;  %2602 = vmatpush.bf16.msra.mxu3 %v7286_v4 }
 0x8b9   :  { %2561 = vmatpush.bf16.msrb.mxu0 %v7261_v30  ;;  %2589 = vmatpush.bf16.msrb.mxu1 %v7277_v31  ;;  %v7303_v30 = vld [vmem:[%s9572_s14 + $0x278] sm:$0xff] }
 0x8ba   :  { %2575 = vmatpush.bf16.msrb.mxu2 %v7269_v33  ;;  %2603 = vmatpush.bf16.msra.mxu3 %v7285_v34  ;;  %v1014_v34 = vperm.slane %v8450_v52, 6 }
 0x8bd   :  { %2562 = vmatpush.bf16.msrb.mxu0 %v7260_v32  ;;  %2590 = vmatpush.bf16.msrb.mxu1 %v7276_v15  ;;  %v1012_v32 = vperm.slane %v8450_v52, 4  ;;  %v7319_v15 = vld [vmem:[%s9572_s14 + $0x2f8] sm:$0xff] }
 0x8be   :  { %2576 = vmatpush.bf16.msrb.mxu2 %v7268_v37  ;;  %2604 = vmatpush.bf16.msra.mxu3 %v7284_v38  ;;  %v7302_v38 = vld [vmem:[%s9572_s14 + $0x270] sm:$0xff] }
 0x8c1   :  { %2563 = vmatpush.bf16.msrb.mxu0 %v7259_v35  ;;  %2591 = vmatpush.bf16.msrb.mxu1 %v7275_v36  ;;  %v7293_v35 = vld [vmem:[%s9572_s14 + $0x228] sm:$0xff] }
 0x8c2   :  { %2577 = vmatpush.bf16.msrb.mxu2 %v7267_v41  ;;  %2605 = vmatpush.bf16.msra.mxu3 %v7283_v1  ;;  %v7309_v36 = vld [vmem:[%s9572_s14 + $0x2a8] sm:$0xff]  ;;  %v7318_v41 = vld [vmem:[%s9572_s14 + $0x2f0] sm:$0xff] }
 0x8c5   :  { %2564 = vmatpush.bf16.msrb.mxu0 %v7258_v39  ;;  %2592 = vmatpush.bf16.msrb.mxu1 %v7274_v40 }
 0x8c6   :  { %2578 = vmatpush.bf16.msrb.mxu2 %v7266_v44  ;;  %2606 = vmatpush.bf16.msra.mxu3 %v7282_v45  ;;  %v1013_v44 = vperm.slane %v8450_v52, 5 }
 0x8c9   :  { %2565 = vmatpush.bf16.msrb.mxu0 %v7257_v43  ;;  %2593 = vmatpush.bf16.msrb.mxu1 %v7273_v60  ;;  %v7292_v60 = vld [vmem:[%s9572_s14 + $0x220] sm:$0xff] }
 0x8ca   :  { %2579 = vmatpush.bf16.msrb.mxu2 %v7265_v49  ;;  %2607 = vmatpush.bf16.msra.mxu3 %v7281_v50  ;;  %v1015_v49 = vperm.slane %v8450_v52, 7  ;;  %v7291_v52 = vld [vmem:[%s9572_s14 + $0x218] sm:$0xff] }
 0x8cd   :  { %2566 = vmatpush.bf16.msrb.mxu0 %v7256_v61  ;;  %2594 = vmatpush.bf16.msrb.mxu1 %v7272_v48  ;;  %v7308_v48 = vld [vmem:[%s9572_s14 + $0x2a0] sm:$0xff] }
 0x8ce   :  { %2580 = vmatpush.bf16.msrb.mxu2 %v7264_v23  ;;  %2608 = vmatpush.bf16.msra.mxu3 %v7280_v51  ;;  %v7301_v23 = vld [vmem:[%s9572_s14 + $0x268] sm:$0xff] }
 0x8ec   :  { %v1212_v53 = vpop.f32.mrf.mxu0 }
 0x8ed   :  { %v1240_v54 = vpop.f32.mrf.mxu1  ;;  %v1213_v57 = vadd.f32 %v1212_v53, %v1008_v55 }
 0x8ee   :  { %v1241_v62 = vadd.f32 %v1240_v54, %v1010_v46  ;;  %v7317_v54 = vld [vmem:[%s9572_s14 + $0x2e8] sm:$0xff] }
 0x8ef   :  { %v1427_v8 = vmax.f32 %v1213_v57, 0.0 }
 0x8f0   :  { %v1429_v10 = vmax.f32 %v1241_v62, 0.0 }
 0x8f2   :  { %v1226_v56 = vpop.f32.mrf.mxu2 }
 0x8f3   :  { %v1254_v59 = vpop.f32.mrf.mxu3  ;;  %v1227_v58 = vadd.f32 %v1226_v56, %v1009_v42 }
 0x8f4   :  { %v1214_v63 = vpop.f32.mrf.mxu0  ;;  %v1255_v14 = vadd.f32 %v1254_v59, %v1011_v47  ;;  %v7307_v59 = vld [vmem:[%s9572_s14 + $0x298] sm:$0xff] }
 0x8f5   :  { %v1215_v0 = vadd.f32 %v1214_v63, %v1008_v55  ;;  %v1242_v2 = vpop.f32.mrf.mxu1  ;;  %v1428_v25 = vmax.f32 %v1227_v58, 0.0 }
 0x8f6   :  { %v1243_v7 = vadd.f32 %v1242_v2, %v1010_v46  ;;  %v1430_v29 = vmax.f32 %v1255_v14, 0.0 }
 0x8f7   :  { %v1443_v9 = vmax.f32 %v1215_v0, 0.0  ;;  %v7300_v0 = vld [vmem:[%s9572_s14 + $0x260] sm:$0xff] }
 0x8f8   :  { %v1445_v11 = vmax.f32 %v1243_v7, 0.0  ;;  %v7316_v7 = vld [vmem:[%s9572_s14 + $0x2e0] sm:$0xff] }
 0x8f9   :  { %v1716_v13 = vpack.c.bf16 %v1443_v9, %v1427_v8  ;;  %v8517_v9 = vld [vmem:[%s9574_s13 + $0x8] sm:$0xff] }
 0x8fa   :  { %v1718_v16 = vpack.c.bf16 %v1445_v11, %v1429_v10  ;;  %v1228_v22 = vpop.f32.mrf.mxu2  ;;  %v7290_v11 = vld [vmem:[%s9572_s14 + $0x210] sm:$0xff] }
 0x8fb   :  { %v1229_v17 = vadd.f32 %v1228_v22, %v1009_v42  ;;  %v1256_v19 = vpop.f32.mrf.mxu3  ;;  %2511 = vmatmul.bf16.vlgmr.msra.gmra.mxu0 %v1716_v13  ;;  %v7299_v22 = vld [vmem:[%s9572_s14 + $0x258] sm:$0xff] }
 0x8fc   :  { %v1257_v18 = vadd.f32 %v1256_v19, %v1011_v47  ;;  %2539 = vmatmul.bf16.vlgmr.msra.gmra.mxu1 %v1718_v16  ;;  %2615 = vmatpush.bf16.msra.mxu0 %v7295_v12  ;;  %v1268_v20 = vpop.f32.mrf.mxu0  ;;  %v1016_v19 = vperm.slane %v8517_v9, 0 }
 0x8fd   :  { %v1444_v26 = vmax.f32 %v1229_v17, 0.0  ;;  %2643 = vmatpush.bf16.msra.mxu1 %v7311_v5  ;;  %v1296_v27 = vpop.f32.mrf.mxu1  ;;  %v1269_v39 = vadd.f32 %v1268_v20, %v1012_v32  ;;  %v7306_v5 = vld [vmem:[%s9572_s14 + $0x290] sm:$0xff] }
 0x8fe   :  { %v1446_v4 = vmax.f32 %v1257_v18, 0.0  ;;  %v1297_v1 = vadd.f32 %v1296_v27, %v1014_v34  ;;  %v7315_v18 = vld [vmem:[%s9572_s14 + $0x2d8] sm:$0xff] }
 0x8ff   :  { %v1717_v31 = vpack.c.bf16 %v1444_v26, %v1428_v25  ;;  %v1431_v51 = vmax.f32 %v1269_v39, 0.0  ;;  %v7289_v25 = vld [vmem:[%s9572_s14 + $0x208] sm:$0xff] }
 0x900   :  { %v1719_v33 = vpack.c.bf16 %v1446_v4, %v1430_v29  ;;  %2616 = vmatpush.bf16.msra.mxu0 %v7294_v24  ;;  %v1433_v55 = vmax.f32 %v1297_v1, 0.0  ;;  %v1018_v24 = vperm.slane %v8517_v9, 2  ;;  %v7305_v26 = vld [vmem:[%s9572_s14 + $0x288] sm:$0xff] }
 0x901   :  { %2644 = vmatpush.bf16.msra.mxu1 %v7310_v28  ;;  %2525 = vmatmul.bf16.vlgmr.msra.gmra.mxu2 %v1717_v31  ;;  %v7298_v28 = vld [vmem:[%s9572_s14 + $0x250] sm:$0xff] }
 0x902   :  { %2553 = vmatmul.bf16.vlgmr.msrb.gmra.mxu3 %v1719_v33  ;;  %2629 = vmatpush.bf16.msra.mxu2 %v7303_v30  ;;  %v1282_v37 = vpop.f32.mrf.mxu2  ;;  %v7314_v30 = vld [vmem:[%s9572_s14 + $0x2d0] sm:$0xff]  ;;  %v1017_v33 = vperm.slane %v8517_v9, 1 }
 0x903   :  { %2657 = vmatpush.bf16.msrb.mxu3 %v7319_v15  ;;  %v1310_v40 = vpop.f32.mrf.mxu3  ;;  %v1283_v56 = vadd.f32 %v1282_v37, %v1013_v44  ;;  %v7288_v15 = vld [vmem:[%s9572_s14 + $0x200] sm:$0xff]  ;;  %v7327_v37 = vld [vmem:[%s9572_s14 + $0x338] sm:$0xff] }
 0x904   :  { %2617 = vmatpush.bf16.msra.mxu0 %v7293_v35  ;;  %v1270_v43 = vpop.f32.mrf.mxu0  ;;  %v1311_v62 = vadd.f32 %v1310_v40, %v1015_v49  ;;  %v7343_v40 = vld [vmem:[%s9572_s14 + $0x3b8] sm:$0xff] }
 0x905   :  { %2645 = vmatpush.bf16.msra.mxu1 %v7309_v36  ;;  %v1271_v45 = vadd.f32 %v1270_v43, %v1012_v32  ;;  %v1298_v61 = vpop.f32.mrf.mxu1  ;;  %v1432_v12 = vmax.f32 %v1283_v56, 0.0  ;;  %v7304_v36 = vld [vmem:[%s9572_s14 + $0x280] sm:$0xff]  ;;  %v7335_v56 = vld [vmem:[%s9572_s14 + $0x378] sm:$0xff] }
 0x906   :  { %v1299_v50 = vadd.f32 %v1298_v61, %v1014_v34  ;;  %2630 = vmatpush.bf16.msra.mxu2 %v7302_v38  ;;  %v1434_v14 = vmax.f32 %v1311_v62, 0.0  ;;  %v1019_v38 = vperm.slane %v8517_v9, 3 }
 0x907   :  { %v1447_v53 = vmax.f32 %v1271_v45, 0.0  ;;  %2658 = vmatpush.bf16.msrb.mxu3 %v7318_v41  ;;  %v7297_v41 = vld [vmem:[%s9572_s14 + $0x248] sm:$0xff] }
 0x908   :  { %v1449_v46 = vmax.f32 %v1299_v50, 0.0  ;;  %2618 = vmatpush.bf16.msra.mxu0 %v7292_v60  ;;  %v7313_v60 = vld [vmem:[%s9572_s14 + $0x2c8] sm:$0xff] }
 0x909   :  { %v1720_v57 = vpack.c.bf16 %v1447_v53, %v1431_v51  ;;  %2646 = vmatpush.bf16.msra.mxu1 %v7308_v48  ;;  %v7342_v53 = vld [vmem:[%s9572_s14 + $0x3b0] sm:$0xff] }
 0x90a   :  { %v1722_v63 = vpack.c.bf16 %v1449_v46, %v1433_v55  ;;  %2631 = vmatpush.bf16.msra.mxu2 %v7301_v23  ;;  %v1284_v42 = vpop.f32.mrf.mxu2 }
 0x90b   :  { %2659 = vmatpush.bf16.msrb.mxu3 %v7317_v54  ;;  %v1285_v2 = vadd.f32 %v1284_v42, %v1013_v44  ;;  %v1312_v47 = vpop.f32.mrf.mxu3  ;;  %2567 = vmatmul.bf16.vlgmr.msrb.gmra.mxu0 %v1720_v57  ;;  %v7296_v54 = vld [vmem:[%s9572_s14 + $0x240] sm:$0xff]  ;;  %v7325_v42 = vld [vmem:[%s9572_s14 + $0x328] sm:$0xff] }
 0x90c   :  { %v1313_v8 = vadd.f32 %v1312_v47, %v1015_v49  ;;  %2595 = vmatmul.bf16.vlgmr.msrb.gmra.mxu1 %v1722_v63  ;;  %2619 = vmatpush.bf16.msra.mxu0 %v7291_v52  ;;  %v1324_v10 = vpop.f32.mrf.mxu0  ;;  %v7326_v49 = vld [vmem:[%s9572_s14 + $0x330] sm:$0xff]  ;;  %v7312_v52 = vld [vmem:[%s9572_s14 + $0x2c0] sm:$0xff]  ;;  %v7341_v47 = vld [vmem:[%s9572_s14 + $0x3a8] sm:$0xff] }
 0x90d   :  { %v1448_v58 = vmax.f32 %v1285_v2, 0.0  ;;  %2647 = vmatpush.bf16.msra.mxu1 %v7307_v59  ;;  %v1352_v13 = vpop.f32.mrf.mxu1  ;;  %v1325_v29 = vadd.f32 %v1324_v10, %v1016_v19  ;;  %v7351_v59 = vld [vmem:[%s9572_s14 + $0x3f8] sm:$0xff] }
 0x90e   :  { %v1450_v16 = vmax.f32 %v1313_v8, 0.0  ;;  %2632 = vmatpush.bf16.msra.mxu2 %v7300_v0  ;;  %v1353_v31 = vadd.f32 %v1352_v13, %v1018_v24  ;;  %v7334_v8 = vld [vmem:[%s9572_s14 + $0x370] sm:$0xff] }
 0x90f   :  { %v1721_v17 = vpack.c.bf16 %v1448_v58, %v1432_v12  ;;  %2660 = vmatpush.bf16.msrb.mxu3 %v7316_v7  ;;  %v1435_v1 = vmax.f32 %v1325_v29, 0.0  ;;  %v7324_v58 = vld [vmem:[%s9572_s14 + $0x320] sm:$0xff]  ;;  %v1020_v29 = vperm.slane %v8517_v9, 4 }
 0x910   :  { %v1723_v20 = vpack.c.bf16 %v1450_v16, %v1434_v14  ;;  %2620 = vmatpush.bf16.msra.mxu0 %v7290_v11  ;;  %v1437_v44 = vmax.f32 %v1353_v31, 0.0  ;;  %v7350_v11 = vld [vmem:[%s9572_s14 + $0x3f0] sm:$0xff]  ;;  %v7333_v14 = vld [vmem:[%s9572_s14 + $0x368] sm:$0xff]  ;;  %v1022_v31 = vperm.slane %v8517_v9, 6 }
 0x911   :  { %2648 = vmatpush.bf16.msra.mxu1 %v7306_v5  ;;  %2581 = vmatmul.bf16.vlgmr.msrb.gmra.mxu2 %v1721_v17  ;;  %v7340_v5 = vld [vmem:[%s9572_s14 + $0x3a0] sm:$0xff]  ;;  %v7349_v16 = vld [vmem:[%s9572_s14 + $0x3e8] sm:$0xff]  ;;  %v7339_v17 = vld [vmem:[%s9572_s14 + $0x398] sm:$0xff] }
 0x912   :  { %2609 = vmatmul.bf16.vlgmr.msra.gmra.mxu3 %v1723_v20  ;;  %2633 = vmatpush.bf16.msra.mxu2 %v7299_v22  ;;  %v1338_v27 = vpop.f32.mrf.mxu2  ;;  %v7323_v22 = vld [vmem:[%s9572_s14 + $0x318] sm:$0xff] }
 0x913   :  { %2661 = vmatpush.bf16.msrb.mxu3 %v7315_v18  ;;  %v1366_v4 = vpop.f32.mrf.mxu3  ;;  %v1339_v61 = vadd.f32 %v1338_v27, %v1017_v33  ;;  %v7332_v18 = vld [vmem:[%s9572_s14 + $0x360] sm:$0xff] }
 0x914   :  { %2621 = vmatpush.bf16.msra.mxu0 %v7289_v25  ;;  %v1326_v32 = vpop.f32.mrf.mxu0  ;;  %v1367_v50 = vadd.f32 %v1366_v4, %v1019_v38  ;;  %v7322_v25 = vld [vmem:[%s9572_s14 + $0x310] sm:$0xff] }
 0x915   :  { %2649 = vmatpush.bf16.msra.mxu1 %v7305_v26  ;;  %v1327_v34 = vadd.f32 %v1326_v32, %v1016_v19  ;;  %v1354_v35 = vpop.f32.mrf.mxu1  ;;  %v1436_v62 = vmax.f32 %v1339_v61, 0.0  ;;  %v7338_v26 = vld [vmem:[%s9572_s14 + $0x390] sm:$0xff]  ;;  %v7321_v32 = vld [vmem:[%s9572_s14 + $0x308] sm:$0xff] }
 0x916   :  { %v1355_v39 = vadd.f32 %v1354_v35, %v1018_v24  ;;  %2634 = vmatpush.bf16.msra.mxu2 %v7298_v28  ;;  %v1438_v0 = vmax.f32 %v1367_v50, 0.0  ;;  %v7348_v24 = vld [vmem:[%s9572_s14 + $0x3e0] sm:$0xff]  ;;  %v7331_v28 = vld [vmem:[%s9572_s14 + $0x358] sm:$0xff]  ;;  %v7330_v35 = vld [vmem:[%s9572_s14 + $0x350] sm:$0xff] }
 0x917   :  { %v1451_v43 = vmax.f32 %v1327_v34, 0.0  ;;  %2662 = vmatpush.bf16.msrb.mxu3 %v7314_v30  ;;  %v7347_v30 = vld [vmem:[%s9572_s14 + $0x3d8] sm:$0xff]  ;;  %v7329_v61 = vld [vmem:[%s9572_s14 + $0x348] sm:$0xff] }
 0x918   :  { %v1453_v45 = vmax.f32 %v1355_v39, 0.0  ;;  %2622 = vmatpush.bf16.msra.mxu0 %v7288_v15  ;;  %v7345_v50 = vld [vmem:[%s9572_s14 + $0x3c8] sm:$0xff] }
 0x919   :  { %v1724_v48 = vpack.c.bf16 %v1451_v43, %v1435_v1  ;;  %2650 = vmatpush.bf16.msra.mxu1 %v7304_v36 }
 0x91a   :  { %v1726_v23 = vpack.c.bf16 %v1453_v45, %v1437_v44  ;;  %2635 = vmatpush.bf16.msra.mxu2 %v7297_v41  ;;  %v1340_v51 = vpop.f32.mrf.mxu2  ;;  %v1021_v41 = vperm.slane %v8517_v9, 5  ;;  %v1023_v44 = vperm.slane %v8517_v9, 7 }
 0x91b   :  { %2663 = vmatpush.bf16.msrb.mxu3 %v7313_v60  ;;  %v1341_v55 = vadd.f32 %v1340_v51, %v1017_v33  ;;  %v1368_v46 = vpop.f32.mrf.mxu3  ;;  %2623 = vmatmul.bf16.vlgmr.msra.gmra.mxu0 %v1724_v48  ;;  %v7337_v33 = vld [vmem:[%s9572_s14 + $0x388] sm:$0xff]  ;;  %v7336_v60 = vld [vmem:[%s9572_s14 + $0x380] sm:$0xff] }
 0x91c   :  { %2671 = vmatpush.bf16.msrb.mxu0 %v7327_v37  ;;  %v1369_v57 = vadd.f32 %v1368_v46, %v1019_v38  ;;  %2651 = vmatmul.bf16.vlgmr.msra.gmra.mxu1 %v1726_v23  ;;  %v1380_v12 = vpop.f32.mrf.mxu0  ;;  %v7346_v37 = vld [vmem:[%s9572_s14 + $0x3d0] sm:$0xff]  ;;  %v7328_v46 = vld [vmem:[%s9572_s14 + $0x340] sm:$0xff] }
 0x91d   :  { %2699 = vmatpush.bf16.msrb.mxu1 %v7343_v40  ;;  %v1452_v63 = vmax.f32 %v1341_v55, 0.0  ;;  %v1408_v13 = vpop.f32.mrf.mxu1  ;;  %v1381_v36 = vadd.f32 %v1380_v12, %v1020_v29  ;;  %v7320_v40 = vld [vmem:[%s9572_s14 + $0x300] sm:$0xff] }
 0x91e   :  { %v1454_v2 = vmax.f32 %v1369_v57, 0.0  ;;  %2636 = vmatpush.bf16.msra.mxu2 %v7296_v54  ;;  %v1409_v38 = vadd.f32 %v1408_v13, %v1022_v31 }
 0x91f   :  { %v1725_v7 = vpack.c.bf16 %v1452_v63, %v1436_v62  ;;  %2664 = vmatpush.bf16.msrb.mxu3 %v7312_v52  ;;  %v1439_v48 = vmax.f32 %v1381_v36, 0.0 }
 0x920   :  { %2672 = vmatpush.bf16.msrb.mxu0 %v7326_v49  ;;  %v1727_v10 = vpack.c.bf16 %v1454_v2, %v1438_v0  ;;  %v1441_v23 = vmax.f32 %v1409_v38, 0.0 }
 0x921   :  { %2700 = vmatpush.bf16.msrb.mxu1 %v7342_v53  ;;  %2637 = vmatmul.bf16.vlgmr.msra.gmra.mxu2 %v1725_v7 }
 0x922   :  { %2685 = vmatpush.bf16.msrb.mxu2 %v7335_v56  ;;  %2665 = vmatmul.bf16.vlgmr.msrb.gmra.mxu3 %v1727_v10  ;;  %v1394_v19 = vpop.f32.mrf.mxu2  ;;  %v7344_v56 = vld [vmem:[%s9572_s14 + $0x3c0] sm:$0xff] }
 0x923   :  { %2713 = vmatpush.bf16.msra.mxu3 %v7351_v59  ;;  %v1422_v20 = vpop.f32.mrf.mxu3  ;;  %v1395_v53 = vadd.f32 %v1394_v19, %v1021_v41 }
 0x924   :  { %2673 = vmatpush.bf16.msrb.mxu0 %v7325_v42  ;;  %v1382_v27 = vpop.f32.mrf.mxu0  ;;  %v1423_v9 = vadd.f32 %v1422_v20, %v1023_v44 }
 0x925   :  { %2701 = vmatpush.bf16.msrb.mxu1 %v7341_v47  ;;  %v1410_v4 = vpop.f32.mrf.mxu1  ;;  %v1383_v15 = vadd.f32 %v1382_v27, %v1020_v29  ;;  %v1440_v59 = vmax.f32 %v1395_v53, 0.0 }
 0x926   :  { %2686 = vmatpush.bf16.msrb.mxu2 %v7334_v8  ;;  %v1411_v34 = vadd.f32 %v1410_v4, %v1022_v31  ;;  %v1442_v62 = vmax.f32 %v1423_v9, 0.0 }
 0x927   :  { %2714 = vmatpush.bf16.msra.mxu3 %v7350_v11  ;;  %v1455_v1 = vmax.f32 %v1383_v15, 0.0 }
 0x928   :  { %2674 = vmatpush.bf16.msrb.mxu0 %v7324_v58  ;;  %v1457_v45 = vmax.f32 %v1411_v34, 0.0  ;;  %v7571_v58 = vld [vmem:[%s9573_s15] ss:$0 sm:$0xff] }
 0x929   :  { %2702 = vmatpush.bf16.msrb.mxu1 %v7340_v5  ;;  %v1728_v54 = vpack.c.bf16 %v1455_v1, %v1439_v48 }
 0x92a   :  { %2687 = vmatpush.bf16.msrb.mxu2 %v7333_v14  ;;  %v1396_v39 = vpop.f32.mrf.mxu2  ;;  %v1730_v55 = vpack.c.bf16 %v1457_v45, %v1441_v23 }
 0x92b   :  { %2715 = vmatpush.bf16.msra.mxu3 %v7349_v16  ;;  %v1424_v43 = vpop.f32.mrf.mxu3  ;;  %v1397_v49 = vadd.f32 %v1396_v39, %v1021_v41 }
 0x92c   :  { %2675 = vmatpush.bf16.msrb.mxu0 %v7323_v22  ;;  %v1425_v51 = vadd.f32 %v1424_v43, %v1023_v44 }
 0x92d   :  { %2703 = vmatpush.bf16.msrb.mxu1 %v7339_v17  ;;  %v1456_v52 = vmax.f32 %v1397_v49, 0.0 }
 0x92e   :  { %2688 = vmatpush.bf16.msrb.mxu2 %v7332_v18  ;;  %v1458_v57 = vmax.f32 %v1425_v51, 0.0 }
 0x92f   :  { %2716 = vmatpush.bf16.msra.mxu3 %v7348_v24  ;;  %v1729_v63 = vpack.c.bf16 %v1456_v52, %v1440_v59 }
 0x930   :  { %2676 = vmatpush.bf16.msrb.mxu0 %v7322_v25  ;;  %v1731_v42 = vpack.c.bf16 %v1458_v57, %v1442_v62 }
 0x931   :  { %2704 = vmatpush.bf16.msrb.mxu1 %v7338_v26 }
 0x932   :  { %2689 = vmatpush.bf16.msrb.mxu2 %v7331_v28 }
 0x933   :  { %2717 = vmatpush.bf16.msra.mxu3 %v7347_v30 }
 0x934   :  { %2677 = vmatpush.bf16.msrb.mxu0 %v7321_v32 }
 0x935   :  { %2705 = vmatpush.bf16.msrb.mxu1 %v7337_v33 }
 0x936   :  { %2690 = vmatpush.bf16.msrb.mxu2 %v7330_v35 }
 0x937   :  { %2718 = vmatpush.bf16.msra.mxu3 %v7346_v37 }
 0x938   :  { %2678 = vmatpush.bf16.msrb.mxu0 %v7320_v40 }
 0x939   :  { %2706 = vmatpush.bf16.msrb.mxu1 %v7336_v60 }
 0x93a   :  { %2691 = vmatpush.bf16.msrb.mxu2 %v7329_v61 }
 0x93b   :  { %2719 = vmatpush.bf16.msra.mxu3 %v7345_v50  ;;  %2679 = vmatmul.bf16.vlgmr.msrb.gmra.mxu0 %v1728_v54 }
 0x93c   :  { %2707 = vmatmul.bf16.vlgmr.msrb.gmra.mxu1 %v1730_v55 }
 0x93e   :  { %2692 = vmatpush.bf16.msrb.mxu2 %v7328_v46 }
 0x93f   :  { %2720 = vmatpush.bf16.msra.mxu3 %v7344_v56 }
 0x941   :  { %2693 = vmatmul.bf16.vlgmr.msrb.gmra.mxu2 %v1729_v63 }
 0x942   :  { %2721 = vmatmul.bf16.vlgmr.msra.gmra.mxu3 %v1731_v42 }
 0x978   :  { %v2512_v0 = vpop.f32.mrf.mxu0 }
 0x979   :  { %v2540_v2 = vpop.f32.mrf.mxu1  ;;  %v2513_v5 = vadd.f32 %v7571_v58, %v2512_v0 }
 0x980   :  { %v2514_v8 = vpop.f32.mrf.mxu0 }
 0x981   :  { %v2542_v10 = vpop.f32.mrf.mxu1  ;;  %v2515_v20 = vadd.f32 %v7571_v58, %v2514_v8 }
 0x984   :  { %v2526_v47 = vpop.f32.mrf.mxu2 }
 0x985   :  { %v2554_v7 = vpop.f32.mrf.mxu3  ;;  %v2527_v14 = vadd.f32 %v2526_v47, %v2513_v5 }
 0x987   :  { %v2541_v19 = vadd.f32 %v2540_v2, %v2527_v14 }
 0x988   :  { %v2568_v13 = vpop.f32.mrf.mxu0 }
 0x989   :  { %v2596_v16 = vpop.f32.mrf.mxu1  ;;  %v2555_v24 = vadd.f32 %v2554_v7, %v2541_v19 }
 0x98b   :  { %v2569_v28 = vadd.f32 %v2568_v13, %v2555_v24 }
 0x98c   :  { %v2528_v11 = vpop.f32.mrf.mxu2 }
 0x98d   :  { %v2556_v12 = vpop.f32.mrf.mxu3  ;;  %v2529_v25 = vadd.f32 %v2528_v11, %v2515_v20 }
 0x98f   :  { %v2543_v29 = vadd.f32 %v2542_v10, %v2529_v25 }
 0x990   :  { %v2570_v18 = vpop.f32.mrf.mxu0 }
 0x991   :  { %v2598_v26 = vpop.f32.mrf.mxu1  ;;  %v2557_v32 = vadd.f32 %v2556_v12, %v2543_v29 }
 0x993   :  { %v2571_v33 = vadd.f32 %v2570_v18, %v2557_v32 }
 0x994   :  { %v2582_v22 = vpop.f32.mrf.mxu2 }
 0x995   :  { %v2610_v17 = vpop.f32.mrf.mxu3  ;;  %v2583_v30 = vadd.f32 %v2582_v22, %v2569_v28 }
 0x997   :  { %v2597_v15 = vadd.f32 %v2596_v16, %v2583_v30 }
 0x998   :  { %v2624_v31 = vpop.f32.mrf.mxu0 }
 0x999   :  { %v2652_v34 = vpop.f32.mrf.mxu1  ;;  %v2611_v36 = vadd.f32 %v2610_v17, %v2597_v15 }
 0x99b   :  { %v2625_v40 = vadd.f32 %v2624_v31, %v2611_v36 }
 0x99c   :  { %v2584_v27 = vpop.f32.mrf.mxu2 }
 0x99d   :  { %v2612_v4 = vpop.f32.mrf.mxu3  ;;  %v2585_v37 = vadd.f32 %v2584_v27, %v2571_v33 }
 0x99f   :  { %v2599_v41 = vadd.f32 %v2598_v26, %v2585_v37  ;;  %v7352_v26 = vld [vmem:[%s9566_s6 + $0x10] sm:$0xff] }
 0x9a0   :  { %v2626_v39 = vpop.f32.mrf.mxu0 }
 0x9a1   :  { %v2613_v43 = vadd.f32 %v2612_v4, %v2599_v41  ;;  %v2654_v60 = vpop.f32.mrf.mxu1 }
 0x9a3   :  { %v2627_v49 = vadd.f32 %v2626_v39, %v2613_v43 }
 0x9a4   :  { %v2638_v35 = vpop.f32.mrf.mxu2 }
 0x9a5   :  { %v2666_v38 = vpop.f32.mrf.mxu3  ;;  %v2639_v1 = vadd.f32 %v2638_v35, %v2625_v40  ;;  %v7572_v40 = vld [vmem:[%s9575_s16] ss:$0 sm:$0xff] }
 0x9a7   :  { %v2653_v45 = vadd.f32 %v2652_v34, %v2639_v1 }
 0x9a9   :  { %v2667_v50 = vadd.f32 %v2666_v38, %v2653_v45 }
 0x9ac   :  { %v2640_v44 = vpop.f32.mrf.mxu2 }
 0x9ad   :  { %v2668_v61 = vpop.f32.mrf.mxu3  ;;  %v2641_v23 = vadd.f32 %v2640_v44, %v2627_v49 }
 0x9af   :  { %v2655_v9 = vadd.f32 %v2654_v60, %v2641_v23  ;;  %v7573_v60 = vld [vmem:[%s9620_s30] ss:$0 sm:$0xff]  ;;  %v7574_v23 = vld [vmem:[%s9619_s25 + $0x1] ss:$0 sm:$0xff]  ;;  %s9624_s25 = smov 104  }
 0x9b1   :  { %v2669_v57 = vadd.f32 %v2668_v61, %v2655_v9 }
 0x9b8   :  { %v2680_v48 = vpop.f32.mrf.mxu0 }
 0x9b9   :  { %v2681_v51 = vadd.f32 %v2680_v48, %v2667_v50  ;;  %v2708_v53 = vpop.f32.mrf.mxu1 }
 0x9c0   :  { %v2682_v56 = vpop.f32.mrf.mxu0 }
 0x9c1   :  { %v2683_v62 = vadd.f32 %v2682_v56, %v2669_v57  ;;  %v2710_v47 = vpop.f32.mrf.mxu1 }
 0x9c4   :  { %v2694_v54 = vpop.f32.mrf.mxu2 }
 0x9c5   :  { %v2695_v55 = vadd.f32 %v2694_v54, %v2681_v51  ;;  %v2722_v46 = vpop.f32.mrf.mxu3 }
 0x9c7   :  { %v2709_v52 = vadd.f32 %v2708_v53, %v2695_v55 }
 0x9c9   :  { %v2723_v59 = vadd.f32 %v2722_v46, %v2709_v52 }
 0x9cb   :  { %v2727_v63 = vadd.f32 %v2723_v59, %v8134_v3 }
 0x9cc   :  { %v2696_v42 = vpop.f32.mrf.mxu2 }
 0x9cd   :  { %v2697_v0 = vadd.f32 %v2696_v42, %v2683_v62  ;;  %v2731_v2 = vsel %vm117_vm1, %v2727_v63, 0.0  ;;  %v2724_v8 = vpop.f32.mrf.mxu3 }
 0x9ce   :  { %2732 = vadd.xlane.f32.xlu0 %v2731_v2 }
 0x9cf   :  { %v2711_v7 = vadd.f32 %v2710_v47, %v2697_v0 }
 0x9d1   :  { %v2725_v10 = vadd.f32 %v2724_v8, %v2711_v7 }
 0x9d3   :  { %v2728_v11 = vadd.f32 %v2725_v10, %v8136_v6  ;;  %v7353_v6 = vld [vmem:[%s9566_s6 + $0x18] sm:$0xff]  ;;  %s9631_s6 = smov 24  }
 0x9d4   :  { %2817 = vmatpush.bf16.msra.mxu0 %v7353_v6 }
 0x9d5   :  { %v2734_v12 = vsel %vm117_vm1, %v2728_v11, 0.0 }
 0x9d6   :  { %2735 = vadd.xlane.f32.xlu1 %v2734_v12 }
 0x9d8   :  { %2818 = vmatpush.bf16.msra.mxu0 %v7352_v26 }
 0xa41   :  { %v2733_v58 = vpop.xlane.xlu0 %2732 }
 0xa42   :  { %v2737_v13 = vmul.f32 %v2733_v58, %v7826_v21 }
 0xa44   :  { %v2739_v5 = vsub.f32 %v2727_v63, %v2737_v13 }
 0xa46   :  { %v2741_v14 = vmul.f32 %v2739_v5, %v2739_v5 }
 0xa48   :  { %v2743_v3 = vsel %vm117_vm1, %v2741_v14, 0.0 }
 0xa49   :  { %v2736_v16 = vpop.xlane.xlu1 %2735  ;;  %2744 = vadd.xlane.f32.xlu2 %v2743_v3 }
 0xa4a   :  { %v2738_v22 = vmul.f32 %v2736_v16, %v7826_v21 }
 0xa4c   :  { %v2740_v17 = vsub.f32 %v2728_v11, %v2738_v22 }
 0xa4e   :  { %v2742_v19 = vmul.f32 %v2740_v17, %v2740_v17 }
 0xa50   :  { %v2746_v18 = vsel %vm117_vm1, %v2742_v19, 0.0 }
 0xa51   :  { %2747 = vadd.xlane.f32.xlu0 %v2746_v18 }
 0xabc   :  { %v2745_v20 = vpop.xlane.xlu2 %2744 }
 0xabd   :  { %v2749_v24 = vmul.f32 %v2745_v20, %v7826_v21 }
 0xabf   :  { %v2751_v25 = vadd.f32 1e-05, %v2749_v24 }
 0xac1   :  { %7626 = vrsqrt.f32 %v2751_v25  ;;  %vm2759_vm11 = vweird.f32 %v2751_v25 }
 0xac4   :  { %v2748_v27 = vpop.xlane.xlu0 %2747 }
 0xac5   :  { %v2750_v28 = vmul.f32 %v2748_v27, %v7826_v21 }
 0xac7   :  { %v7627_v29 = vpop.eup %7626  ;;  %v2752_v4 = vadd.f32 1e-05, %v2750_v28 }
 0xac8   :  { %v2754_v30 = vmul.f32 %v7627_v29, %v2751_v25  ;;  %vm2760_vm10 = vweird.f32 %v7627_v29 }
 0xac9   :  { %7628 = vrsqrt.f32 %v2752_v4  ;;  %vm2761_vm12 = vmor %vm2759_vm11, %vm2760_vm10  ;;  %vm2769_vm14 = vweird.f32 %v2752_v4 }
 0xaca   :  { %v2755_v31 = vmul.f32 %v7627_v29, %v2754_v30 }
 0xacc   :  { %v2756_v32 = vmul.f32 0.5, %v2755_v31 }
 0xace   :  { %v2757_v15 = vsub.f32 1.5, %v2756_v32 }
 0xacf   :  { %v7629_v33 = vpop.eup %7628 }
 0xad0   :  { %v2758_v34 = vmul.f32 %v7627_v29, %v2757_v15  ;;  %v2764_v35 = vmul.f32 %v7629_v33, %v2752_v4  ;;  %vm2770_vm13 = vweird.f32 %v7629_v33 }
 0xad1   :  { %vm2771_vm15 = vmor %vm2769_vm14, %vm2770_vm13 }
 0xad2   :  { %v2765_v36 = vmul.f32 %v7629_v33, %v2764_v35  ;;  %v2762_v37 = vsel %vm2761_vm12, %v7627_v29, %v2758_v34 }
 0xad3   :  { %v2773_v41 = vmul.f32 %v2762_v37, %v2739_v5 }
 0xad4   :  { %v2766_v38 = vmul.f32 0.5, %v2765_v36 }
 0xad5   :  { %v2778_v44 = vmul.f32 %v7572_v40, %v2773_v41 }
 0xad6   :  { %v2767_v39 = vsub.f32 1.5, %v2766_v38 }
 0xad7   :  { %v8690_v48 = vadd.f32 %v7573_v60, %v2778_v44 }
 0xad8   :  { %v2768_v1 = vmul.f32 %v7629_v33, %v2767_v39 }
 0xada   :  { %v2772_v43 = vsel %vm2771_vm15, %v7629_v33, %v2768_v1 }
 0xadb   :  { %v2774_v45 = vmul.f32 %v2772_v43, %v2740_v17 }
 0xadd   :  { %v2779_v61 = vmul.f32 %v7572_v40, %v2774_v45 }
 0xadf   :  { %v8692_v49 = vadd.f32 %v7573_v60, %v2779_v61 }
 0xae1   :  { %v2792_v50 = vpack.c.bf16 %v8692_v49, %v8690_v48 }
 0xae3   :  { %6195 = vmatmul.msk.bf16.vlgmr.msra.gmra.mxu0 %vm117_vm1, %v2792_v50 }
 0xb60   :  { %v2820_v51 = vpop.f32.mrf.mxu0 }
 0xb61   :  { %v8700_v53 = vadd.f32 %v7574_v23, %v2820_v51 }
 0xb63   :  { %3063 = vrot.lane.b32.xlu0 %v8700_v53, %s7680_s28  ;;  %2907 = vrot.lane.b32.xlu2 %v8700_v53, %s7677_s3  ;;  %v2825_v54 = vmul.f32 0.35355338, %v8700_v53 }
 0xb64   :  { %2828 = vrot.lane.b32.xlu1 %v8700_v53, %s7675_s26 }
 0xb68   :  { %v2822_v9 = vpop.f32.mrf.mxu0 }
 0xb69   :  { %v8713_v55 = vadd.f32 %v7574_v23, %v2822_v9 }
 0xb6b   :  { %2983 = vrot.lane.b32.xlu2 %v2825_v54, %s9621_s27  ;;  %2905 = vrot.lane.b32.xlu0 %v2825_v54, %s9622_s17  ;;  %v2826_v46 = vmul.f32 0.35355338, %v8713_v55 }
 0xb6c   :  { %2985 = vrot.lane.b32.xlu1 %v8700_v53, %s9623_s1 }
 0xb73   :  { %3234 = vrot.lane.b32.xlu2 %v8713_v55, %s7677_s3  ;;  %3155 = vrot.lane.b32.xlu0 %v8713_v55, %s7675_s26  ;;  %s9626_s26 = smov 48   ;;  %s9627_s3 = smov 56  }
 0xb74   :  { %3061 = vrot.lane.b32.xlu1 %v2825_v54, %s9624_s25 }
 0xb7b   :  { %3390 = vrot.lane.b32.xlu2 %v8713_v55, %s7680_s28  ;;  %3312 = vrot.lane.b32.xlu0 %v8713_v55, %s9623_s1  ;;  %s9628_s28 = smov 40  }
 0xb7c   :  { %3232 = vrot.lane.b32.xlu1 %v2826_v46, %s9622_s17 }
 0xb83   :  { %2879 = vrot.lane.b32.xlu2 %v8700_v53, %s9625_s29  ;;  %3388 = vrot.lane.b32.xlu0 %v2826_v46, %s9624_s25 }
 0xb84   :  { %3310 = vrot.lane.b32.xlu1 %v2826_v46, %s9621_s27 }
 0xbbd   :  { %v2908_v52 = vpop.permute.xlu2 %2907 }
 0xbc5   :  { %v2984_v56 = vpop.permute.xlu2 %2983 }
 0xbcd   :  { %v3235_v57 = vpop.permute.xlu2 %3234 }
 0xbd5   :  { %v3064_v59 = vpop.permute.xlu0 %3063  ;;  %v3391_v62 = vpop.permute.xlu2 %3390 }
 0xbd6   :  { %v2829_v63 = vpop.permute.xlu1 %2828 }
 0xbd7   :  { %6196 = vmatpush.xpose.msk.msra.mxu2 %vm222_vm9, %v2829_v63 }
 0xbda   :  { %6197 = vmatmul.msk.f32.vlgmr.msra.gmra.mxu2 %vm222_vm9, %v2825_v54 }
 0xbdb   :  { %6199 = vmatpush.xpose.msk.msrb.mxu2 %vm222_vm9, %v2908_v52 }
 0xbdd   :  { %v2880_v42 = vpop.permute.xlu2 %2879  ;;  %v2906_v0 = vpop.permute.xlu0 %2905 }
 0xbde   :  { %v2986_v2 = vpop.permute.xlu1 %2985  ;;  %2900 = vmatpush.msra.mxu1 %v2880_v42 }
 0xbdf   :  { %6205 = vmatpush.xpose.msk.msra.mxu2 %vm222_vm9, %v3064_v59  ;;  %6202 = vmatpush.xpose.msk.msrb.mxu3 %vm222_vm9, %v2986_v2 }
 0xbe2   :  { %6200 = vmatmul.msk.f32.vlgmr.msrb.gmra.mxu2 %vm222_vm9, %v2906_v0  ;;  %6203 = vmatmul.msk.f32.vlgmr.msrb.gmra.mxu3 %vm222_vm9, %v2984_v56 }
 0xbe3   :  { %6211 = vmatpush.xpose.msk.msrb.mxu2 %vm222_vm9, %v3235_v57 }
 0xbe5   :  { %v3156_v47 = vpop.permute.xlu0 %3155 }
 0xbe6   :  { %v3062_v7 = vpop.permute.xlu1 %3061  ;;  %6208 = vmatpush.xpose.msk.msra.mxu3 %vm222_vm9, %v3156_v47 }
 0xbea   :  { %6206 = vmatmul.msk.f32.vlgmr.msra.gmra.mxu2 %vm222_vm9, %v3062_v7  ;;  %6209 = vmatmul.msk.f32.vlgmr.msra.gmra.mxu3 %vm222_vm9, %v2826_v46 }
 0xbeb   :  { %6217 = vmatpush.xpose.msk.msra.mxu2 %vm222_vm9, %v3391_v62 }
 0xbed   :  { %v3313_v8 = vpop.permute.xlu0 %3312 }
 0xbee   :  { %v3233_v10 = vpop.permute.xlu1 %3232  ;;  %6214 = vmatpush.xpose.msk.msrb.mxu3 %vm222_vm9, %v3313_v8 }
 0xbf2   :  { %6212 = vmatmul.msk.f32.vlgmr.msrb.gmra.mxu2 %vm222_vm9, %v3233_v10 }
 0xbf5   :  { %v3389_v12 = vpop.permute.xlu0 %3388 }
 0xbf6   :  { %v3311_v11 = vpop.permute.xlu1 %3310 }
 0xbf7   :  { %6215 = vmatmul.msk.f32.vlgmr.msrb.gmra.mxu3 %vm222_vm9, %v3311_v11 }
 0xbfa   :  { %6218 = vmatmul.msk.f32.vlgmr.msra.gmra.mxu2 %vm222_vm9, %v3389_v12 }
 0xc5d   :  { %v2852_v58 = vpop.f32.mrf.mxu2 }
 0xc5e   :  { %v2855_v13 = vsel %vm222_vm9, %v2852_v58, -inf }
 0xc5f   :  { %2856 = vmax.xlane.f32.xlu2 %v2855_v13 }
 0xc65   :  { %v2930_v5 = vpop.f32.mrf.mxu2  ;;  %v3008_v14 = vpop.f32.mrf.mxu3 }
 0xc66   :  { %v3011_v3 = vsel %vm222_vm9, %v3008_v14, -inf  ;;  %v2933_v16 = vsel %vm222_vm9, %v2930_v5, -inf }
 0xc67   :  { %3012 = vmax.xlane.f32.xlu0 %v3011_v3  ;;  %2934 = vmax.xlane.f32.xlu1 %v2933_v16 }
 0xc6d   :  { %v3086_v22 = vpop.f32.mrf.mxu2  ;;  %v3179_v17 = vpop.f32.mrf.mxu3 }
 0xc6e   :  { %v3182_v19 = vsel %vm222_vm9, %v3179_v17, -inf  ;;  %v3089_v18 = vsel %vm222_vm9, %v3086_v22, -inf }
 0xc6f   :  { %3183 = vmax.xlane.f32.xlu1 %v3182_v19  ;;  %3090 = vmax.xlane.f32.xlu2 %v3089_v18 }
 0xc75   :  { %v3257_v6 = vpop.f32.mrf.mxu2 }
 0xc76   :  { %v3260_v20 = vsel %vm222_vm9, %v3257_v6, -inf }
 0xc77   :  { %3261 = vmax.xlane.f32.xlu0 %v3260_v20 }
 0xc7a   :  { %v3335_v24 = vpop.f32.mrf.mxu3 }
 0xc7b   :  { %v3338_v25 = vsel %vm222_vm9, %v3335_v24, -inf }
 0xc7c   :  { %3339 = vmax.xlane.f32.xlu2 %v3338_v25 }
 0xc7d   :  { %v3413_v26 = vpop.f32.mrf.mxu2 }
 0xc7e   :  { %v3416_v27 = vsel %vm222_vm9, %v3413_v26, -inf }
 0xc7f   :  { %3417 = vmax.xlane.f32.xlu1 %v3416_v27 }
 0xc94   :  { %3035 = vrot.lane.b32.xlu2 %v8700_v53, %s9626_s26 }
 0xc98   :  { %2957 = vrot.lane.b32.xlu1 %v8700_v53, %s9627_s3 }
 0xcd2   :  { %v2857_v28 = vpop.xlane.xlu2 %2856 }
 0xcd3   :  { %v2858_v29 = vsub.f32 %v2852_v58, %v2857_v28 }
 0xcd5   :  { %v2859_v4 = vmul.f32 1.442695, %v2858_v29 }
 0xcd7   :  { %7630 = vpow2.f32 %v2859_v4 }
 0xcda   :  { %v3013_v30 = vpop.xlane.xlu0 %3012  ;;  %v2935_v31 = vpop.xlane.xlu1 %2934 }
 0xcdb   :  { %v3014_v32 = vsub.f32 %v3008_v14, %v3013_v30  ;;  %v2936_v15 = vsub.f32 %v2930_v5, %v2935_v31 }
 0xcdd   :  { %v8758_v33 = vpop.eup %7630  ;;  %v3015_v34 = vmul.f32 1.442695, %v3014_v32  ;;  %v2937_v35 = vmul.f32 1.442695, %v2936_v15 }
 0xcde   :  { %v2861_v36 = vsel %vm222_vm9, %v8758_v33, 0.0 }
 0xcdf   :  { %7632 = vpow2.f32 %v3015_v34  ;;  %2862 = vadd.xlane.f32.xlu0 %v2861_v36 }
 0xce0   :  { %7634 = vpow2.f32 %v2937_v35 }
 0xce2   :  { %v3184_v37 = vpop.xlane.xlu1 %3183  ;;  %v3091_v38 = vpop.xlane.xlu2 %3090 }
 0xce3   :  { %v3185_v39 = vsub.f32 %v3179_v17, %v3184_v37  ;;  %v3092_v40 = vsub.f32 %v3086_v22, %v3091_v38 }
 0xce5   :  { %v8762_v41 = vpop.eup %7632  ;;  %v3186_v1 = vmul.f32 1.442695, %v3185_v39  ;;  %v3093_v43 = vmul.f32 1.442695, %v3092_v40 }
 0xce6   :  { %v8764_v60 = vpop.eup %7634  ;;  %v3017_v44 = vsel %vm222_vm9, %v8762_v41, 0.0 }
 0xce7   :  { %7636 = vpow2.f32 %v3186_v1  ;;  %3018 = vadd.xlane.f32.xlu1 %v3017_v44  ;;  %v2939_v45 = vsel %vm222_vm9, %v8764_v60, 0.0 }
 0xce8   :  { %7638 = vpow2.f32 %v3093_v43  ;;  %2940 = vadd.xlane.f32.xlu2 %v2939_v45 }
 0xcea   :  { %v3262_v51 = vpop.xlane.xlu0 %3261 }
 0xceb   :  { %v3263_v52 = vsub.f32 %v3257_v6, %v3262_v51 }
 0xced   :  { %v8770_v61 = vpop.eup %7636  ;;  %v3264_v57 = vmul.f32 1.442695, %v3263_v52 }
 0xcee   :  { %v8772_v50 = vpop.eup %7638  ;;  %v3188_v23 = vsel %vm222_vm9, %v8770_v61, 0.0 }
 0xcef   :  { %3189 = vadd.xlane.f32.xlu1 %v3188_v23  ;;  %v3095_v54 = vsel %vm222_vm9, %v8772_v50, 0.0  ;;  %v3340_v9 = vpop.xlane.xlu2 %3339 }
 0xcf0   :  { %3096 = vadd.xlane.f32.xlu0 %v3095_v54  ;;  %v3341_v46 = vsub.f32 %v3335_v24, %v3340_v9 }
 0xcf2   :  { %v3342_v56 = vmul.f32 1.442695, %v3341_v46  ;;  %v3418_v59 = vpop.xlane.xlu1 %3417 }
 0xcf3   :  { %v3419_v42 = vsub.f32 %v3413_v26, %v3418_v59 }
 0xcf4   :  { %7640 = vpow2.f32 %v3342_v56 }
 0xcf5   :  { %7642 = vpow2.f32 %v3264_v57  ;;  %v3420_v2 = vmul.f32 1.442695, %v3419_v42 }
 0xcf7   :  { %v3036_v62 = vpop.permute.xlu2 %3035  ;;  %7644 = vpow2.f32 %v3420_v2 }
 0xcf8   :  { %3056 = vmatpush.msrb.mxu0 %v3036_v62 }
 0xcfa   :  { %v8778_v63 = vpop.eup %7640 }
 0xcfb   :  { %v3344_v0 = vsel %vm222_vm9, %v8778_v63, 0.0  ;;  %v8782_v47 = vpop.eup %7642 }
 0xcfc   :  { %3345 = vadd.xlane.f32.xlu0 %v3344_v0  ;;  %v3266_v7 = vsel %vm222_vm9, %v8782_v47, 0.0 }
 0xcfd   :  { %v8788_v8 = vpop.eup %7644 }
 0xcfe   :  { %v3422_v11 = vsel %vm222_vm9, %v8788_v8, 0.0 }
 0xd00   :  { %3206 = vrot.lane.b32.xlu2 %v8713_v55, %s9625_s29 }
 0xd04   :  { %3267 = vadd.xlane.f32.xlu0 %v3266_v7 }
 0xd08   :  { %3362 = vrot.lane.b32.xlu2 %v8713_v55, %s9626_s26  ;;  %3284 = vrot.lane.b32.xlu1 %v8713_v55, %s9627_s3 }
 0xd0a   :  { %v2958_v10 = vpop.permute.xlu1 %2957 }
 0xd0b   :  { %2978 = vmatpush.msrb.mxu1 %v2958_v10 }
 0xd0c   :  { %3423 = vadd.xlane.f32.xlu0 %v3422_v11 }
 0xd10   :  { %3440 = vrot.lane.b32.xlu1 %v8713_v55, %s9628_s28 }
 0xd20   :  { %3113 = vrot.lane.b32.xlu0 %v8700_v53, %s9628_s28 }
 0xd52   :  { %v2863_v12 = vpop.xlane.xlu0 %2862 }
 0xd53   :  { %7646 = vrcp.f32 %v2863_v12  ;;  %v2875_v22 = vand.u32 2147483648, %v2863_v12  ;;  %v2873_v17 = vand.u32 2147483647, %v2863_v12  ;;  %vm2869_vm4 = vweird.f32 %v2863_v12 }
 0xd55   :  { %v2876_v53 = vor.u32 1.1754944e-38, %v2875_v22  ;;  %vm2874_vm6 = vcmp.eq.f32.partialorder %v2873_v17, 8.507059e+37 }
 0xd59   :  { %v7647_v58 = vpop.eup %7646 }
 0xd5a   :  { %v2865_v13 = vmul.f32 %v7647_v58, %v2863_v12  ;;  %v3019_v5 = vpop.xlane.xlu1 %3018  ;;  %vm2870_vm3 = vweird.f32 %v7647_v58 }
 0xd5b   :  { %7648 = vrcp.f32 %v3019_v5  ;;  %v2941_v14 = vpop.xlane.xlu2 %2940  ;;  %vm2871_vm5 = vmor %vm2869_vm4, %vm2870_vm3  ;;  %v3031_v29 = vand.u32 2147483648, %v3019_v5  ;;  %v3029_v31 = vand.u32 2147483647, %v3019_v5  ;;  %vm3025_vm10 = vweird.f32 %v3019_v5 }
 0xd5c   :  { %v2866_v3 = vsub.f32 1.0, %v2865_v13  ;;  %7650 = vrcp.f32 %v2941_v14  ;;  %v2953_v32 = vand.u32 2147483648, %v2941_v14  ;;  %v2951_v34 = vand.u32 2147483647, %v2941_v14 }
 0xd5d   :  { %v3032_v39 = vor.u32 1.1754944e-38, %v3031_v29  ;;  %vm2947_vm12 = vweird.f32 %v2941_v14  ;;  %vm3030_vm13 = vcmp.eq.f32.partialorder %v3029_v31, 8.507059e+37 }
 0xd5e   :  { %v2867_v16 = vmul.f32 %v7647_v58, %v2866_v3  ;;  %v2954_v43 = vor.u32 1.1754944e-38, %v2953_v32  ;;  %vm2952_vm15 = vcmp.eq.f32.partialorder %v2951_v34, 8.507059e+37 }
 0xd60   :  { %v2868_v19 = vadd.f32 %v7647_v58, %v2867_v16 }
 0xd61   :  { %v7649_v18 = vpop.eup %7648 }
 0xd62   :  { %v7651_v55 = vpop.eup %7650  ;;  %v2872_v6 = vsel %vm2871_vm5, %v7647_v58, %v2868_v19  ;;  %v3021_v20 = vmul.f32 %v7649_v18, %v3019_v5  ;;  %v3190_v24 = vpop.xlane.xlu1 %3189  ;;  %vm3026_vm7 = vweird.f32 %v7649_v18 }
 0xd63   :  { %v2943_v25 = vmul.f32 %v7651_v55, %v2941_v14  ;;  %7652 = vrcp.f32 %v3190_v24  ;;  %v3207_v26 = vpop.permute.xlu2 %3206  ;;  %v2877_v27 = vsel %vm2874_vm6, %v2876_v53, %v2872_v6  ;;  %vm2948_vm8 = vweird.f32 %v7651_v55  ;;  %v8800_v35 = vpop.xlane.xlu0 %3096  ;;  %vm3027_vm11 = vmor %vm3025_vm10, %vm3026_vm7 }
 0xd64   :  { %v3022_v28 = vsub.f32 1.0, %v3021_v20  ;;  %3227 = vmatpush.msra.mxu0 %v3207_v26  ;;  %v2878_v36 = vmul.f32 %v8758_v33, %v2877_v27  ;;  %vm2949_vm14 = vmor %vm2947_vm12, %vm2948_vm8  ;;  %v3202_v33 = vand.u32 2147483648, %v3190_v24  ;;  %v3200_v56 = vand.u32 2147483647, %v3190_v24 }
 0xd65   :  { %v2944_v4 = vsub.f32 1.0, %v2943_v25  ;;  %vm3196_vm4 = vweird.f32 %v3190_v24  ;;  %v3109_v26 = vand.u32 2147483648, %v8800_v35  ;;  %v3107_v27 = vand.u32 2147483647, %v8800_v35 }
 0xd66   :  { %v3023_v30 = vmul.f32 %v7649_v18, %v3022_v28  ;;  %6198 = vmatmul.msk.f32.vlgmr.msra.gmra.mxu1 %vm222_vm9, %v2878_v36  ;;  %v3203_v42 = vor.u32 1.1754944e-38, %v3202_v33  ;;  %vm3201_vm6 = vcmp.eq.f32.partialorder %v3200_v56, 8.507059e+37 }
 0xd67   :  { %v2945_v15 = vmul.f32 %v7651_v55, %v2944_v4 }
 0xd68   :  { %v3024_v37 = vadd.f32 %v7649_v18, %v3023_v30  ;;  %v3110_v30 = vor.u32 1.1754944e-38, %v3109_v26 }
 0xd69   :  { %v7653_v38 = vpop.eup %7652  ;;  %v2946_v40 = vadd.f32 %v7651_v55, %v2945_v15 }
 0xd6a   :  { %v3028_v1 = vsel %vm3027_vm11, %v7649_v18, %v3024_v37  ;;  %v3192_v44 = vmul.f32 %v7653_v38, %v3190_v24  ;;  %vm3197_vm3 = vweird.f32 %v7653_v38 }
 0xd6b   :  { %v3033_v45 = vsel %vm3030_vm13, %v3032_v39, %v3028_v1  ;;  %v2950_v23 = vsel %vm2949_vm14, %v7651_v55, %v2946_v40  ;;  %v3363_v57 = vpop.permute.xlu2 %3362  ;;  %vm3198_vm5 = vmor %vm3196_vm4, %vm3197_vm3  ;;  %vm3103_vm13 = vweird.f32 %v8800_v35 }
 0xd6c   :  { %v2955_v51 = vsel %vm2952_vm15, %v2954_v43, %v2950_v23  ;;  %v3193_v54 = vsub.f32 1.0, %v3192_v44  ;;  %v3034_v46 = vmul.f32 %v8762_v41, %v3033_v45  ;;  %vm3108_vm15 = vcmp.eq.f32.partialorder %v3107_v27, 8.507059e+37 }
 0xd6d   :  { %v2956_v9 = vmul.f32 %v8764_v60, %v2955_v51 }
 0xd6e   :  { %v3194_v52 = vmul.f32 %v7653_v38, %v3193_v54  ;;  %6204 = vmatmul.msk.f32.vlgmr.msrb.gmra.mxu0 %vm222_vm9, %v3034_v46 }
 0xd6f   :  { %v3346_v59 = vpop.xlane.xlu0 %3345  ;;  %3383 = vmatpush.msrb.mxu0 %v3363_v57  ;;  %6201 = vmatmul.msk.f32.vlgmr.msrb.gmra.mxu1 %vm222_vm9, %v2956_v9 }
 0xd70   :  { %v3195_v62 = vadd.f32 %v7653_v38, %v3194_v52  ;;  %7654 = vrcp.f32 %v3346_v59  ;;  %v3358_v58 = vand.u32 2147483648, %v3346_v59  ;;  %v3356_v5 = vand.u32 2147483647, %v3346_v59 }
 0xd71   :  { %7656 = vrcp.f32 %v8800_v35  ;;  %vm3352_vm8 = vweird.f32 %v3346_v59 }
 0xd72   :  { %v3199_v0 = vsel %vm3198_vm5, %v7653_v38, %v3195_v62  ;;  %v3359_v16 = vor.u32 1.1754944e-38, %v3358_v58  ;;  %vm3357_vm11 = vcmp.eq.f32.partialorder %v3356_v5, 8.507059e+37 }
 0xd73   :  { %v3204_v60 = vsel %vm3201_vm6, %v3203_v42, %v3199_v0 }
 0xd74   :  { %v3205_v41 = vmul.f32 %v8770_v61, %v3204_v60 }
 0xd76   :  { %v7655_v2 = vpop.eup %7654  ;;  %6210 = vmatmul.msk.f32.vlgmr.msra.gmra.mxu0 %vm222_vm9, %v3205_v41 }
 0xd77   :  { %v3348_v7 = vmul.f32 %v7655_v2, %v3346_v59  ;;  %v3268_v10 = vpop.xlane.xlu0 %3267  ;;  %v7657_v11 = vpop.eup %7656  ;;  %vm3353_vm7 = vweird.f32 %v7655_v2 }
 0xd78   :  { %7658 = vrcp.f32 %v3268_v10  ;;  %v3099_v14 = vmul.f32 %v7657_v11, %v8800_v35  ;;  %vm3354_vm10 = vmor %vm3352_vm8, %vm3353_vm7  ;;  %vm3104_vm12 = vweird.f32 %v7657_v11  ;;  %v3280_v34 = vand.u32 2147483648, %v3268_v10 }
 0xd79   :  { %v3349_v12 = vsub.f32 1.0, %v3348_v7  ;;  %vm3105_vm14 = vmor %vm3103_vm13, %vm3104_vm12  ;;  %vm3274_vm4 = vweird.f32 %v3268_v10  ;;  %v3278_v36 = vand.u32 2147483647, %v3268_v10 }
 0xd7a   :  { %v3100_v61 = vsub.f32 1.0, %v3099_v14  ;;  %v3285_v28 = vpop.permute.xlu1 %3284  ;;  %v3281_v40 = vor.u32 1.1754944e-38, %v3280_v34 }
 0xd7b   :  { %v3350_v13 = vmul.f32 %v7655_v2, %v3349_v12  ;;  %vm3279_vm6 = vcmp.eq.f32.partialorder %v3278_v36, 8.507059e+37 }
 0xd7c   :  { %v3101_v6 = vmul.f32 %v7657_v11, %v3100_v61 }
 0xd7d   :  { %v3351_v3 = vadd.f32 %v7655_v2, %v3350_v13 }
 0xd7e   :  { %v7659_v18 = vpop.eup %7658  ;;  %v3102_v20 = vadd.f32 %v7657_v11, %v3101_v6  ;;  %v7575_v6 = vld [vmem:[%s9567_s9 + $0x1] ss:$0 sm:$0xff] }
 0xd7f   :  { %v3355_v22 = vsel %vm3354_vm10, %v7655_v2, %v3351_v3  ;;  %v3424_v19 = vpop.xlane.xlu0 %3423  ;;  %v3270_v53 = vmul.f32 %v7659_v18, %v3268_v10  ;;  %vm3275_vm3 = vweird.f32 %v7659_v18  ;;  %v7354_v2 = vld [vmem:[%s9568_s8 + $0x10] sm:$0xff] }
 0xd80   :  { %v3360_v17 = vsel %vm3357_vm11, %v3359_v16, %v3355_v22  ;;  %7660 = vrcp.f32 %v3424_v19  ;;  %v3106_v29 = vsel %vm3105_vm14, %v7657_v11, %v3102_v20  ;;  %vm3276_vm5 = vmor %vm3274_vm4, %vm3275_vm3  ;;  %v3436_v45 = vand.u32 2147483648, %v3424_v19 }
 0xd81   :  { %v3361_v55 = vmul.f32 %v8778_v63, %v3360_v17  ;;  %v3271_v24 = vsub.f32 1.0, %v3270_v53  ;;  %v3111_v31 = vsel %vm3108_vm15, %v3110_v30, %v3106_v29  ;;  %vm3430_vm8 = vweird.f32 %v3424_v19 }
 0xd82   :  { %v3112_v38 = vmul.f32 %v8772_v50, %v3111_v31  ;;  %v3441_v1 = vpop.permute.xlu1 %3440  ;;  %v3434_v51 = vand.u32 2147483647, %v3424_v19  ;;  %v3437_v54 = vor.u32 1.1754944e-38, %v3436_v45  ;;  %v7381_v45 = vld [vmem:[%s9571_s12 + $0x1c4] sm:$0xf0] }
 0xd83   :  { %6216 = vmatmul.msk.f32.vlgmr.msrb.gmra.mxu0 %vm222_vm9, %v3361_v55  ;;  %v3272_v4 = vmul.f32 %v7659_v18, %v3271_v24 }
 0xd84   :  { %vm3435_vm11 = vcmp.eq.f32.partialorder %v3434_v51, 8.507059e+37 }
 0xd85   :  { %v3273_v32 = vadd.f32 %v7659_v18, %v3272_v4 }
 0xd86   :  { %v7661_v25 = vpop.eup %7660 }
 0xd87   :  { %v3426_v63 = vmul.f32 %v7661_v25, %v3424_v19  ;;  %v3277_v35 = vsel %vm3276_vm5, %v7659_v18, %v3273_v32  ;;  %vm3431_vm7 = vweird.f32 %v7661_v25 }
 0xd88   :  { %v3282_v43 = vsel %vm3279_vm6, %v3281_v40, %v3277_v35  ;;  %vm3432_vm10 = vmor %vm3430_vm8, %vm3431_vm7  ;;  %v7380_v35 = vld [vmem:[%s9571_s12 + $0x1bc] sm:$0xf0]  ;;  %vm5407_vm8 = vcmask 1040384  }
 0xd89   :  { %v3427_v15 = vsub.f32 1.0, %v3426_v63  ;;  %v3283_v23 = vmul.f32 %v8782_v47, %v3282_v43  ;;  %v6338_v43 = vld [vmem:[%s9571_s12 + $0x1c0] sm:$0xf0] }
 0xd8b   :  { %v3428_v39 = vmul.f32 %v7661_v25, %v3427_v15 }
 0xd8d   :  { %v3429_v44 = vadd.f32 %v7661_v25, %v3428_v39  ;;  %v7372_v39 = vld [vmem:[%s9571_s12 + $0x184] sm:$0xf] }
 0xd8f   :  { %v3433_v50 = vsel %vm3432_vm10, %v7661_v25, %v3429_v44  ;;  %v6344_v44 = vld [vmem:[%s9571_s12 + $0x188] sm:$0xf] }
 0xd90   :  { %v3438_v33 = vsel %vm3435_vm11, %v3437_v54, %v3433_v50  ;;  %v6345_v51 = vor.u32 %v7381_v45, %v6344_v44  ;;  %v7373_v50 = vld [vmem:[%s9571_s12 + $0x18c] sm:$0xf] }
 0xd91   :  { %v3439_v9 = vmul.f32 %v8788_v8, %v3438_v33  ;;  %v7355_v8 = vld [vmem:[%s9568_s8 + $0x18] sm:$0xff]  ;;  %v6346_v54 = vld [vmem:[%s9571_s12 + $0x1c8] sm:$0xf0] }
 0xd92   :  { %v3114_v37 = vpop.permute.xlu0 %3113  ;;  %3513 = vmatpush.bf16.msra.mxu3 %v7355_v8 }
 0xd93   :  { %3134 = vmatpush.msra.mxu1 %v3114_v37 }
 0xd94   :  { %6207 = vmatmul.msk.f32.vlgmr.msra.gmra.mxu1 %vm222_vm9, %v3112_v38  ;;  %v6336_v38 = vld [vmem:[%s9571_s12 + $0x180] sm:$0xf] }
 0xd95   :  { %3305 = vmatpush.msrb.mxu1 %v3285_v28 }
 0xd96   :  { %3514 = vmatpush.bf16.msra.mxu3 %v7354_v2 }
 0xd97   :  { %3461 = vmatpush.msra.mxu1 %v3441_v1  ;;  %v6337_v1 = vor.u32 %v7380_v35, %v6336_v38 }
 0xd99   :  { %3821 = vmatpush.bf16.msra.mxu0 %v6337_v1  ;;  %v7576_v1 = vld [vmem:[%s9569_s10 + $0x1] ss:$0 sm:$0xff] }
 0xd9c   :  { %6213 = vmatmul.msk.f32.vlgmr.msrb.gmra.mxu1 %vm222_vm9, %v3283_v23  ;;  %v6341_v23 = vor.u32 %v7372_v39, %v6338_v43 }
 0xd9d   :  { %3849 = vmatpush.bf16.msrb.mxu1 %v6345_v51 }
 0xd9e   :  { %3835 = vmatpush.bf16.msrb.mxu2 %v6341_v23  ;;  %v7577_v23 = vld [vmem:[%s9570_s11 + $0x1] ss:$0 sm:$0xff] }
 0xda4   :  { %6219 = vmatmul.msk.f32.vlgmr.msra.gmra.mxu1 %vm222_vm9, %v3439_v9  ;;  %v6349_v9 = vor.u32 %v7373_v50, %v6346_v54 }
 0xda6   :  { %3863 = vmatpush.bf16.msrb.mxu3 %v6349_v9  ;;  %v7376_v9 = vld [vmem:[%s9571_s12 + $0x1a4] sm:$0xf] }
 0xde3   :  { %v2902_v56 = vpop.f32.mrf.mxu1 }
 0xdeb   :  { %v3058_v46 = vpop.f32.mrf.mxu0 }
 0xdec   :  { %v2980_v47 = vpop.f32.mrf.mxu1 }
 0xdf3   :  { %v3229_v52 = vpop.f32.mrf.mxu0 }
 0xe00   :  { %v3385_v57 = vpop.f32.mrf.mxu0 }
 0xe01   :  { %v7552_v59 = vpack.i.bf16 %v3385_v57, %v3058_v46  ;;  %v6272_v46 = vld [vmem:[%s9571_s12 + $0x100] sm:$0xf] }
 0xe03   :  { %7553 = vrot.lane.b32.xlu0 %v7552_v59, %s9629_s4  ;;  %v6274_v59 = vld [vmem:[%s9571_s12 + $0x140] sm:$0xf0] }
 0xe11   :  { %v3136_v62 = vpop.f32.mrf.mxu1 }
 0xe19   :  { %v3307_v42 = vpop.f32.mrf.mxu1 }
 0xe1a   :  { %v7547_v0 = vpack.i.bf16 %v3307_v42, %v2980_v47  ;;  %v6280_v47 = vld [vmem:[%s9571_s12 + $0x108] sm:$0xf] }
 0xe1c   :  { %7548 = vrot.lane.b32.xlu2 %v7547_v0, %s9630_s0 }
 0xe21   :  { %v3463_v60 = vpop.f32.mrf.mxu1 }
 0xe22   :  { %v7557_v41 = vpack.i.bf16 %v3463_v60, %v3136_v62  ;;  %v7365_v62 = vld [vmem:[%s9571_s12 + $0x144] sm:$0xf0]  ;;  %v7357_v60 = vld [vmem:[%s9571_s12 + $0x10c] sm:$0xf] }
 0xe23   :  { %v6281_v0 = vor.u32 %v7365_v62, %v6280_v47  ;;  %v6378_v47 = vld [vmem:[%s9571_s12 + $0x1e8] sm:$0xf0] }
 0xe24   :  { %7558 = vrot.lane.b32.xlu1 %v7557_v41, %s9631_s6  ;;  %v6282_v41 = vld [vmem:[%s9571_s12 + $0x148] sm:$0xf0] }
 0xe25   :  { %v6285_v8 = vor.u32 %v7357_v60, %v6282_v41  ;;  %3850 = vmatpush.bf16.msrb.mxu1 %v6281_v0  ;;  %v6304_v60 = vld [vmem:[%s9571_s12 + $0x120] sm:$0xf] }
 0xe26   :  { %v7368_v41 = vld [vmem:[%s9571_s12 + $0x15c] sm:$0xf0] }
 0xe27   :  { %3864 = vmatpush.bf16.msrb.mxu3 %v6285_v8 }
 0xe75   :  { %v7554_v12 = vpop.permute.xlu0 %7553 }
 0xe76   :  { %v7549_v7 = vpop.permute.xlu2 %7548  ;;  %v7556_v5 = vunpack.i.h.bf16 %v7554_v12  ;;  %v7555_v14 = vunpack.i.l.bf16 %v7554_v12 }
 0xe77   :  { %v7551_v10 = vunpack.i.h.bf16 %v7549_v7  ;;  %v7550_v11 = vunpack.i.l.bf16 %v7549_v7  ;;  %v6352_v7 = vld [vmem:[%s9571_s12 + $0x190] sm:$0xf] }
 0xe79   :  { %v3478_v58 = vsel %vm222_vm9, %v3229_v52, %v7551_v10  ;;  %v3151_v13 = vsel %vm222_vm9, %v2902_v56, %v7550_v11  ;;  %v7364_v52 = vld [vmem:[%s9571_s12 + $0x13c] sm:$0xf0]  ;;  %v7356_v56 = vld [vmem:[%s9571_s12 + $0x104] sm:$0xf]  ;;  %v7382_v10 = vld [vmem:[%s9571_s12 + $0x1cc] sm:$0xf0] }
 0xe7a   :  { %v3152_v61 = vsel %vm93_vm0, %v3151_v13, %v7555_v14  ;;  %v3479_v17 = vsel %vm93_vm0, %v3478_v58, %v7556_v5  ;;  %v6273_v57 = vor.u32 %v7364_v52, %v6272_v46  ;;  %v6277_v42 = vor.u32 %v7356_v56, %v6274_v59  ;;  %v7374_v11 = vld [vmem:[%s9571_s12 + $0x194] sm:$0xf]  ;;  %v6360_v5 = vld [vmem:[%s9571_s12 + $0x198] sm:$0xf]  ;;  %v6370_v46 = vld [vmem:[%s9571_s12 + $0x1e0] sm:$0xf0] }
 0xe7b   :  { %v6353_v58 = vor.u32 %v7382_v10, %v6352_v7  ;;  %v6354_v13 = vld [vmem:[%s9571_s12 + $0x1d0] sm:$0xf0]  ;;  %v7383_v14 = vld [vmem:[%s9571_s12 + $0x1d4] sm:$0xf0]  ;;  %v7377_v59 = vld [vmem:[%s9571_s12 + $0x1ac] sm:$0xf]  ;;  %v6373_v0 = vor.u32 %v7376_v9, %v6370_v46 }
 0xe7c   :  { %3822 = vmatpush.bf16.msra.mxu0 %v6273_v57  ;;  %3836 = vmatpush.bf16.msrb.mxu2 %v6277_v42  ;;  %v7385_v57 = vld [vmem:[%s9571_s12 + $0x1e4] sm:$0xf0]  ;;  %v7360_v7 = vld [vmem:[%s9571_s12 + $0x124] sm:$0xf] }
 0xe7d   :  { %v6306_v10 = vld [vmem:[%s9571_s12 + $0x160] sm:$0xf0] }
 0xe7e   :  { %v7400_v9 = vld [vmem:[%s9572_s14 + $0x460] sm:$0xff] }
 0xe7f   :  { %v7416_v46 = vld [vmem:[%s9572_s14 + $0x4e0] sm:$0xff] }
 0xe80   :  { %3877 = vmatpush.bf16.msrb.mxu0 %v6353_v58  ;;  %v7361_v58 = vld [vmem:[%s9571_s12 + $0x12c] sm:$0xf] }
 0xe96   :  { %v7559_v3 = vpop.permute.xlu1 %7558 }
 0xe97   :  { %v7561_v16 = vunpack.i.h.bf16 %v7559_v3  ;;  %v7560_v22 = vunpack.i.l.bf16 %v7559_v3  ;;  %v6357_v3 = vor.u32 %v7374_v11, %v6354_v13  ;;  %v6312_v11 = vld [vmem:[%s9571_s12 + $0x128] sm:$0xf]  ;;  %v6314_v13 = vld [vmem:[%s9571_s12 + $0x168] sm:$0xf0] }
 0xe99   :  { %v3153_v19 = vsel %vm546_vm2, %v3152_v61, %v7560_v22  ;;  %v3480_v18 = vsel %vm546_vm2, %v3479_v17, %v7561_v16  ;;  %v6361_v16 = vor.u32 %v7383_v14, %v6360_v5  ;;  %v7375_v22 = vld [vmem:[%s9571_s12 + $0x19c] sm:$0xf]  ;;  %v6288_v17 = vld [vmem:[%s9571_s12 + $0x110] sm:$0xf]  ;;  %3891 = vmatpush.bf16.msra.mxu2 %v6357_v3  ;;  %v6305_v5 = vor.u32 %v7368_v41, %v6304_v60  ;;  %v7389_v41 = vld [vmem:[%s9572_s14 + $0x408] sm:$0xff] }
 0xe9a   :  { %v3488_v55 = vpack.c.bf16 %v3480_v18, %v3153_v19  ;;  %v6362_v61 = vld [vmem:[%s9571_s12 + $0x1d8] sm:$0xf0]  ;;  %v6309_v14 = vor.u32 %v7360_v7, %v6306_v10  ;;  %v7398_v60 = vld [vmem:[%s9572_s14 + $0x450] sm:$0xff]  ;;  %v7413_v7 = vld [vmem:[%s9572_s14 + $0x4c8] sm:$0xff] }
 0xe9b   :  { %3905 = vmatpush.bf16.msra.mxu1 %v6361_v16  ;;  %v6317_v16 = vor.u32 %v7361_v58, %v6314_v13  ;;  %v7388_v10 = vld [vmem:[%s9572_s14 + $0x400] sm:$0xff]  ;;  %v7443_v58 = vld [vmem:[%s9572_s14 + $0x5b8] sm:$0xff] }
 0xe9c   :  { %6233 = vmatmul.msk.bf16.vlgmr.msra.gmra.mxu3 %vm117_vm1, %v3488_v55  ;;  %v6365_v55 = vor.u32 %v7375_v22, %v6362_v61  ;;  %v6384_v22 = vld [vmem:[%s9571_s12 + $0x1b0] sm:$0xf]  ;;  %v7396_v13 = vld [vmem:[%s9572_s14 + $0x440] sm:$0xff] }
 0xe9d   :  { %v7386_v61 = vld [vmem:[%s9571_s12 + $0x1ec] sm:$0xf0] }
 0xe9e   :  { %3919 = vmatpush.bf16.msra.mxu3 %v6365_v55  ;;  %v7387_v55 = vld [vmem:[%s9571_s12 + $0x1f4] sm:$0xf0] }
 0xf1f   :  { %v3516_v53 = vpop.f32.mrf.mxu3 }
 0xf20   :  { %v3517_v20 = vadd.f32 %v7575_v6, %v3516_v53  ;;  %v7358_v53 = vld [vmem:[%s9571_s12 + $0x114] sm:$0xf] }
 0xf22   :  { %v3521_v24 = vadd.f32 %v3517_v20, %v8690_v48 }
 0xf24   :  { %v3527_v25 = vsel %vm117_vm1, %v3521_v24, 0.0 }
 0xf25   :  { %3528 = vadd.xlane.f32.xlu2 %v3527_v25  ;;  %v6290_v25 = vld [vmem:[%s9571_s12 + $0x150] sm:$0xf0] }
 0xf27   :  { %v3518_v26 = vpop.f32.mrf.mxu3 }
 0xf28   :  { %v3519_v27 = vadd.f32 %v7575_v6, %v3518_v26  ;;  %v7366_v6 = vld [vmem:[%s9571_s12 + $0x14c] sm:$0xf0]  ;;  %v6296_v26 = vld [vmem:[%s9571_s12 + $0x118] sm:$0xf] }
 0xf2a   :  { %v3522_v28 = vadd.f32 %v3519_v27, %v8692_v49  ;;  %v7367_v27 = vld [vmem:[%s9571_s12 + $0x154] sm:$0xf0] }
 0xf2c   :  { %v3530_v29 = vsel %vm117_vm1, %v3522_v28, 0.0 }
 0xf2d   :  { %3531 = vadd.xlane.f32.xlu0 %v3530_v29  ;;  %v6297_v29 = vor.u32 %v7367_v27, %v6296_v26  ;;  %v7370_v26 = vld [vmem:[%s9571_s12 + $0x16c] sm:$0xf0] }
 0xf2f   :  { %3906 = vmatpush.bf16.msra.mxu1 %v6297_v29  ;;  %v7362_v29 = vld [vmem:[%s9571_s12 + $0x134] sm:$0xf] }
 0xf98   :  { %v3529_v4 = vpop.xlane.xlu2 %3528 }
 0xf99   :  { %v3533_v63 = vmul.f32 %v3529_v4, %v7826_v21  ;;  %v7359_v4 = vld [vmem:[%s9571_s12 + $0x11c] sm:$0xf] }
 0xf9b   :  { %v8847_v30 = vsub.f32 %v3521_v24, %v3533_v63  ;;  %v6289_v24 = vor.u32 %v7366_v6, %v6288_v17  ;;  %v6298_v63 = vld [vmem:[%s9571_s12 + $0x158] sm:$0xf0]  ;;  %v7378_v17 = vld [vmem:[%s9571_s12 + $0x1b4] sm:$0xf] }
 0xf9c   :  { %v7379_v6 = vld [vmem:[%s9571_s12 + $0x1bc] sm:$0xf] }
 0xf9d   :  { %v3537_v31 = vmul.f32 %v8847_v30, %v8847_v30  ;;  %3878 = vmatpush.bf16.msrb.mxu0 %v6289_v24 }
 0xf9f   :  { %v3539_v48 = vsel %vm117_vm1, %v3537_v31, 0.0 }
 0xfa0   :  { %v3532_v32 = vpop.xlane.xlu0 %3531  ;;  %3540 = vadd.xlane.f32.xlu1 %v3539_v48  ;;  %v6301_v48 = vor.u32 %v7359_v4, %v6298_v63  ;;  %v6322_v4 = vld [vmem:[%s9571_s12 + $0x170] sm:$0xf0]  ;;  %v6328_v63 = vld [vmem:[%s9571_s12 + $0x138] sm:$0xf] }
 0xfa1   :  { %v3534_v15 = vmul.f32 %v3532_v32, %v7826_v21 }
 0xfa2   :  { %3920 = vmatpush.bf16.msra.mxu3 %v6301_v48  ;;  %v7363_v48 = vld [vmem:[%s9571_s12 + $0x13c] sm:$0xf] }
 0xfa3   :  { %v8853_v34 = vsub.f32 %v3522_v28, %v3534_v15  ;;  %v6293_v28 = vor.u32 %v7358_v53, %v6290_v25  ;;  %v6394_v53 = vld [vmem:[%s9571_s12 + $0x1f8] sm:$0xf0]  ;;  %v6320_v25 = vld [vmem:[%s9571_s12 + $0x130] sm:$0xf] }
 0xfa5   :  { %v3538_v49 = vmul.f32 %v8853_v34, %v8853_v34  ;;  %3892 = vmatpush.bf16.msra.mxu2 %v6293_v28  ;;  %v6397_v28 = vor.u32 %v7379_v6, %v6394_v53  ;;  %v7440_v6 = vld [vmem:[%s9572_s14 + $0x5a0] sm:$0xff]  ;;  %v7433_v53 = vld [vmem:[%s9572_s14 + $0x568] sm:$0xff] }
 0xfa7   :  { %v3542_v36 = vsel %vm117_vm1, %v3538_v49, 0.0 }
 0xfa8   :  { %3543 = vadd.xlane.f32.xlu2 %v3542_v36 }
0x1013   :  { %v3541_v37 = vpop.xlane.xlu1 %3540 }
0x1014   :  { %v3545_v40 = vmul.f32 %v3541_v37, %v7826_v21 }
0x1016   :  { %v8883_v33 = vadd.f32 1e-05, %v3545_v40 }
0x1018   :  { %7662 = vrsqrt.f32 %v8883_v33  ;;  %vm3555_vm9 = vweird.f32 %v8883_v33 }
0x101b   :  { %v3544_v2 = vpop.xlane.xlu2 %3543 }
0x101c   :  { %v3546_v12 = vmul.f32 %v3544_v2, %v7826_v21  ;;  %v6381_v2 = vor.u32 %v7377_v59, %v6378_v47  ;;  %v7399_v59 = vld [vmem:[%s9572_s14 + $0x458] sm:$0xff] }
0x101d   :  { %v7415_v47 = vld [vmem:[%s9572_s14 + $0x4d8] sm:$0xff] }
0x101e   :  { %v7663_v19 = vpop.eup %7662  ;;  %v3548_v18 = vadd.f32 1e-05, %v3546_v12  ;;  %v7369_v12 = vld [vmem:[%s9571_s12 + $0x164] sm:$0xf0] }
0x101f   :  { %v3550_v20 = vmul.f32 %v7663_v19, %v8883_v33  ;;  %vm3556_vm0 = vweird.f32 %v7663_v19  ;;  %v6368_v33 = vld [vmem:[%s9571_s12 + $0x1a0] sm:$0xf]  ;;  %v6313_v3 = vor.u32 %v7369_v12, %v6312_v11  ;;  %v7427_v12 = vld [vmem:[%s9572_s14 + $0x538] sm:$0xff] }
0x1020   :  { %7664 = vrsqrt.f32 %v3548_v18  ;;  %vm3557_vm2 = vmor %vm3555_vm9, %vm3556_vm0  ;;  %vm3565_vm13 = vweird.f32 %v3548_v18  ;;  %v7404_v11 = vld [vmem:[%s9572_s14 + $0x480] sm:$0xff] }
0x1021   :  { %v3551_v31 = vmul.f32 %v7663_v19, %v3550_v20  ;;  %v6385_v20 = vor.u32 %v7386_v61, %v6384_v22  ;;  %v7442_v22 = vld [vmem:[%s9572_s14 + $0x5b0] sm:$0xff] }
0x1022   :  { %v7434_v61 = vld [vmem:[%s9572_s14 + $0x570] sm:$0xff] }
0x1023   :  { %v3552_v32 = vmul.f32 0.5, %v3551_v31  ;;  %v7371_v31 = vld [vmem:[%s9571_s12 + $0x174] sm:$0xf0] }
0x1025   :  { %v3553_v15 = vsub.f32 1.5, %v3552_v32  ;;  %v6330_v32 = vld [vmem:[%s9571_s12 + $0x178] sm:$0xf0] }
0x1026   :  { %v7665_v49 = vpop.eup %7664 }
0x1027   :  { %v3554_v36 = vmul.f32 %v7663_v19, %v3553_v15  ;;  %v3560_v37 = vmul.f32 %v7665_v49, %v3548_v18  ;;  %vm3566_vm12 = vweird.f32 %v7665_v49  ;;  %v6392_v18 = vld [vmem:[%s9571_s12 + $0x1b8] sm:$0xf]  ;;  %v6321_v15 = vor.u32 %v7370_v26, %v6320_v25  ;;  %v7432_v26 = vld [vmem:[%s9572_s14 + $0x560] sm:$0xff] }
0x1028   :  { %vm3567_vm14 = vmor %vm3565_vm13, %vm3566_vm12  ;;  %v6393_v27 = vor.u32 %v7387_v55, %v6392_v18  ;;  %v7441_v18 = vld [vmem:[%s9572_s14 + $0x5a8] sm:$0xff]  ;;  %v7424_v55 = vld [vmem:[%s9572_s14 + $0x520] sm:$0xff] }
0x1029   :  { %v3561_v38 = vmul.f32 %v7665_v49, %v3560_v37  ;;  %v3558_v35 = vsel %vm3557_vm2, %v7663_v19, %v3554_v36  ;;  %v6386_v19 = vld [vmem:[%s9571_s12 + $0x1f0] sm:$0xf0]  ;;  %v6329_v36 = vor.u32 %v7371_v31, %v6328_v63  ;;  %v6333_v37 = vor.u32 %v7363_v48, %v6330_v32  ;;  %v7439_v25 = vld [vmem:[%s9572_s14 + $0x598] sm:$0xff]  ;;  %v7421_v31 = vld [vmem:[%s9572_s14 + $0x508] sm:$0xff] }
0x102a   :  { %v3569_v43 = vmul.f32 %v3558_v35, %v8847_v30  ;;  %v7384_v30 = vld [vmem:[%s9571_s12 + $0x1dc] sm:$0xf0]  ;;  %v6389_v24 = vor.u32 %v7378_v17, %v6386_v19  ;;  %v7411_v35 = vld [vmem:[%s9572_s14 + $0x4b8] sm:$0xff]  ;;  %v7450_v17 = vld [vmem:[%s9572_s14 + $0x5f0] sm:$0xff] }
0x102b   :  { %v3562_v39 = vmul.f32 0.5, %v3561_v38  ;;  %v6369_v42 = vor.u32 %v7384_v30, %v6368_v33  ;;  %v7395_v38 = vld [vmem:[%s9572_s14 + $0x438] sm:$0xff]  ;;  %v7392_v33 = vld [vmem:[%s9572_s14 + $0x420] sm:$0xff]  ;;  %v7425_v19 = vld [vmem:[%s9572_s14 + $0x528] sm:$0xff] }
0x102c   :  { %v3574_v51 = vmul.f32 %v7576_v1, %v3569_v43  ;;  %v7410_v43 = vld [vmem:[%s9572_s14 + $0x4b0] sm:$0xff]  ;;  %v7408_v30 = vld [vmem:[%s9572_s14 + $0x4a0] sm:$0xff]  ;;  %v7447_v63 = vld [vmem:[%s9572_s14 + $0x5d8] sm:$0xff] }
0x102d   :  { %v3563_v40 = vsub.f32 1.5, %v3562_v39  ;;  %v7403_v39 = vld [vmem:[%s9572_s14 + $0x478] sm:$0xff]  ;;  %v7437_v48 = vld [vmem:[%s9572_s14 + $0x588] sm:$0xff]  ;;  %v7430_v32 = vld [vmem:[%s9572_s14 + $0x550] sm:$0xff] }
0x102e   :  { %v8984_v52 = vadd.f32 %v7577_v23, %v3574_v51  ;;  %v7409_v51 = vld [vmem:[%s9572_s14 + $0x4a8] sm:$0xff] }
0x102f   :  { %v3564_v44 = vmul.f32 %v7665_v49, %v3563_v40  ;;  %v7419_v40 = vld [vmem:[%s9572_s14 + $0x4f8] sm:$0xff] }
0x1031   :  { %v3568_v45 = vsel %vm3567_vm14, %v7665_v49, %v3564_v44  ;;  %v6325_v49 = vor.u32 %v7362_v29, %v6322_v4  ;;  %v7402_v44 = vld [vmem:[%s9572_s14 + $0x470] sm:$0xff]  ;;  %v7431_v4 = vld [vmem:[%s9572_s14 + $0x558] sm:$0xff] }
0x1032   :  { %v3570_v50 = vmul.f32 %v3568_v45, %v8853_v34  ;;  %v6376_v34 = vld [vmem:[%s9571_s12 + $0x1a8] sm:$0xf]  ;;  %v7418_v45 = vld [vmem:[%s9572_s14 + $0x4f0] sm:$0xff] }
0x1033   :  { %v6377_v8 = vor.u32 %v7385_v57, %v6376_v34  ;;  %v7391_v34 = vld [vmem:[%s9572_s14 + $0x418] sm:$0xff]  ;;  %v7438_v29 = vld [vmem:[%s9572_s14 + $0x590] sm:$0xff] }
0x1034   :  { %v3575_v54 = vmul.f32 %v7576_v1, %v3570_v50  ;;  %v7394_v1 = vld [vmem:[%s9572_s14 + $0x430] sm:$0xff]  ;;  %v7401_v50 = vld [vmem:[%s9572_s14 + $0x468] sm:$0xff]  ;;  %v7407_v57 = vld [vmem:[%s9572_s14 + $0x498] sm:$0xff] }
0x1036   :  { %v8986_v56 = vadd.f32 %v7577_v23, %v3575_v54  ;;  %v7393_v23 = vld [vmem:[%s9572_s14 + $0x428] sm:$0xff] }
0x1037   :  { %v7417_v54 = vld [vmem:[%s9572_s14 + $0x4e8] sm:$0xff] }
0x1038   :  { %v8999_v62 = vpack.c.bf16 %v8986_v56, %v8984_v52 }
0x103a   :  { %6398 = vmatmul.msk.bf16.vlgmr.msra.gmra.mxu0 %vm117_vm1, %v8999_v62  ;;  %6399 = vmatmul.msk.bf16.vlgmr.msrb.gmra.mxu2 %vm117_vm1, %v8999_v62 }
0x103b   :  { %6400 = vmatmul.msk.bf16.vlgmr.msrb.gmra.mxu1 %vm117_vm1, %v8999_v62  ;;  %6401 = vmatmul.msk.bf16.vlgmr.msrb.gmra.mxu3 %vm117_vm1, %v8999_v62 }
0x103c   :  { %3933 = vmatpush.bf16.msra.mxu0 %v6369_v42  ;;  %3947 = vmatpush.bf16.msrb.mxu2 %v6373_v0  ;;  %v7390_v42 = vld [vmem:[%s9572_s14 + $0x410] sm:$0xff] }
0x103d   :  { %3961 = vmatpush.bf16.msrb.mxu1 %v6377_v8  ;;  %3975 = vmatpush.bf16.msrb.mxu3 %v6381_v2  ;;  %v7406_v0 = vld [vmem:[%s9572_s14 + $0x490] sm:$0xff]  ;;  %v7405_v8 = vld [vmem:[%s9572_s14 + $0x488] sm:$0xff] }
0x103e   :  { %v7397_v2 = vld [vmem:[%s9572_s14 + $0x448] sm:$0xff] }
0x1040   :  { %3934 = vmatpush.bf16.msra.mxu0 %v6305_v5  ;;  %3948 = vmatpush.bf16.msrb.mxu2 %v6309_v14  ;;  %v7412_v5 = vld [vmem:[%s9572_s14 + $0x4c0] sm:$0xff]  ;;  %v7435_v14 = vld [vmem:[%s9572_s14 + $0x578] sm:$0xff] }
0x1041   :  { %3962 = vmatpush.bf16.msrb.mxu1 %v6313_v3  ;;  %3976 = vmatpush.bf16.msrb.mxu3 %v6317_v16  ;;  %v7451_v3 = vld [vmem:[%s9572_s14 + $0x5f8] sm:$0xff]  ;;  %v7426_v16 = vld [vmem:[%s9572_s14 + $0x530] sm:$0xff] }
0x104a   :  { %6402 = vmatmul.msk.bf16.vlgmr.msrb.gmra.mxu0 %vm117_vm1, %v8999_v62  ;;  %6403 = vmatmul.msk.bf16.vlgmr.msra.gmra.mxu2 %vm117_vm1, %v8999_v62 }
0x104b   :  { %6404 = vmatmul.msk.bf16.vlgmr.msra.gmra.mxu1 %vm117_vm1, %v8999_v62  ;;  %6405 = vmatmul.msk.bf16.vlgmr.msra.gmra.mxu3 %vm117_vm1, %v8999_v62 }
0x104c   :  { %3989 = vmatpush.bf16.msrb.mxu0 %v6385_v20  ;;  %4003 = vmatpush.bf16.msra.mxu2 %v6389_v24  ;;  %v7449_v20 = vld [vmem:[%s9572_s14 + $0x5e8] sm:$0xff]  ;;  %v7423_v24 = vld [vmem:[%s9572_s14 + $0x518] sm:$0xff] }
0x104d   :  { %4017 = vmatpush.bf16.msra.mxu1 %v6393_v27  ;;  %4031 = vmatpush.bf16.msra.mxu3 %v6397_v28  ;;  %v7448_v27 = vld [vmem:[%s9572_s14 + $0x5e0] sm:$0xff]  ;;  %v7422_v28 = vld [vmem:[%s9572_s14 + $0x510] sm:$0xff] }
0x1050   :  { %3990 = vmatpush.bf16.msrb.mxu0 %v6321_v15  ;;  %4004 = vmatpush.bf16.msra.mxu2 %v6325_v49  ;;  %v7446_v15 = vld [vmem:[%s9572_s14 + $0x5d0] sm:$0xff]  ;;  %v7420_v49 = vld [vmem:[%s9572_s14 + $0x500] sm:$0xff] }
0x1051   :  { %4018 = vmatpush.bf16.msra.mxu1 %v6329_v36  ;;  %4032 = vmatpush.bf16.msra.mxu3 %v6333_v37  ;;  %v7436_v36 = vld [vmem:[%s9572_s14 + $0x580] sm:$0xff]  ;;  %v7429_v37 = vld [vmem:[%s9572_s14 + $0x548] sm:$0xff] }
0x105a   :  { %6406 = vmatmul.msk.bf16.vlgmr.msra.gmra.mxu0 %vm117_vm1, %v8999_v62  ;;  %6407 = vmatmul.msk.bf16.vlgmr.msrb.gmra.mxu2 %vm117_vm1, %v8999_v62 }
0x105b   :  { %6408 = vmatmul.msk.bf16.vlgmr.msrb.gmra.mxu1 %vm117_vm1, %v8999_v62  ;;  %6409 = vmatmul.msk.bf16.vlgmr.msrb.gmra.mxu3 %vm117_vm1, %v8999_v62 }
0x105c   :  { %5117 = vmatpush.bf16.msra.mxu0 %v7395_v38  ;;  %5145 = vmatpush.bf16.msrb.mxu1 %v7411_v35  ;;  %v7445_v38 = vld [vmem:[%s9572_s14 + $0x5c8] sm:$0xff]  ;;  %v7428_v35 = vld [vmem:[%s9572_s14 + $0x540] sm:$0xff] }
0x105d   :  { %5131 = vmatpush.bf16.msrb.mxu2 %v7403_v39  ;;  %5159 = vmatpush.bf16.msrb.mxu3 %v7419_v40  ;;  %v7444_v39 = vld [vmem:[%s9572_s14 + $0x5c0] sm:$0xff]  ;;  %v9300_v40 = vld [vmem:[%s9574_s13 + $0x10] sm:$0xff] }
0x1060   :  { %5118 = vmatpush.bf16.msra.mxu0 %v7394_v1  ;;  %5146 = vmatpush.bf16.msrb.mxu1 %v7410_v43 }
0x1061   :  { %5132 = vmatpush.bf16.msrb.mxu2 %v7402_v44  ;;  %5160 = vmatpush.bf16.msrb.mxu3 %v7418_v45  ;;  %v3620_v44 = vperm.slane %v9300_v40, 0  ;;  %v3622_v45 = vperm.slane %v9300_v40, 2 }
0x1064   :  { %5119 = vmatpush.bf16.msra.mxu0 %v7393_v23  ;;  %5147 = vmatpush.bf16.msrb.mxu1 %v7409_v51 }
0x1065   :  { %5133 = vmatpush.bf16.msrb.mxu2 %v7401_v50  ;;  %5161 = vmatpush.bf16.msrb.mxu3 %v7417_v54 }
0x1068   :  { %5120 = vmatpush.bf16.msra.mxu0 %v7392_v33  ;;  %5148 = vmatpush.bf16.msrb.mxu1 %v7408_v30  ;;  %v3621_v30 = vperm.slane %v9300_v40, 1 }
0x1069   :  { %5134 = vmatpush.bf16.msrb.mxu2 %v7400_v9  ;;  %5162 = vmatpush.bf16.msrb.mxu3 %v7416_v46 }
0x106a   :  { %6410 = vmatmul.msk.bf16.vlgmr.msrb.gmra.mxu0 %vm117_vm1, %v8999_v62  ;;  %6411 = vmatmul.msk.bf16.vlgmr.msra.gmra.mxu2 %vm117_vm1, %v8999_v62 }
0x106b   :  { %6412 = vmatmul.msk.bf16.vlgmr.msra.gmra.mxu1 %vm117_vm1, %v8999_v62  ;;  %6413 = vmatmul.msk.bf16.vlgmr.msra.gmra.mxu3 %vm117_vm1, %v8999_v62  ;;  %v7414_v62 = vld [vmem:[%s9572_s14 + $0x4d0] sm:$0xff] }
0x106c   :  { %5121 = vmatpush.bf16.msra.mxu0 %v7391_v34  ;;  %5149 = vmatpush.bf16.msrb.mxu1 %v7407_v57  ;;  %v3623_v34 = vperm.slane %v9300_v40, 3 }
0x106d   :  { %5135 = vmatpush.bf16.msrb.mxu2 %v7399_v59  ;;  %5163 = vmatpush.bf16.msrb.mxu3 %v7415_v47 }
0x1070   :  { %5122 = vmatpush.bf16.msra.mxu0 %v7390_v42  ;;  %5150 = vmatpush.bf16.msrb.mxu1 %v7406_v0 }
0x1071   :  { %5136 = vmatpush.bf16.msrb.mxu2 %v7398_v60  ;;  %5164 = vmatpush.bf16.msrb.mxu3 %v7414_v62  ;;  %v7459_v60 = vld [vmem:[%s9572_s14 + $0x638] sm:$0xff] }
0x1074   :  { %5123 = vmatpush.bf16.msra.mxu0 %v7389_v41  ;;  %5151 = vmatpush.bf16.msrb.mxu1 %v7405_v8  ;;  %v7475_v8 = vld [vmem:[%s9572_s14 + $0x6b8] sm:$0xff] }
0x1075   :  { %5137 = vmatpush.bf16.msrb.mxu2 %v7397_v2  ;;  %5165 = vmatpush.bf16.msrb.mxu3 %v7413_v7 }
0x1078   :  { %5124 = vmatpush.bf16.msra.mxu0 %v7388_v10  ;;  %5152 = vmatpush.bf16.msrb.mxu1 %v7404_v11 }
0x1079   :  { %5138 = vmatpush.bf16.msrb.mxu2 %v7396_v13  ;;  %5166 = vmatpush.bf16.msrb.mxu3 %v7412_v5  ;;  %v7458_v5 = vld [vmem:[%s9572_s14 + $0x630] sm:$0xff] }
0x107c   :  { %5173 = vmatpush.bf16.msrb.mxu0 %v7427_v12  ;;  %5201 = vmatpush.bf16.msra.mxu1 %v7443_v58 }
0x107d   :  { %5187 = vmatpush.bf16.msra.mxu2 %v7435_v14  ;;  %5215 = vmatpush.bf16.msra.mxu3 %v7451_v3 }
0x1080   :  { %5174 = vmatpush.bf16.msrb.mxu0 %v7426_v16  ;;  %5202 = vmatpush.bf16.msra.mxu1 %v7442_v22  ;;  %v7474_v22 = vld [vmem:[%s9572_s14 + $0x6b0] sm:$0xff] }
0x1081   :  { %5188 = vmatpush.bf16.msra.mxu2 %v7434_v61  ;;  %5216 = vmatpush.bf16.msra.mxu3 %v7450_v17 }
0x1084   :  { %5175 = vmatpush.bf16.msrb.mxu0 %v7425_v19  ;;  %5203 = vmatpush.bf16.msra.mxu1 %v7441_v18  ;;  %v7467_v19 = vld [vmem:[%s9572_s14 + $0x678] sm:$0xff] }
0x1085   :  { %5189 = vmatpush.bf16.msra.mxu2 %v7433_v53  ;;  %5217 = vmatpush.bf16.msra.mxu3 %v7449_v20  ;;  %v3626_v20 = vperm.slane %v9300_v40, 6 }
0x1088   :  { %5176 = vmatpush.bf16.msrb.mxu0 %v7424_v55  ;;  %5204 = vmatpush.bf16.msra.mxu1 %v7440_v6  ;;  %v3624_v55 = vperm.slane %v9300_v40, 4  ;;  %v7483_v6 = vld [vmem:[%s9572_s14 + $0x6f8] sm:$0xff] }
0x1089   :  { %5190 = vmatpush.bf16.msra.mxu2 %v7432_v26  ;;  %5218 = vmatpush.bf16.msra.mxu3 %v7448_v27  ;;  %v7466_v27 = vld [vmem:[%s9572_s14 + $0x670] sm:$0xff] }
0x108c   :  { %5177 = vmatpush.bf16.msrb.mxu0 %v7423_v24  ;;  %5205 = vmatpush.bf16.msra.mxu1 %v7439_v25  ;;  %v7457_v24 = vld [vmem:[%s9572_s14 + $0x628] sm:$0xff] }
0x108d   :  { %5191 = vmatpush.bf16.msra.mxu2 %v7431_v4  ;;  %5219 = vmatpush.bf16.msra.mxu3 %v7447_v63  ;;  %v7473_v25 = vld [vmem:[%s9572_s14 + $0x6a8] sm:$0xff]  ;;  %v7482_v4 = vld [vmem:[%s9572_s14 + $0x6f0] sm:$0xff] }
0x1090   :  { %5178 = vmatpush.bf16.msrb.mxu0 %v7422_v28  ;;  %5206 = vmatpush.bf16.msra.mxu1 %v7438_v29 }
0x1091   :  { %5192 = vmatpush.bf16.msra.mxu2 %v7430_v32  ;;  %5220 = vmatpush.bf16.msra.mxu3 %v7446_v15  ;;  %v3625_v32 = vperm.slane %v9300_v40, 5 }
0x1094   :  { %5179 = vmatpush.bf16.msrb.mxu0 %v7421_v31  ;;  %5207 = vmatpush.bf16.msra.mxu1 %v7437_v48  ;;  %v7456_v48 = vld [vmem:[%s9572_s14 + $0x620] sm:$0xff] }
0x1095   :  { %5193 = vmatpush.bf16.msra.mxu2 %v7429_v37  ;;  %5221 = vmatpush.bf16.msra.mxu3 %v7445_v38  ;;  %v3627_v37 = vperm.slane %v9300_v40, 7  ;;  %v7455_v40 = vld [vmem:[%s9572_s14 + $0x618] sm:$0xff] }
0x1098   :  { %5180 = vmatpush.bf16.msrb.mxu0 %v7420_v49  ;;  %5208 = vmatpush.bf16.msra.mxu1 %v7436_v36  ;;  %v7472_v36 = vld [vmem:[%s9572_s14 + $0x6a0] sm:$0xff] }
0x1099   :  { %5194 = vmatpush.bf16.msra.mxu2 %v7428_v35  ;;  %5222 = vmatpush.bf16.msra.mxu3 %v7444_v39  ;;  %v7465_v35 = vld [vmem:[%s9572_s14 + $0x668] sm:$0xff] }
0x10b7   :  { %v3824_v1 = vpop.f32.mrf.mxu0 }
0x10b8   :  { %v3852_v43 = vpop.f32.mrf.mxu1  ;;  %v3825_v51 = vadd.f32 %v3824_v1, %v3620_v44 }
0x10b9   :  { %v3853_v54 = vadd.f32 %v3852_v43, %v3622_v45  ;;  %v7481_v43 = vld [vmem:[%s9572_s14 + $0x6e8] sm:$0xff] }
0x10ba   :  { %v4039_v59 = vmax.f32 %v3825_v51, 0.0 }
0x10bb   :  { %v4041_v42 = vmax.f32 %v3853_v54, 0.0 }
0x10bd   :  { %v3838_v23 = vpop.f32.mrf.mxu2 }
0x10be   :  { %v3866_v50 = vpop.f32.mrf.mxu3  ;;  %v3839_v62 = vadd.f32 %v3838_v23, %v3621_v30 }
0x10bf   :  { %v3826_v33 = vpop.f32.mrf.mxu0  ;;  %v3867_v2 = vadd.f32 %v3866_v50, %v3623_v34  ;;  %v7471_v50 = vld [vmem:[%s9572_s14 + $0x698] sm:$0xff] }
0x10c0   :  { %v3827_v9 = vadd.f32 %v3826_v33, %v3620_v44  ;;  %v3854_v46 = vpop.f32.mrf.mxu1  ;;  %v4040_v14 = vmax.f32 %v3839_v62, 0.0 }
0x10c1   :  { %v3855_v57 = vadd.f32 %v3854_v46, %v3622_v45  ;;  %v4042_v61 = vmax.f32 %v3867_v2, 0.0 }
0x10c2   :  { %v4055_v47 = vmax.f32 %v3827_v9, 0.0  ;;  %v7464_v9 = vld [vmem:[%s9572_s14 + $0x660] sm:$0xff] }
0x10c3   :  { %v4057_v0 = vmax.f32 %v3855_v57, 0.0  ;;  %v7480_v57 = vld [vmem:[%s9572_s14 + $0x6e0] sm:$0xff] }
0x10c4   :  { %v4330_v41 = vpack.c.bf16 %v4055_v47, %v4039_v59  ;;  %v9367_v47 = vld [vmem:[%s9574_s13 + $0x18] sm:$0xff] }
0x10c5   :  { %v4332_v7 = vpack.c.bf16 %v4057_v0, %v4041_v42  ;;  %v3840_v10 = vpop.f32.mrf.mxu2  ;;  %v7454_v0 = vld [vmem:[%s9572_s14 + $0x610] sm:$0xff] }
0x10c6   :  { %v3841_v11 = vadd.f32 %v3840_v10, %v3621_v30  ;;  %v3868_v12 = vpop.f32.mrf.mxu3  ;;  %5125 = vmatmul.bf16.vlgmr.msra.gmra.mxu0 %v4330_v41  ;;  %v7463_v10 = vld [vmem:[%s9572_s14 + $0x658] sm:$0xff] }
0x10c7   :  { %v3869_v58 = vadd.f32 %v3868_v12, %v3623_v34  ;;  %5153 = vmatmul.bf16.vlgmr.msrb.gmra.mxu1 %v4332_v7  ;;  %5229 = vmatpush.bf16.msra.mxu0 %v7459_v60  ;;  %v3880_v13 = vpop.f32.mrf.mxu0  ;;  %v3628_v12 = vperm.slane %v9367_v47, 0 }
0x10c8   :  { %v4056_v3 = vmax.f32 %v3841_v11, 0.0  ;;  %5257 = vmatpush.bf16.msrb.mxu1 %v7475_v8  ;;  %v3908_v16 = vpop.f32.mrf.mxu1  ;;  %v3881_v28 = vadd.f32 %v3880_v13, %v3624_v55  ;;  %v7470_v8 = vld [vmem:[%s9572_s14 + $0x690] sm:$0xff] }
0x10c9   :  { %v4058_v17 = vmax.f32 %v3869_v58, 0.0  ;;  %v3909_v63 = vadd.f32 %v3908_v16, %v3626_v20  ;;  %v7479_v58 = vld [vmem:[%s9572_s14 + $0x6d8] sm:$0xff] }
0x10ca   :  { %v4331_v18 = vpack.c.bf16 %v4056_v3, %v4040_v14  ;;  %v4043_v39 = vmax.f32 %v3881_v28, 0.0  ;;  %v7453_v14 = vld [vmem:[%s9572_s14 + $0x608] sm:$0xff] }
0x10cb   :  { %v4333_v53 = vpack.c.bf16 %v4058_v17, %v4042_v61  ;;  %5230 = vmatpush.bf16.msra.mxu0 %v7458_v5  ;;  %v4045_v44 = vmax.f32 %v3909_v63, 0.0  ;;  %v3630_v5 = vperm.slane %v9367_v47, 2  ;;  %v7469_v3 = vld [vmem:[%s9572_s14 + $0x688] sm:$0xff] }
0x10cc   :  { %5258 = vmatpush.bf16.msrb.mxu1 %v7474_v22  ;;  %5139 = vmatmul.bf16.vlgmr.msrb.gmra.mxu2 %v4331_v18  ;;  %v7462_v22 = vld [vmem:[%s9572_s14 + $0x650] sm:$0xff] }
0x10cd   :  { %5167 = vmatmul.bf16.vlgmr.msrb.gmra.mxu3 %v4333_v53  ;;  %5243 = vmatpush.bf16.msrb.mxu2 %v7467_v19  ;;  %v3894_v26 = vpop.f32.mrf.mxu2  ;;  %v7478_v19 = vld [vmem:[%s9572_s14 + $0x6d0] sm:$0xff]  ;;  %v3629_v53 = vperm.slane %v9367_v47, 1 }
0x10ce   :  { %5271 = vmatpush.bf16.msrb.mxu3 %v7483_v6  ;;  %v3922_v29 = vpop.f32.mrf.mxu3  ;;  %v3895_v23 = vadd.f32 %v3894_v26, %v3625_v32  ;;  %v7452_v6 = vld [vmem:[%s9572_s14 + $0x600] sm:$0xff]  ;;  %v7491_v26 = vld [vmem:[%s9572_s14 + $0x738] sm:$0xff] }
0x10cf   :  { %5231 = vmatpush.bf16.msra.mxu0 %v7457_v24  ;;  %v3882_v31 = vpop.f32.mrf.mxu0  ;;  %v3923_v54 = vadd.f32 %v3922_v29, %v3627_v37  ;;  %v7507_v29 = vld [vmem:[%s9572_s14 + $0x7b8] sm:$0xff] }
0x10d0   :  { %5259 = vmatpush.bf16.msrb.mxu1 %v7473_v25  ;;  %v3883_v15 = vadd.f32 %v3882_v31, %v3624_v55  ;;  %v3910_v49 = vpop.f32.mrf.mxu1  ;;  %v4044_v60 = vmax.f32 %v3895_v23, 0.0  ;;  %v7468_v25 = vld [vmem:[%s9572_s14 + $0x680] sm:$0xff]  ;;  %v7499_v23 = vld [vmem:[%s9572_s14 + $0x778] sm:$0xff] }
0x10d1   :  { %v3911_v38 = vadd.f32 %v3910_v49, %v3626_v20  ;;  %5244 = vmatpush.bf16.msrb.mxu2 %v7466_v27  ;;  %v4046_v2 = vmax.f32 %v3923_v54, 0.0  ;;  %v3631_v27 = vperm.slane %v9367_v47, 3 }
0x10d2   :  { %v4059_v1 = vmax.f32 %v3883_v15, 0.0  ;;  %5272 = vmatpush.bf16.msrb.mxu3 %v7482_v4  ;;  %v7461_v4 = vld [vmem:[%s9572_s14 + $0x648] sm:$0xff] }
0x10d3   :  { %v4061_v45 = vmax.f32 %v3911_v38, 0.0  ;;  %5232 = vmatpush.bf16.msra.mxu0 %v7456_v48  ;;  %v7477_v48 = vld [vmem:[%s9572_s14 + $0x6c8] sm:$0xff] }
0x10d4   :  { %v4334_v51 = vpack.c.bf16 %v4059_v1, %v4043_v39  ;;  %5260 = vmatpush.bf16.msrb.mxu1 %v7472_v36  ;;  %v7506_v1 = vld [vmem:[%s9572_s14 + $0x7b0] sm:$0xff] }
0x10d5   :  { %v4336_v33 = vpack.c.bf16 %v4061_v45, %v4045_v44  ;;  %5245 = vmatpush.bf16.msrb.mxu2 %v7465_v35  ;;  %v3896_v30 = vpop.f32.mrf.mxu2 }
0x10d6   :  { %5273 = vmatpush.bf16.msrb.mxu3 %v7481_v43  ;;  %v3897_v46 = vadd.f32 %v3896_v30, %v3625_v32  ;;  %v3924_v34 = vpop.f32.mrf.mxu3  ;;  %5181 = vmatmul.bf16.vlgmr.msrb.gmra.mxu0 %v4334_v51  ;;  %v7460_v43 = vld [vmem:[%s9572_s14 + $0x640] sm:$0xff]  ;;  %v7489_v30 = vld [vmem:[%s9572_s14 + $0x728] sm:$0xff] }
0x10d7   :  { %v3925_v59 = vadd.f32 %v3924_v34, %v3627_v37  ;;  %5209 = vmatmul.bf16.vlgmr.msra.gmra.mxu1 %v4336_v33  ;;  %5233 = vmatpush.bf16.msra.mxu0 %v7455_v40  ;;  %v3936_v42 = vpop.f32.mrf.mxu0  ;;  %v7490_v37 = vld [vmem:[%s9572_s14 + $0x730] sm:$0xff]  ;;  %v7476_v40 = vld [vmem:[%s9572_s14 + $0x6c0] sm:$0xff]  ;;  %v7505_v34 = vld [vmem:[%s9572_s14 + $0x7a8] sm:$0xff] }
0x10d8   :  { %v4060_v62 = vmax.f32 %v3897_v46, 0.0  ;;  %5261 = vmatpush.bf16.msrb.mxu1 %v7471_v50  ;;  %v3964_v41 = vpop.f32.mrf.mxu1  ;;  %v3937_v61 = vadd.f32 %v3936_v42, %v3628_v12  ;;  %v7515_v50 = vld [vmem:[%s9572_s14 + $0x7f8] sm:$0xff] }
0x10d9   :  { %v4062_v7 = vmax.f32 %v3925_v59, 0.0  ;;  %5246 = vmatpush.bf16.msrb.mxu2 %v7464_v9  ;;  %v3965_v18 = vadd.f32 %v3964_v41, %v3630_v5  ;;  %v7498_v59 = vld [vmem:[%s9572_s14 + $0x770] sm:$0xff] }
0x10da   :  { %v4335_v11 = vpack.c.bf16 %v4060_v62, %v4044_v60  ;;  %5274 = vmatpush.bf16.msrb.mxu3 %v7480_v57  ;;  %v4047_v63 = vmax.f32 %v3937_v61, 0.0  ;;  %v7488_v62 = vld [vmem:[%s9572_s14 + $0x720] sm:$0xff]  ;;  %v3632_v61 = vperm.slane %v9367_v47, 4 }
0x10db   :  { %v4337_v13 = vpack.c.bf16 %v4062_v7, %v4046_v2  ;;  %5234 = vmatpush.bf16.msra.mxu0 %v7454_v0  ;;  %v4049_v32 = vmax.f32 %v3965_v18, 0.0  ;;  %v7514_v0 = vld [vmem:[%s9572_s14 + $0x7f0] sm:$0xff]  ;;  %v7497_v2 = vld [vmem:[%s9572_s14 + $0x768] sm:$0xff]  ;;  %v3634_v18 = vperm.slane %v9367_v47, 6 }
0x10dc   :  { %5262 = vmatpush.bf16.msrb.mxu1 %v7470_v8  ;;  %5195 = vmatmul.bf16.vlgmr.msra.gmra.mxu2 %v4335_v11  ;;  %v7504_v8 = vld [vmem:[%s9572_s14 + $0x7a0] sm:$0xff]  ;;  %v7513_v7 = vld [vmem:[%s9572_s14 + $0x7e8] sm:$0xff]  ;;  %v7503_v11 = vld [vmem:[%s9572_s14 + $0x798] sm:$0xff] }
0x10dd   :  { %5223 = vmatmul.bf16.vlgmr.msra.gmra.mxu3 %v4337_v13  ;;  %5247 = vmatpush.bf16.msrb.mxu2 %v7463_v10  ;;  %v3950_v16 = vpop.f32.mrf.mxu2  ;;  %v7487_v10 = vld [vmem:[%s9572_s14 + $0x718] sm:$0xff] }
0x10de   :  { %5275 = vmatpush.bf16.msrb.mxu3 %v7479_v58  ;;  %v3978_v17 = vpop.f32.mrf.mxu3  ;;  %v3951_v49 = vadd.f32 %v3950_v16, %v3629_v53  ;;  %v7496_v58 = vld [vmem:[%s9572_s14 + $0x760] sm:$0xff] }
0x10df   :  { %5235 = vmatpush.bf16.msra.mxu0 %v7453_v14  ;;  %v3938_v55 = vpop.f32.mrf.mxu0  ;;  %v3979_v38 = vadd.f32 %v3978_v17, %v3631_v27  ;;  %v7486_v14 = vld [vmem:[%s9572_s14 + $0x710] sm:$0xff] }
0x10e0   :  { %5263 = vmatpush.bf16.msrb.mxu1 %v7469_v3  ;;  %v3939_v20 = vadd.f32 %v3938_v55, %v3628_v12  ;;  %v3966_v24 = vpop.f32.mrf.mxu1  ;;  %v4048_v54 = vmax.f32 %v3951_v49, 0.0  ;;  %v7502_v3 = vld [vmem:[%s9572_s14 + $0x790] sm:$0xff]  ;;  %v7485_v55 = vld [vmem:[%s9572_s14 + $0x708] sm:$0xff] }
0x10e1   :  { %v3967_v28 = vadd.f32 %v3966_v24, %v3630_v5  ;;  %5248 = vmatpush.bf16.msrb.mxu2 %v7462_v22  ;;  %v4050_v9 = vmax.f32 %v3979_v38, 0.0  ;;  %v7512_v5 = vld [vmem:[%s9572_s14 + $0x7e0] sm:$0xff]  ;;  %v7495_v22 = vld [vmem:[%s9572_s14 + $0x758] sm:$0xff]  ;;  %v7494_v24 = vld [vmem:[%s9572_s14 + $0x750] sm:$0xff] }
0x10e2   :  { %v4063_v31 = vmax.f32 %v3939_v20, 0.0  ;;  %5276 = vmatpush.bf16.msrb.mxu3 %v7478_v19  ;;  %v7511_v19 = vld [vmem:[%s9572_s14 + $0x7d8] sm:$0xff]  ;;  %v7493_v49 = vld [vmem:[%s9572_s14 + $0x748] sm:$0xff] }
0x10e3   :  { %v4065_v15 = vmax.f32 %v3967_v28, 0.0  ;;  %5236 = vmatpush.bf16.msra.mxu0 %v7452_v6  ;;  %v7509_v38 = vld [vmem:[%s9572_s14 + $0x7c8] sm:$0xff] }
0x10e4   :  { %v4338_v36 = vpack.c.bf16 %v4063_v31, %v4047_v63  ;;  %5264 = vmatpush.bf16.msrb.mxu1 %v7468_v25 }
0x10e5   :  { %v4340_v35 = vpack.c.bf16 %v4065_v15, %v4049_v32  ;;  %5249 = vmatpush.bf16.msrb.mxu2 %v7461_v4  ;;  %v3952_v39 = vpop.f32.mrf.mxu2  ;;  %v3633_v4 = vperm.slane %v9367_v47, 5  ;;  %v3635_v32 = vperm.slane %v9367_v47, 7 }
0x10e6   :  { %5277 = vmatpush.bf16.msrb.mxu3 %v7477_v48  ;;  %v3953_v44 = vadd.f32 %v3952_v39, %v3629_v53  ;;  %v3980_v45 = vpop.f32.mrf.mxu3  ;;  %5237 = vmatmul.bf16.vlgmr.msra.gmra.mxu0 %v4338_v36  ;;  %v7501_v53 = vld [vmem:[%s9572_s14 + $0x788] sm:$0xff]  ;;  %v7500_v48 = vld [vmem:[%s9572_s14 + $0x780] sm:$0xff] }
0x10e7   :  { %5285 = vmatpush.bf16.msrb.mxu0 %v7491_v26  ;;  %v3981_v51 = vadd.f32 %v3980_v45, %v3631_v27  ;;  %5265 = vmatmul.bf16.vlgmr.msrb.gmra.mxu1 %v4340_v35  ;;  %v3992_v60 = vpop.f32.mrf.mxu0  ;;  %v7510_v26 = vld [vmem:[%s9572_s14 + $0x7d0] sm:$0xff]  ;;  %v7492_v45 = vld [vmem:[%s9572_s14 + $0x740] sm:$0xff] }
0x10e8   :  { %5313 = vmatpush.bf16.msra.mxu1 %v7507_v29  ;;  %v4064_v33 = vmax.f32 %v3953_v44, 0.0  ;;  %v4020_v41 = vpop.f32.mrf.mxu1  ;;  %v3993_v25 = vadd.f32 %v3992_v60, %v3632_v61  ;;  %v7484_v29 = vld [vmem:[%s9572_s14 + $0x700] sm:$0xff] }
0x10e9   :  { %v4066_v46 = vmax.f32 %v3981_v51, 0.0  ;;  %5250 = vmatpush.bf16.msrb.mxu2 %v7460_v43  ;;  %v4021_v27 = vadd.f32 %v4020_v41, %v3634_v18 }
0x10ea   :  { %v4339_v57 = vpack.c.bf16 %v4064_v33, %v4048_v54  ;;  %5278 = vmatpush.bf16.msrb.mxu3 %v7476_v40  ;;  %v4051_v36 = vmax.f32 %v3993_v25, 0.0 }
0x10eb   :  { %5286 = vmatpush.bf16.msrb.mxu0 %v7490_v37  ;;  %v4341_v42 = vpack.c.bf16 %v4066_v46, %v4050_v9  ;;  %v4053_v35 = vmax.f32 %v4021_v27, 0.0 }
0x10ec   :  { %5314 = vmatpush.bf16.msra.mxu1 %v7506_v1  ;;  %5251 = vmatmul.bf16.vlgmr.msrb.gmra.mxu2 %v4339_v57 }
0x10ed   :  { %5299 = vmatpush.bf16.msra.mxu2 %v7499_v23  ;;  %5279 = vmatmul.bf16.vlgmr.msrb.gmra.mxu3 %v4341_v42  ;;  %v4006_v12 = vpop.f32.mrf.mxu2  ;;  %v7508_v23 = vld [vmem:[%s9572_s14 + $0x7c0] sm:$0xff] }
0x10ee   :  { %5327 = vmatpush.bf16.msra.mxu3 %v7515_v50  ;;  %v4034_v13 = vpop.f32.mrf.mxu3  ;;  %v4007_v1 = vadd.f32 %v4006_v12, %v3633_v4 }
0x10ef   :  { %5287 = vmatpush.bf16.msrb.mxu0 %v7489_v30  ;;  %v3994_v16 = vpop.f32.mrf.mxu0  ;;  %v4035_v47 = vadd.f32 %v4034_v13, %v3635_v32 }
0x10f0   :  { %5315 = vmatpush.bf16.msra.mxu1 %v7505_v34  ;;  %v4022_v17 = vpop.f32.mrf.mxu1  ;;  %v3995_v6 = vadd.f32 %v3994_v16, %v3632_v61  ;;  %v4052_v50 = vmax.f32 %v4007_v1, 0.0 }
0x10f1   :  { %5300 = vmatpush.bf16.msra.mxu2 %v7498_v59  ;;  %v4023_v20 = vadd.f32 %v4022_v17, %v3634_v18  ;;  %v4054_v54 = vmax.f32 %v4035_v47, 0.0 }
0x10f2   :  { %5328 = vmatpush.bf16.msra.mxu3 %v7514_v0  ;;  %v4067_v63 = vmax.f32 %v3995_v6, 0.0 }
0x10f3   :  { %5288 = vmatpush.bf16.msrb.mxu0 %v7488_v62  ;;  %v4069_v15 = vmax.f32 %v4023_v20, 0.0  ;;  %v7578_v62 = vld [vmem:[%s9573_s15 + $0x1] ss:$0 sm:$0xff] }
0x10f4   :  { %5316 = vmatpush.bf16.msra.mxu1 %v7504_v8  ;;  %v4342_v43 = vpack.c.bf16 %v4067_v63, %v4051_v36 }
0x10f5   :  { %5301 = vmatpush.bf16.msra.mxu2 %v7497_v2  ;;  %v4008_v28 = vpop.f32.mrf.mxu2  ;;  %v4344_v44 = vpack.c.bf16 %v4069_v15, %v4053_v35 }
0x10f6   :  { %5329 = vmatpush.bf16.msra.mxu3 %v7513_v7  ;;  %v4036_v31 = vpop.f32.mrf.mxu3  ;;  %v4009_v37 = vadd.f32 %v4008_v28, %v3633_v4 }
0x10f7   :  { %5289 = vmatpush.bf16.msrb.mxu0 %v7487_v10  ;;  %v4037_v39 = vadd.f32 %v4036_v31, %v3635_v32 }
0x10f8   :  { %5317 = vmatpush.bf16.msra.mxu1 %v7503_v11  ;;  %v4068_v40 = vmax.f32 %v4009_v37, 0.0 }
0x10f9   :  { %5302 = vmatpush.bf16.msra.mxu2 %v7496_v58  ;;  %v4070_v51 = vmax.f32 %v4037_v39, 0.0 }
0x10fa   :  { %5330 = vmatpush.bf16.msra.mxu3 %v7512_v5  ;;  %v4343_v33 = vpack.c.bf16 %v4068_v40, %v4052_v50 }
0x10fb   :  { %5290 = vmatpush.bf16.msrb.mxu0 %v7486_v14  ;;  %v4345_v30 = vpack.c.bf16 %v4070_v51, %v4054_v54 }
0x10fc   :  { %5318 = vmatpush.bf16.msra.mxu1 %v7502_v3 }
0x10fd   :  { %5303 = vmatpush.bf16.msra.mxu2 %v7495_v22 }
0x10fe   :  { %5331 = vmatpush.bf16.msra.mxu3 %v7511_v19 }
0x10ff   :  { %5291 = vmatpush.bf16.msrb.mxu0 %v7485_v55 }
0x1100   :  { %5319 = vmatpush.bf16.msra.mxu1 %v7501_v53 }
0x1101   :  { %5304 = vmatpush.bf16.msra.mxu2 %v7494_v24 }
0x1102   :  { %5332 = vmatpush.bf16.msra.mxu3 %v7510_v26 }
0x1103   :  { %5292 = vmatpush.bf16.msrb.mxu0 %v7484_v29 }
0x1104   :  { %5320 = vmatpush.bf16.msra.mxu1 %v7500_v48 }
0x1105   :  { %5305 = vmatpush.bf16.msra.mxu2 %v7493_v49 }
0x1106   :  { %5333 = vmatpush.bf16.msra.mxu3 %v7509_v38  ;;  %5293 = vmatmul.bf16.vlgmr.msrb.gmra.mxu0 %v4342_v43 }
0x1107   :  { %5321 = vmatmul.bf16.vlgmr.msra.gmra.mxu1 %v4344_v44 }
0x1109   :  { %5306 = vmatpush.bf16.msra.mxu2 %v7492_v45 }
0x110a   :  { %5334 = vmatpush.bf16.msra.mxu3 %v7508_v23 }
0x110c   :  { %5307 = vmatmul.bf16.vlgmr.msra.gmra.mxu2 %v4343_v33 }
0x110d   :  { %5335 = vmatmul.bf16.vlgmr.msra.gmra.mxu3 %v4345_v30 }
0x1143   :  { %v5126_v9 = vpop.f32.mrf.mxu0 }
0x1144   :  { %v5154_v46 = vpop.f32.mrf.mxu1  ;;  %v5127_v8 = vadd.f32 %v7578_v62, %v5126_v9 }
0x114b   :  { %v5128_v59 = vpop.f32.mrf.mxu0 }
0x114c   :  { %v5156_v42 = vpop.f32.mrf.mxu1  ;;  %v5129_v13 = vadd.f32 %v7578_v62, %v5128_v59 }
0x114f   :  { %v5140_v34 = vpop.f32.mrf.mxu2 }
0x1150   :  { %v5168_v57 = vpop.f32.mrf.mxu3  ;;  %v5141_v2 = vadd.f32 %v5140_v34, %v5127_v8 }
0x1152   :  { %v5155_v12 = vadd.f32 %v5154_v46, %v5141_v2 }
0x1153   :  { %v5182_v41 = vpop.f32.mrf.mxu0 }
0x1154   :  { %v5210_v7 = vpop.f32.mrf.mxu1  ;;  %v5169_v5 = vadd.f32 %v5168_v57, %v5155_v12 }
0x1156   :  { %v5183_v22 = vadd.f32 %v5182_v41, %v5169_v5  ;;  %v5412_v5 = vld [vmem:[%s9577_s18 + $0x18] sm:$0xff] }
0x1157   :  { %v5142_v0 = vpop.f32.mrf.mxu2  ;;  %5432 = vmatpush.msra.mxu0 %v5412_v5 }
0x1158   :  { %v5170_v60 = vpop.f32.mrf.mxu3  ;;  %v5143_v14 = vadd.f32 %v5142_v0, %v5129_v13 }
0x115a   :  { %v5157_v61 = vadd.f32 %v5156_v42, %v5143_v14  ;;  %v5411_v14 = vld [vmem:[%s9577_s18 + $0x10] sm:$0xff] }
0x115b   :  { %v5184_v58 = vpop.f32.mrf.mxu0  ;;  %5433 = vmatpush.msra.mxu0 %v5411_v14 }
0x115c   :  { %v5212_v3 = vpop.f32.mrf.mxu1  ;;  %v5171_v55 = vadd.f32 %v5170_v60, %v5157_v61 }
0x115e   :  { %v5185_v53 = vadd.f32 %v5184_v58, %v5171_v55 }
0x115f   :  { %v5196_v10 = vpop.f32.mrf.mxu2 }
0x1160   :  { %v5224_v11 = vpop.f32.mrf.mxu3  ;;  %v5197_v19 = vadd.f32 %v5196_v10, %v5183_v22  ;;  %v5409_v22 = vld [vmem:[%s9577_s18] sm:$0xff] }
0x1162   :  { %v5211_v6 = vadd.f32 %v5210_v7, %v5197_v19  ;;  %v29_v19 = vstv %s9579_s20 }
0x1163   :  { %v5238_v18 = vpop.f32.mrf.mxu0  ;;  %30 = vst [vmem:[#allocation3] sm:$0x1] %v29_v19 }
0x1164   :  { %v5266_v20 = vpop.f32.mrf.mxu1  ;;  %v5225_v25 = vadd.f32 %v5224_v11, %v5211_v6 }
0x1166   :  { %v5239_v29 = vadd.f32 %v5238_v18, %v5225_v25  ;;  %v31_v18 = vstv %s9580_s21 }
0x1167   :  { %v5198_v16 = vpop.f32.mrf.mxu2  ;;  %32 = vst [vmem:[#allocation4] sm:$0x1] %v31_v18 }
0x1168   :  { %v5226_v17 = vpop.f32.mrf.mxu3  ;;  %v5199_v26 = vadd.f32 %v5198_v16, %v5185_v53  ;;  %v5410_v16 = vld [vmem:[%s9577_s18 + $0x8] sm:$0xff] }
0x1169   :  { %5434 = vmatpush.msra.mxu0 %v5410_v16 }
0x116a   :  { %v5213_v4 = vadd.f32 %v5212_v3, %v5199_v26 }
0x116b   :  { %v5240_v28 = vpop.f32.mrf.mxu0  ;;  %5435 = vmatpush.msra.mxu0 %v5409_v22 }
0x116c   :  { %v5227_v31 = vadd.f32 %v5226_v17, %v5213_v4  ;;  %v5268_v48 = vpop.f32.mrf.mxu1  ;;  %v27_v17 = vstv %s9578_s19 }
0x116d   :  { %28 = vst [vmem:[#allocation2] sm:$0x1] %v27_v17 }
0x116e   :  { %v5241_v37 = vadd.f32 %v5240_v28, %v5227_v31 }
0x116f   :  { %v5252_v24 = vpop.f32.mrf.mxu2 }
0x1170   :  { %v5280_v27 = vpop.f32.mrf.mxu3  ;;  %v5253_v63 = vadd.f32 %v5252_v24, %v5239_v29 }
0x1172   :  { %v5267_v15 = vadd.f32 %v5266_v20, %v5253_v63 }
0x1174   :  { %v5281_v38 = vadd.f32 %v5280_v27, %v5267_v15 }
0x1177   :  { %v5254_v32 = vpop.f32.mrf.mxu2 }
0x1178   :  { %v5282_v49 = vpop.f32.mrf.mxu3  ;;  %v5255_v35 = vadd.f32 %v5254_v32, %v5241_v37 }
0x117a   :  { %v5269_v47 = vadd.f32 %v5268_v48, %v5255_v35 }
0x117c   :  { %v5283_v51 = vadd.f32 %v5282_v49, %v5269_v47 }
0x1183   :  { %v5294_v36 = vpop.f32.mrf.mxu0 }
0x1184   :  { %v5295_v39 = vadd.f32 %v5294_v36, %v5281_v38  ;;  %v5322_v1 = vpop.f32.mrf.mxu1  ;;  %v7580_v36 = vld [vmem:[%s9620_s30 + $0x1] ss:$0 sm:$0xff] }
0x118b   :  { %v5296_v23 = vpop.f32.mrf.mxu0 }
0x118c   :  { %v5297_v54 = vadd.f32 %v5296_v23, %v5283_v51  ;;  %v5324_v34 = vpop.f32.mrf.mxu1  ;;  %v7582_v23 = vld [vmem:[#allocation3] ss:$0 sm:$0xff] }
0x118f   :  { %v5308_v43 = vpop.f32.mrf.mxu2 }
0x1190   :  { %v5309_v44 = vadd.f32 %v5308_v43, %v5295_v39  ;;  %v5336_v45 = vpop.f32.mrf.mxu3 }
0x1192   :  { %v5323_v40 = vadd.f32 %v5322_v1, %v5309_v44 }
0x1194   :  { %v5337_v50 = vadd.f32 %v5336_v45, %v5323_v40  ;;  %v7689_v45 = vmov 0   ;;  %v7581_v40 = vld [vmem:[#allocation2] ss:$0 sm:$0xff] }
0x1195   :  { %7562 = vset.pattern.permute.xlu1 %v7689_v45  ;;  %7563 = vset.pattern.permute.xlu0 %v7689_v45 }
0x1196   :  { %v5341_v33 = vadd.f32 %v5337_v50, %v8984_v52 }
0x1197   :  { %v5310_v30 = vpop.f32.mrf.mxu2 }
0x1198   :  { %v5311_v9 = vadd.f32 %v5310_v30, %v5297_v54  ;;  %v5347_v46 = vsel %vm117_vm1, %v5341_v33, 0.0  ;;  %v5338_v59 = vpop.f32.mrf.mxu3  ;;  %v7583_v54 = vld [vmem:[#allocation4] ss:$0 sm:$0xff] }
0x1199   :  { %5348 = vadd.xlane.f32.xlu0 %v5347_v46 }
0x119a   :  { %v5325_v57 = vadd.f32 %v5324_v34, %v5311_v9 }
0x119c   :  { %v5339_v42 = vadd.f32 %v5338_v59, %v5325_v57 }
0x119e   :  { %v5342_v0 = vadd.f32 %v5339_v42, %v8986_v56 }
0x11a0   :  { %v5350_v60 = vsel %vm117_vm1, %v5342_v0, 0.0 }
0x11a1   :  { %5351 = vadd.xlane.f32.xlu1 %v5350_v60 }
0x120c   :  { %v5349_v62 = vpop.xlane.xlu0 %5348 }
0x120d   :  { %v5353_v41 = vmul.f32 %v5349_v62, %v7826_v21 }
0x120f   :  { %v5355_v8 = vsub.f32 %v5341_v33, %v5353_v41 }
0x1211   :  { %v5357_v2 = vmul.f32 %v5355_v8, %v5355_v8 }
0x1213   :  { %v5359_v52 = vsel %vm117_vm1, %v5357_v2, 0.0 }
0x1214   :  { %v5352_v7 = vpop.xlane.xlu1 %5351  ;;  %5360 = vadd.xlane.f32.xlu2 %v5359_v52 }
0x1215   :  { %v5354_v10 = vmul.f32 %v5352_v7, %v7826_v21 }
0x1217   :  { %v5356_v11 = vsub.f32 %v5342_v0, %v5354_v10 }
0x1219   :  { %v5358_v12 = vmul.f32 %v5356_v11, %v5356_v11 }
0x121b   :  { %v5362_v58 = vsel %vm117_vm1, %v5358_v12, 0.0 }
0x121c   :  { %5363 = vadd.xlane.f32.xlu0 %v5362_v58 }
0x1287   :  { %v5361_v56 = vpop.xlane.xlu2 %5360 }
0x1288   :  { %v5365_v13 = vmul.f32 %v5361_v56, %v7826_v21 }
0x128a   :  { %v5367_v3 = vadd.f32 1e-05, %v5365_v13 }
0x128c   :  { %7666 = vrsqrt.f32 %v5367_v3  ;;  %vm5375_vm3 = vweird.f32 %v5367_v3 }
0x128f   :  { %v5364_v61 = vpop.xlane.xlu0 %5363 }
0x1290   :  { %v5366_v55 = vmul.f32 %v5364_v61, %v7826_v21  ;;  %v7579_v21 = vld [vmem:[%s9575_s16 + $0x1] ss:$0 sm:$0xff] }
0x1292   :  { %v7667_v6 = vpop.eup %7666  ;;  %v5368_v53 = vadd.f32 1e-05, %v5366_v55 }
0x1293   :  { %v5370_v20 = vmul.f32 %v7667_v6, %v5367_v3  ;;  %vm5376_vm15 = vweird.f32 %v7667_v6 }
0x1294   :  { %7668 = vrsqrt.f32 %v5368_v53  ;;  %vm5377_vm4 = vmor %vm5375_vm3, %vm5376_vm15  ;;  %vm5385_vm6 = vweird.f32 %v5368_v53 }
0x1295   :  { %v5371_v24 = vmul.f32 %v7667_v6, %v5370_v20 }
0x1297   :  { %v5372_v25 = vmul.f32 0.5, %v5371_v24 }
0x1299   :  { %v5373_v26 = vsub.f32 1.5, %v5372_v25 }
0x129a   :  { %v7669_v27 = vpop.eup %7668 }
0x129b   :  { %v5374_v28 = vmul.f32 %v7667_v6, %v5373_v26  ;;  %v5380_v29 = vmul.f32 %v7669_v27, %v5368_v53  ;;  %vm5386_vm5 = vweird.f32 %v7669_v27 }
0x129c   :  { %vm5387_vm7 = vmor %vm5385_vm6, %vm5386_vm5 }
0x129d   :  { %v5378_v4 = vsel %vm5377_vm4, %v7667_v6, %v5374_v28  ;;  %v5381_v63 = vmul.f32 %v7669_v27, %v5380_v29 }
0x129e   :  { %v5389_v48 = vmul.f32 %v5378_v4, %v5355_v8 }
0x129f   :  { %v5382_v31 = vmul.f32 0.5, %v5381_v63 }
0x12a0   :  { %v5394_v49 = vmul.f32 %v7579_v21, %v5389_v48 }
0x12a1   :  { %v5383_v32 = vsub.f32 1.5, %v5382_v31 }
0x12a2   :  { %v5399_v39 = vadd.f32 %v7580_v36, %v5394_v49 }
0x12a3   :  { %v5384_v15 = vmul.f32 %v7669_v27, %v5383_v32 }
0x12a4   :  { %v5402_v43 = vrot.slane %v5399_v39, 7 }
0x12a5   :  { %v5388_v37 = vsel %vm5387_vm7, %v7669_v27, %v5384_v15 }
0x12a6   :  { %v5390_v38 = vmul.f32 %v5388_v37, %v5356_v11 }
0x12a8   :  { %v5395_v35 = vmul.f32 %v7579_v21, %v5390_v38 }
0x12aa   :  { %v5400_v1 = vadd.f32 %v7580_v36, %v5395_v35 }
0x12ac   :  { %v5405_v47 = vrot.slane %v5400_v1, 6 }
0x12ae   :  { %v5408_v44 = vsel %vm5407_vm8, %v5402_v43, %v5405_v47 }
0x12af   :  { %7185 = vmatmul.msk.f32.vlgmr.msra.gmra.mxu0 %vm117_vm1, %v5408_v44 }
0x132c   :  { %v5437_v51 = vpop.f32.mrf.mxu0 }
0x132d   :  { %v5438_v50 = vadd.f32 %v7581_v40, %v5437_v51 }
0x132f   :  { %v5444_v33 = vmul.f32 %v7582_v23, %v5438_v50 }
0x1331   :  { %v5449_v30 = vadd.f32 %v7583_v54, %v5444_v33 }
0x1333   :  { %v7186_v9 = vmul.f32 -1.442695, %v5449_v30 }
0x1335   :  { %7670 = vpow2.f32 %v7186_v9 }
0x133b   :  { %v7671_v46 = vpop.eup %7670 }
0x133c   :  { %v5453_v34 = vadd.f32 1.0, %v7671_v46 }
0x133e   :  { %7672 = vrcp.f32 %v5453_v34  ;;  %v5465_v0 = vand.u32 2147483648, %v5453_v34  ;;  %v5463_v62 = vand.u32 2147483647, %v5453_v34  ;;  %vm5459_vm10 = vweird.f32 %v5453_v34 }
0x1340   :  { %v5466_v8 = vor.u32 1.1754944e-38, %v5465_v0  ;;  %vm5464_vm0 = vcmp.eq.f32.partialorder %v5463_v62, 8.507059e+37 }
0x1344   :  { %v7673_v57 = vpop.eup %7672 }
0x1345   :  { %v5455_v59 = vmul.f32 %v7673_v57, %v5453_v34  ;;  %vm5460_vm1 = vweird.f32 %v7673_v57 }
0x1346   :  { %vm5461_vm11 = vmor %vm5459_vm10, %vm5460_vm1 }
0x1347   :  { %v5456_v42 = vsub.f32 1.0, %v5455_v59 }
0x1349   :  { %v5457_v60 = vmul.f32 %v7673_v57, %v5456_v42 }
0x134b   :  { %v5458_v41 = vadd.f32 %v7673_v57, %v5457_v60 }
0x134d   :  { %v5462_v2 = vsel %vm5461_vm11, %v7673_v57, %v5458_v41 }
0x134e   :  { %v5467_v52 = vsel %vm5464_vm0, %v5466_v8, %v5462_v2 }
0x134f   :  { %5471 = vperm.xlu1 %7562, %v5467_v52  }
0x13c1   :  { %v5472_v7 = vpop.permute.xlu1 %5471 }
0x13c2   :  { %5474 = vst [vmem:[%s9581_s22] sm:$0x3] %v5472_v7 }

</bundles_post_ra>
